<compile_context>
chip_gen: v7x
topology: tpu7x:2x2x1
jax: 0.10.0
libtpu: 0.0.40
codegen_flags: <defaults>
</compile_context>

<pallas_src>
import functools
import math

import jax
import jax.numpy as jnp
from jax.experimental import pallas as pl
from jax.experimental.pallas import tpu as pltpu

# Make the pure-JAX reference (and the fp32 kernel path) use true fp32 matmuls
# so the tight-tolerance check below is meaningful on TPU.
jax.config.update("jax_default_matmul_precision", "highest")


# ----------------------------------------------------------------------------
# Fused Pallas kernel: input projection + PE, all encoder layers, output heads.
# ----------------------------------------------------------------------------
def _anomaly_transformer_kernel(
    x_ref, w_in_ref, pe_ref,
    wqkv_ref, wo_ref, bvec_ref, w1_ref, b1_ref, w2_ref,
    w_head_ref, b_head_ref, ws2_ref,
    *out_and_scratch,
    n_heads, return_attention, return_hidden, resident_weights,
    compute_dtype, ln_eps=1e-5,
):
    outs = list(out_and_scratch)
    h_vmem, assoc_vmem = outs[-2], outs[-1]
    outs = outs[:-2]
    it = iter(outs)
    head_ref = next(it)          # (1, S, input_dim + d_half) fused head slab
    score_ref = next(it)         # (1, 1, S)
    assoc_ref = next(it)         # (1, 1, S)
    hid_ref = next(it) if return_hidden else None
    attn_ref = next(it) if return_attention else None

    l = pl.program_id(1)
    n_layers = pl.num_programs(1)
    cdt = compute_dtype
    exact = jnp.dtype(cdt) == jnp.dtype(jnp.float32)

    # ---- first layer step: input projection + positional encoding, reset acc ----
    @pl.when(l == 0)
    def _():
        x_in = x_ref[0].astype(cdt)                                   # (S, in)
        h_vmem[...] = (
            jnp.dot(x_in, w_in_ref[...], preferred_element_type=jnp.float32)
            + pe_ref[...])                                            # pe has b_in folded in
        assoc_vmem[...] = jnp.zeros_like(assoc_vmem)

    x = h_vmem[...]                                                   # (S, D) fp32
    S, D = x.shape
    H = n_heads
    d_k = D // H
    inv_sqrt_dk = 1.0 / math.sqrt(d_k)

    # this layer's weights: VMEM-resident full-L block (index by l), or a
    # per-layer streamed block (index 0)
    def wsel(ref):
        return ref[l] if resident_weights else ref[0]

    wqkv = wsel(wqkv_ref)                                             # (D, 3D) cdt
    wo = wsel(wo_ref)                                                 # (D, D)  cdt
    w1 = wsel(w1_ref)                                                 # (D, d_ff) cdt
    w2 = wsel(w2_ref)                                                 # (d_ff, D) cdt
    b1 = wsel(b1_ref)[0]                                              # (d_ff,) fp32
    bvec_l = wsel(bvec_ref)                                           # (6, D)  fp32
    bo, ln1_g, ln1_b, ln2_g, ln2_b, b_ff2 = (
        bvec_l[0], bvec_l[1], bvec_l[2], bvec_l[3], bvec_l[4], bvec_l[5])

    xc = x.astype(cdt)

    # ---- fused Q|K|V projection: one lane-dense MXU pass ----
    qkv = jnp.dot(xc, wqkv, preferred_element_type=cdt)               # (S, 3D)
    q_all = qkv[:, 0 * D:1 * D]
    k_all = qkv[:, 1 * D:2 * D]
    v_all = qkv[:, 2 * D:3 * D]

    # ---- per-head attention via static lane slices (no activation broadcast) ----
    kl_eps = 1e-8
    log_prior = math.log(1.0 / S + kl_eps)
    sum_attn = jnp.zeros((S, S), jnp.float32)
    ctx_parts = []
    for h in range(H):
        sl = slice(h * d_k, (h + 1) * d_k)
        qh, kh, vh = q_all[:, sl], k_all[:, sl], v_all[:, sl]
        sc = jax.lax.dot_general(
            qh, kh, (((1,), (1,)), ((), ())),
            preferred_element_type=jnp.float32) * inv_sqrt_dk         # (S, S) fp32
        sc = sc - jnp.max(sc, axis=-1, keepdims=True)                 # stable softmax
        e = jnp.exp(sc)
        den = jnp.sum(e, axis=-1, keepdims=True)
        if exact:
            attn_h = e / den
        else:
            attn_h = e * pl.reciprocal(den, approx=True)              # EUP, no fp32 divide
        if attn_ref is not None:
            attn_ref[0, h] = attn_h.astype(attn_ref.dtype)
        sum_attn = sum_attn + attn_h
        ctx_parts.append(
            jnp.dot(attn_h.astype(cdt), vh, preferred_element_type=cdt))

    # Association discrepancy KL(mean_h attn || uniform prior), accumulated
    # over layers in a lane-dense (1, S) VMEM accumulator.
    avg_attn = sum_attn * (1.0 / H) + kl_eps                          # (S, S)
    term = avg_attn * (jnp.log(avg_attn) - log_prior)                 # (S, S)
    ones_row = jnp.ones((1, S), jnp.float32)
    kl_row = jnp.einsum("ak,qk->aq", ones_row, term,
                        preferred_element_type=jnp.float32)           # (1, S)
    assoc_vmem[...] = assoc_vmem[...] + kl_row

    # ---- fused output projection: heads merged into lanes, one (S,D)x(D,D) pass ----
    ctx_m = jnp.concatenate(ctx_parts, axis=1)                        # (S, D) cdt
    attn_out = jnp.dot(ctx_m, wo, preferred_element_type=jnp.float32) + bo

    # norm1(x + attn_out)   (fp32)
    h1 = x + attn_out
    mu1 = jnp.mean(h1, axis=-1, keepdims=True)
    var1 = jnp.mean((h1 - mu1) ** 2, axis=-1, keepdims=True)
    h1 = (h1 - mu1) * jax.lax.rsqrt(var1 + ln_eps) * ln1_g + ln1_b

    # feed-forward (compute_dtype operands, fp32 accumulation)
    ff = jnp.maximum(
        jnp.dot(h1.astype(cdt), w1, preferred_element_type=jnp.float32) + b1, 0.0)
    ff = jnp.dot(ff.astype(cdt), w2, preferred_element_type=jnp.float32) + b_ff2

    # norm2(h1 + ff)
    h2 = h1 + ff
    mu2 = jnp.mean(h2, axis=-1, keepdims=True)
    var2 = jnp.mean((h2 - mu2) ** 2, axis=-1, keepdims=True)
    h_new = (h2 - mu2) * jax.lax.rsqrt(var2 + ln_eps) * ln2_g + ln2_b

    h_vmem[...] = h_new          # carry to next layer, VMEM-resident

    # ---- last layer step: fused reconstruction / scorer head, lane-dense stores ----
    @pl.when(l == n_layers - 1)
    def _():
        assoc_ref[0] = assoc_vmem[...]
        if hid_ref is not None:
            hid_ref[0] = h_new

        # one MXU pass for [reconstruction | scorer-hidden]; written as one
        # lane-dense slab, sliced host-side (no masked partial stores).
        y = jnp.dot(h_new.astype(cdt), w_head_ref[...],
                    preferred_element_type=jnp.float32) + b_head_ref[0]
        head_ref[0] = y

        d_half = ws2_ref.shape[-1]
        input_dim = y.shape[-1] - d_half
        s_hid = jnp.maximum(y[:, input_dim:], 0.0)                    # (S, d_half)
        w2b = ws2_ref[...]                                            # (2, d_half)
        # (d_half -> 1) projection as a (1,d_half)x(S,d_half)^T contraction:
        # produces the (1, S) lane-dense result directly.
        s_lin = jnp.einsum("aj,qj->aq", w2b[0:1, :], s_hid,
                           preferred_element_type=jnp.float32) + w2b[1:2, 0:1]
        score_ref[0] = jax.nn.sigmoid(s_lin)


# ----------------------------------------------------------------------------
# Parameter setup (deterministic, synthetic)
# ----------------------------------------------------------------------------
def make_positional_encoding(max_len, d_model):
    position = jnp.arange(max_len, dtype=jnp.float32)[:, None]
    div_term = jnp.exp(jnp.arange(0, d_model, 2, dtype=jnp.float32)
                       * (-math.log(10000.0) / d_model))
    pe = jnp.zeros((max_len, d_model), jnp.float32)
    pe = pe.at[:, 0::2].set(jnp.sin(position * div_term))
    pe = pe.at[:, 1::2].set(jnp.cos(position * div_term))
    return pe


def init_params(key, input_dim, d_model, n_heads, n_layers, d_ff, max_seq_len):
    def mat(k, fan_in, fan_out):
        return jax.random.normal(k, (fan_in, fan_out), jnp.float32) * 0.05

    def vec(k, n, scale=0.05, shift=0.0):
        return jax.random.normal(k, (1, n), jnp.float32) * scale + shift

    keys = jax.random.split(key, 8 + 13 * n_layers)
    ki = iter(keys)
    d_half = d_model // 2
    params = {
        "w_in": mat(next(ki), input_dim, d_model),
        "b_in": vec(next(ki), d_model),
        "pe": make_positional_encoding(max_seq_len, d_model),
        "w_out": mat(next(ki), d_model, input_dim),
        "b_out": vec(next(ki), input_dim),
        "w_s1": mat(next(ki), d_model, d_half),
        "b_s1": vec(next(ki), d_half),
        "w_s2": mat(next(ki), d_half, 1),
        "b_s2": vec(next(ki), 1),
        "layers": [],
    }
    for _ in range(n_layers):
        lp = {
            "wq": mat(next(ki), d_model, d_model),
            "wk": mat(next(ki), d_model, d_model),
            "wv": mat(next(ki), d_model, d_model),
            "wo": mat(next(ki), d_model, d_model),
            "bo": vec(next(ki), d_model),
            "ln1_g": vec(next(ki), d_model, 0.1, 1.0),
            "ln1_b": vec(next(ki), d_model),
            "ln2_g": vec(next(ki), d_model, 0.1, 1.0),
            "ln2_b": vec(next(ki), d_model),
            "w_ff1": mat(next(ki), d_model, d_ff),
            "b_ff1": vec(next(ki), d_ff),
            "w_ff2": mat(next(ki), d_ff, d_model),
            "b_ff2": vec(next(ki), d_model),
        }
        params["layers"].append(lp)
    return params


# ----------------------------------------------------------------------------
# Generation-aware VMEM budgeting
# ----------------------------------------------------------------------------
def _vmem_capacity_bytes():
    try:
        info = pltpu.get_tpu_info()
        for attr in ("vmem_capacity_bytes", "vmem_bytes", "vmem_size_bytes"):
            cap = getattr(info, attr, None)
            if cap:
                return int(cap)
    except Exception:
        pass
    return 128 * 1024 * 1024   # conservative v5e/v6e default


# ----------------------------------------------------------------------------
# Forward pass (single fused Pallas call)
# ----------------------------------------------------------------------------
def anomaly_transformer_forward(x, params, n_heads, *,
                                return_attention=True,
                                return_hidden=True,
                                compute_dtype=jnp.bfloat16,
                                resident_weights=None,
                                vmem_limit_bytes=None):
    B, S, input_dim = x.shape
    d_model = params["w_in"].shape[1]
    d_half = params["w_s1"].shape[1]
    assert d_model % n_heads == 0
    layers = params["layers"]
    n_layers = len(layers)
    d_ff = layers[0]["w_ff1"].shape[1]
    cdt = compute_dtype
    n_head_out = input_dim + d_half

    # ---- host-side parameter repacking (cheap, layout plumbing only) ----
    w_in = params["w_in"].astype(cdt)
    pe_b = (params["pe"][:S] + params["b_in"]).astype(jnp.float32)     # (S, D)

    def stack(name):
        return jnp.stack([lp[name] for lp in layers], axis=0)

    # fused Q|K|V weight: one lane-dense (D, 3D) matrix per layer
    wqkv = jnp.concatenate([stack("wq"), stack("wk"), stack("wv")],
                           axis=2).astype(cdt)                         # (L, D, 3D)
    wo = stack("wo").astype(cdt)                                       # (L, D, D)
    w1 = stack("w_ff1").astype(cdt)                                    # (L, D, d_ff)
    w2 = stack("w_ff2").astype(cdt)                                    # (L, d_ff, D)
    b1 = stack("b_ff1")                                                # (L, 1, d_ff) fp32
    # pack all d_model-wide per-layer vectors into one array: one DMA, not six
    bvec = jnp.stack(
        [jnp.concatenate([lp["bo"], lp["ln1_g"], lp["ln1_b"],
                          lp["ln2_g"], lp["ln2_b"], lp["b_ff2"]], axis=0)
         for lp in layers], axis=0)                                    # (L, 6, D) fp32

    # fused head: [reconstruction | scorer-hidden] in a single matmul
    w_head = jnp.concatenate([params["w_out"], params["w_s1"]], axis=1).astype(cdt)
    b_head = jnp.concatenate([params["b_out"], params["b_s1"]], axis=1)  # (1, n_head_out)
    ws2 = jnp.concatenate(
        [params["w_s2"].T, jnp.full((1, d_half), params["b_s2"][0, 0])], axis=0)  # (2, d_half)

    # ---- generation-aware VMEM budget / weight residency ----
    cap = _vmem_capacity_bytes()
    if vmem_limit_bytes is None:
        # 112 MiB on 128-MiB parts (v5e/v6e), 56 MiB on 64-MiB parts (v7x)
        vmem_limit_bytes = int(max(32 * 1024 * 1024,
                                   min(cap * 7 // 8, 112 * 1024 * 1024)))
    itemsize = jnp.dtype(cdt).itemsize
    resident_bytes = int(wqkv.size * itemsize + wo.size * itemsize
                         + w1.size * itemsize + w2.size * itemsize
                         + b1.size * 4 + bvec.size * 4)
    if resident_weights is None:
        # full-L residency only on 128-MiB parts and when (double-buffered)
        # weights leave headroom for activations; stream per layer on v7x.
        resident_weights = (cap >= 96 * 1024 * 1024
                            and 2 * resident_bytes <= vmem_limit_bytes - 32 * 1024 * 1024)

    # ---- specs ----
    if resident_weights:
        def L_spec(shape):
            return pl.BlockSpec((n_layers,) + shape,
                                lambda b, l, _n=len(shape): (0,) * (_n + 1))
    else:
        def L_spec(shape):
            return pl.BlockSpec((1,) + shape,
                                lambda b, l, _n=len(shape): (l,) + (0,) * _n)

    in_specs = [
        pl.BlockSpec((1, S, input_dim), lambda b, l: (b, 0, 0)),            # x
        pl.BlockSpec((input_dim, d_model), lambda b, l: (0, 0)),            # w_in
        pl.BlockSpec((S, d_model), lambda b, l: (0, 0)),                    # pe (+ b_in)
        L_spec((d_model, 3 * d_model)),                                     # wqkv fused
        L_spec((d_model, d_model)),                                         # wo
        L_spec((6, d_model)),                                               # packed biases/LN
        L_spec((d_model, d_ff)),                                            # w_ff1
        L_spec((1, d_ff)),                                                  # b_ff1
        L_spec((d_ff, d_model)),                                            # w_ff2
        pl.BlockSpec((d_model, n_head_out), lambda b, l: (0, 0)),           # w_head
        pl.BlockSpec((1, n_head_out), lambda b, l: (0, 0)),                 # b_head
        pl.BlockSpec((2, d_half), lambda b, l: (0, 0)),                     # scorer w2 / b2
    ]

    out_shapes = [
        jax.ShapeDtypeStruct((B, S, n_head_out), jnp.float32),              # [recon | scorer-hid]
        jax.ShapeDtypeStruct((B, 1, S), jnp.float32),                       # anomaly scores
        jax.ShapeDtypeStruct((B, 1, S), jnp.float32),                       # summed association
    ]
    out_specs = [
        pl.BlockSpec((1, S, n_head_out), lambda b, l: (b, 0, 0)),
        pl.BlockSpec((1, 1, S), lambda b, l: (b, 0, 0)),
        pl.BlockSpec((1, 1, S), lambda b, l: (b, 0, 0)),
    ]
    if return_hidden:
        out_shapes.append(jax.ShapeDtypeStruct((B, S, d_model), jnp.float32))
        out_specs.append(pl.BlockSpec((1, S, d_model), lambda b, l: (b, 0, 0)))
    if return_attention:
        attn_dtype = jnp.float32 if jnp.dtype(cdt) == jnp.dtype(jnp.float32) else jnp.bfloat16
        out_shapes.append(
            jax.ShapeDtypeStruct((B * n_layers, n_heads, S, S), attn_dtype))
        out_specs.append(
            pl.BlockSpec((1, n_heads, S, S),
                         lambda b, l: (b * n_layers + l, 0, 0, 0)))

    kernel = functools.partial(
        _anomaly_transformer_kernel,
        n_heads=n_heads,
        return_attention=return_attention,
        return_hidden=return_hidden,
        resident_weights=resident_weights,
        compute_dtype=cdt,
    )

    outs = pl.pallas_call(
        kernel,
        out_shape=tuple(out_shapes),
        grid=(B, n_layers),
        in_specs=in_specs,
        out_specs=tuple(out_specs),
        scratch_shapes=[
            pltpu.VMEM((S, d_model), jnp.float32),   # hidden-state carry
            pltpu.VMEM((1, S), jnp.float32),         # association accumulator
        ],
        compiler_params=pltpu.CompilerParams(
            dimension_semantics=("parallel", "arbitrary"),
            vmem_limit_bytes=vmem_limit_bytes,
        ),
    )(x, w_in, pe_b, wqkv, wo, bvec, w1, b1, w2, w_head, b_head, ws2)

    outs = list(outs)
    head_slab = outs.pop(0)
    scores = outs.pop(0)
    assoc_sum = outs.pop(0)
    hidden = outs.pop(0) if return_hidden else None
    if return_attention:
        attn_flat = outs.pop(0)
        attn_all = attn_flat.reshape(B, n_layers, n_heads, S, S)
        all_attention = [attn_all[:, i] for i in range(n_layers)]
    else:
        all_attention = []

    return {
        "reconstruction": head_slab[:, :, :input_dim],
        "anomaly_scores": scores[:, 0, :],
        "association_discrepancy": assoc_sum[:, 0, :] / n_layers,
        "attention_weights": all_attention,
        "hidden_states": hidden,
    }


# ----------------------------------------------------------------------------
# Pure-JAX reference (for correctness check)
# ----------------------------------------------------------------------------
def reference_forward(x, params, n_heads):
    B, S, _ = x.shape
    d_model = params["w_in"].shape[1]
    d_k = d_model // n_heads
    n_layers = len(params["layers"])

    def layernorm(h, g, b, eps=1e-5):
        mu = jnp.mean(h, axis=-1, keepdims=True)
        var = jnp.mean((h - mu) ** 2, axis=-1, keepdims=True)
        return (h - mu) / jnp.sqrt(var + eps) * g + b

    hidden = x @ params["w_in"] + params["b_in"][0] + params["pe"][:S][None]
    total_assoc = jnp.zeros((B, S), jnp.float32)
    all_attention = []
    for lp in params["layers"]:
        Q = (hidden @ lp["wq"]).reshape(B, S, n_heads, d_k).transpose(0, 2, 1, 3)
        K = (hidden @ lp["wk"]).reshape(B, S, n_heads, d_k).transpose(0, 2, 1, 3)
        V = (hidden @ lp["wv"]).reshape(B, S, n_heads, d_k).transpose(0, 2, 1, 3)
        scores = jnp.einsum("bhqd,bhkd->bhqk", Q, K) / math.sqrt(d_k)
        attn = jax.nn.softmax(scores, axis=-1)
        all_attention.append(attn)
        ctx = jnp.einsum("bhqk,bhkd->bhqd", attn, V).transpose(0, 2, 1, 3).reshape(B, S, d_model)
        attn_out = ctx @ lp["wo"] + lp["bo"][0]
        eps = 1e-8
        avg_attn = attn.mean(axis=1) + eps
        prior = 1.0 / S + eps
        total_assoc += jnp.sum(avg_attn * jnp.log(avg_attn / prior), axis=-1)
        h1 = layernorm(hidden + attn_out, lp["ln1_g"][0], lp["ln1_b"][0])
        ff = jnp.maximum(h1 @ lp["w_ff1"] + lp["b_ff1"][0], 0.0) @ lp["w_ff2"] + lp["b_ff2"][0]
        hidden = layernorm(h1 + ff, lp["ln2_g"][0], lp["ln2_b"][0])

    recon = hidden @ params["w_out"] + params["b_out"][0]
    s = jnp.maximum(hidden @ params["w_s1"] + params["b_s1"][0], 0.0)
    s = jax.nn.sigmoid(s @ params["w_s2"] + params["b_s2"][0])
    return {
        "reconstruction": recon,
        "anomaly_scores": s[..., 0],
        "association_discrepancy": total_assoc / n_layers,
        "attention_weights": all_attention,
        "hidden_states": hidden,
    }


# ----------------------------------------------------------------------------
if __name__ == "__main__":
    B, S = 2, 8
    INPUT_DIM, D_MODEL, N_HEADS, N_LAYERS, D_FF, MAX_SEQ = 8, 32, 4, 2, 64, 32

    key = jax.random.PRNGKey(0)
    k_param, k_x = jax.random.split(key)
    params = init_params(k_param, INPUT_DIM, D_MODEL, N_HEADS, N_LAYERS, D_FF, MAX_SEQ)
    x = jax.random.normal(k_x, (B, S, INPUT_DIM), jnp.float32)

    ref = reference_forward(x, params, N_HEADS)

    # ---- fp32 kernel, resident weights (v5e/v6e layout): exact-math check ----
    out32 = anomaly_transformer_forward(x, params, N_HEADS,
                                        return_attention=True,
                                        compute_dtype=jnp.float32,
                                        resident_weights=True)
    jax.block_until_ready(out32)
    for name in ("reconstruction", "anomaly_scores",
                 "association_discrepancy", "hidden_states"):
        assert jnp.allclose(out32[name], ref[name], rtol=2e-3, atol=2e-3), name
    for li in range(N_LAYERS):
        assert jnp.allclose(out32["attention_weights"][li],
                            ref["attention_weights"][li], rtol=2e-3, atol=2e-3)

    # ---- fp32 kernel, per-layer streamed weights (v7x layout) ----
    out32s = anomaly_transformer_forward(x, params, N_HEADS,
                                         return_attention=True,
                                         compute_dtype=jnp.float32,
                                         resident_weights=False)
    jax.block_until_ready(out32s)
    for name in ("reconstruction", "anomaly_scores",
                 "association_discrepancy", "hidden_states"):
        assert jnp.allclose(out32s[name], ref[name], rtol=2e-3, atol=2e-3), name

    # ---- bf16-MXU path (default residency heuristic), bf16 attention dump ----
    out16 = anomaly_transformer_forward(x, params, N_HEADS,
                                        return_attention=True,
                                        compute_dtype=jnp.bfloat16)
    jax.block_until_ready(out16)
    for name in ("reconstruction", "anomaly_scores", "hidden_states"):
        assert jnp.allclose(out16[name], ref[name], rtol=5e-2, atol=5e-2), name
    # association takes log of softmax probabilities -> most precision sensitive
    assert jnp.allclose(out16["association_discrepancy"],
                        ref["association_discrepancy"], rtol=5e-1, atol=5e-2)
    for li in range(N_LAYERS):
        assert jnp.allclose(out16["attention_weights"][li].astype(jnp.float32),
                            ref["attention_weights"][li], rtol=5e-2, atol=3e-2)

    # ---- minimal-output variant (no attention dump, no hidden dump) ----
    out_na = anomaly_transformer_forward(x, params, N_HEADS,
                                         return_attention=False,
                                         return_hidden=False,
                                         compute_dtype=jnp.bfloat16)
    jax.block_until_ready(out_na)
    assert len(out_na["attention_weights"]) == 0
    assert out_na["hidden_states"] is None
    assert jnp.allclose(out_na["reconstruction"], ref["reconstruction"],
                        rtol=5e-2, atol=5e-2)
    assert jnp.allclose(out_na["anomaly_scores"], ref["anomaly_scores"],
                        rtol=5e-2, atol=5e-2)

    # ---- shape checks (match the PyTorch module's output contract) ----
    assert out16["reconstruction"].shape == (B, S, INPUT_DIM)
    assert out16["anomaly_scores"].shape == (B, S)
    assert out16["association_discrepancy"].shape == (B, S)
    assert out16["hidden_states"].shape == (B, S, D_MODEL)
    assert len(out16["attention_weights"]) == N_LAYERS
    assert out16["attention_weights"][0].shape == (B, N_HEADS, S, S)

    print("KERNEL_OK")
</pallas_src>

<mosaic_0001>
module attributes {stable_mosaic.version = 11 : i64} {
  func.func @_anomaly_transformer_kernel(%arg0: i32, %arg1: i32, %arg2: memref<1x8x8xf32, #tpu.memory_space<vmem>>, %arg3: memref<8x32xf32, #tpu.memory_space<vmem>>, %arg4: memref<8x32xf32, #tpu.memory_space<vmem>>, %arg5: memref<2x32x96xf32, #tpu.memory_space<vmem>>, %arg6: memref<2x32x32xf32, #tpu.memory_space<vmem>>, %arg7: memref<2x6x32xf32, #tpu.memory_space<vmem>>, %arg8: memref<2x32x64xf32, #tpu.memory_space<vmem>>, %arg9: memref<2x1x64xf32, #tpu.memory_space<vmem>>, %arg10: memref<2x64x32xf32, #tpu.memory_space<vmem>>, %arg11: memref<32x24xf32, #tpu.memory_space<vmem>>, %arg12: memref<1x24xf32, #tpu.memory_space<vmem>>, %arg13: memref<2x16xf32, #tpu.memory_space<vmem>>, %arg14: memref<1x8x24xf32, #tpu.memory_space<vmem>>, %arg15: memref<1x1x8xf32, #tpu.memory_space<vmem>>, %arg16: memref<1x1x8xf32, #tpu.memory_space<vmem>>, %arg17: memref<1x8x32xf32, #tpu.memory_space<vmem>>, %arg18: memref<1x4x8x8xf32, #tpu.memory_space<vmem>>, %arg19: memref<8x32xf32, #tpu.memory_space<vmem>>, %arg20: memref<1x8xf32, #tpu.memory_space<vmem>>) attributes {dimension_semantics = [#tpu.dimension_semantics<parallel>, #tpu.dimension_semantics<arbitrary>], iteration_bounds = array<i64: 2, 2>, scalar_prefetch = 0 : i64, scratch_operands = 2 : i64, tpu.core_type = #tpu.core_type<tc>, window_params = [{transform_indices = @transform_0, window_bounds = array<i64: 1, 8, 8>}, {pipeline_mode = #tpu.pipeline_mode<synchronous>, transform_indices = @transform_1, window_bounds = array<i64: 8, 32>}, {pipeline_mode = #tpu.pipeline_mode<synchronous>, transform_indices = @transform_2, window_bounds = array<i64: 8, 32>}, {pipeline_mode = #tpu.pipeline_mode<synchronous>, transform_indices = @transform_3, window_bounds = array<i64: 2, 32, 96>}, {pipeline_mode = #tpu.pipeline_mode<synchronous>, transform_indices = @transform_4, window_bounds = array<i64: 2, 32, 32>}, {pipeline_mode = #tpu.pipeline_mode<synchronous>, transform_indices = @transform_5, window_bounds = array<i64: 2, 6, 32>}, {pipeline_mode = #tpu.pipeline_mode<synchronous>, transform_indices = @transform_6, window_bounds = array<i64: 2, 32, 64>}, {pipeline_mode = #tpu.pipeline_mode<synchronous>, transform_indices = @transform_7, window_bounds = array<i64: 2, 1, 64>}, {pipeline_mode = #tpu.pipeline_mode<synchronous>, transform_indices = @transform_8, window_bounds = array<i64: 2, 64, 32>}, {pipeline_mode = #tpu.pipeline_mode<synchronous>, transform_indices = @transform_9, window_bounds = array<i64: 32, 24>}, {pipeline_mode = #tpu.pipeline_mode<synchronous>, transform_indices = @transform_10, window_bounds = array<i64: 1, 24>}, {pipeline_mode = #tpu.pipeline_mode<synchronous>, transform_indices = @transform_11, window_bounds = array<i64: 2, 16>}, {transform_indices = @transform_12, window_bounds = array<i64: 1, 8, 24>}, {transform_indices = @transform_13, window_bounds = array<i64: 1, 1, 8>}, {transform_indices = @transform_14, window_bounds = array<i64: 1, 1, 8>}, {transform_indices = @transform_15, window_bounds = array<i64: 1, 8, 32>}, {transform_indices = @transform_16, window_bounds = array<i64: 1, 4, 8, 8>}]} {
    %c0_i32 = arith.constant 0 : i32
    %0 = arith.cmpi eq, %arg1, %c0_i32 : i32
    %1 = arith.extui %0 : i1 to i32
    %c0_i32_0 = arith.constant 0 : i32
    %2 = arith.cmpi ne, %1, %c0_i32_0 : i32
    scf.if %2 {
      %c0_74 = arith.constant 0 : index
      %c0_75 = arith.constant 0 : index
      %c0_76 = arith.constant 0 : index
      %202 = vector.load %arg2[%c0_74, %c0_75, %c0_76] : memref<1x8x8xf32, #tpu.memory_space<vmem>>, vector<1x8x8xf32>
      %203 = vector.shape_cast %202 : vector<1x8x8xf32> to vector<8x8xf32>
      %c0_77 = arith.constant 0 : index
      %c0_78 = arith.constant 0 : index
      %204 = vector.load %arg3[%c0_77, %c0_78] : memref<8x32xf32, #tpu.memory_space<vmem>>, vector<8x32xf32>
      %cst_79 = arith.constant dense<0.000000e+00> : vector<8x32xf32>
      %205 = tpu.matmul %203, %204, %cst_79 {dimension_numbers = #tpu.dot_dimension_numbers<[1], [0], [0], [1], [0, 0, 1, 1], [], []>, precision = #tpu.contract_precision<fp32>} : vector<8x8xf32>, vector<8x32xf32>, vector<8x32xf32> -> vector<8x32xf32>
      %c0_80 = arith.constant 0 : index
      %c0_81 = arith.constant 0 : index
      %206 = vector.load %arg4[%c0_80, %c0_81] : memref<8x32xf32, #tpu.memory_space<vmem>>, vector<8x32xf32>
      %207 = arith.addf %205, %206 : vector<8x32xf32>
      %c0_82 = arith.constant 0 : index
      %c0_83 = arith.constant 0 : index
      %208 = vector.load %arg19[%c0_82, %c0_83] : memref<8x32xf32, #tpu.memory_space<vmem>>, vector<8x32xf32>
      tpu.vector_store %arg19[%c0_82, %c0_83], %207 {strides = array<i32>} : memref<8x32xf32, #tpu.memory_space<vmem>>, vector<8x32xf32>,
      %cst_84 = arith.constant 0.000000e+00 : f32
      %209 = vector.broadcast %cst_84 : f32 to vector<1x8xf32>
      %c0_85 = arith.constant 0 : index
      %c0_86 = arith.constant 0 : index
      %210 = vector.load %arg20[%c0_85, %c0_86] : memref<1x8xf32, #tpu.memory_space<vmem>>, vector<1x8xf32>
      tpu.vector_store %arg20[%c0_85, %c0_86], %209 {strides = array<i32>} : memref<1x8xf32, #tpu.memory_space<vmem>>, vector<1x8xf32>,
    } else {
    }
    %c0 = arith.constant 0 : index
    %c0_1 = arith.constant 0 : index
    %3 = vector.load %arg19[%c0, %c0_1] : memref<8x32xf32, #tpu.memory_space<vmem>>, vector<8x32xf32>
    %4 = arith.index_cast %arg1 : i32 to index
    %c0_2 = arith.constant 0 : index
    %c0_3 = arith.constant 0 : index
    %5 = vector.load %arg5[%4, %c0_2, %c0_3] : memref<2x32x96xf32, #tpu.memory_space<vmem>>, vector<1x32x96xf32>
    %6 = vector.shape_cast %5 : vector<1x32x96xf32> to vector<32x96xf32>
    %7 = arith.index_cast %arg1 : i32 to index
    %c0_4 = arith.constant 0 : index
    %c0_5 = arith.constant 0 : index
    %8 = vector.load %arg6[%7, %c0_4, %c0_5] : memref<2x32x32xf32, #tpu.memory_space<vmem>>, vector<1x32x32xf32>
    %9 = vector.shape_cast %8 : vector<1x32x32xf32> to vector<32x32xf32>
    %10 = arith.index_cast %arg1 : i32 to index
    %c0_6 = arith.constant 0 : index
    %c0_7 = arith.constant 0 : index
    %11 = vector.load %arg8[%10, %c0_6, %c0_7] : memref<2x32x64xf32, #tpu.memory_space<vmem>>, vector<1x32x64xf32>
    %12 = vector.shape_cast %11 : vector<1x32x64xf32> to vector<32x64xf32>
    %13 = arith.index_cast %arg1 : i32 to index
    %c0_8 = arith.constant 0 : index
    %c0_9 = arith.constant 0 : index
    %14 = vector.load %arg10[%13, %c0_8, %c0_9] : memref<2x64x32xf32, #tpu.memory_space<vmem>>, vector<1x64x32xf32>
    %15 = vector.shape_cast %14 : vector<1x64x32xf32> to vector<64x32xf32>
    %16 = arith.index_cast %arg1 : i32 to index
    %c0_10 = arith.constant 0 : index
    %c0_11 = arith.constant 0 : index
    %17 = vector.load %arg9[%16, %c0_10, %c0_11] : memref<2x1x64xf32, #tpu.memory_space<vmem>>, vector<1x1x64xf32>
    %18 = vector.shape_cast %17 : vector<1x1x64xf32> to vector<1x64xf32>
    %19 = vector.shape_cast %18 : vector<1x64xf32> to vector<64xf32>
    %20 = arith.index_cast %arg1 : i32 to index
    %c0_12 = arith.constant 0 : index
    %c0_13 = arith.constant 0 : index
    %21 = vector.load %arg7[%20, %c0_12, %c0_13] : memref<2x6x32xf32, #tpu.memory_space<vmem>>, vector<1x6x32xf32>
    %22 = vector.shape_cast %21 : vector<1x6x32xf32> to vector<6x32xf32>
    %23 = vector.extract_strided_slice %22 {offsets = [0, 0], sizes = [1, 32], strides = [1, 1]} : vector<6x32xf32> to vector<1x32xf32>
    %24 = vector.shape_cast %23 : vector<1x32xf32> to vector<32xf32>
    %25 = vector.extract_strided_slice %22 {offsets = [1, 0], sizes = [1, 32], strides = [1, 1]} : vector<6x32xf32> to vector<1x32xf32>
    %26 = vector.shape_cast %25 : vector<1x32xf32> to vector<32xf32>
    %27 = vector.extract_strided_slice %22 {offsets = [2, 0], sizes = [1, 32], strides = [1, 1]} : vector<6x32xf32> to vector<1x32xf32>
    %28 = vector.shape_cast %27 : vector<1x32xf32> to vector<32xf32>
    %29 = vector.extract_strided_slice %22 {offsets = [3, 0], sizes = [1, 32], strides = [1, 1]} : vector<6x32xf32> to vector<1x32xf32>
    %30 = vector.shape_cast %29 : vector<1x32xf32> to vector<32xf32>
    %31 = vector.extract_strided_slice %22 {offsets = [4, 0], sizes = [1, 32], strides = [1, 1]} : vector<6x32xf32> to vector<1x32xf32>
    %32 = vector.shape_cast %31 : vector<1x32xf32> to vector<32xf32>
    %33 = vector.extract_strided_slice %22 {offsets = [5, 0], sizes = [1, 32], strides = [1, 1]} : vector<6x32xf32> to vector<1x32xf32>
    %34 = vector.shape_cast %33 : vector<1x32xf32> to vector<32xf32>
    %cst = arith.constant dense<0.000000e+00> : vector<8x96xf32>
    %35 = tpu.matmul %3, %6, %cst {dimension_numbers = #tpu.dot_dimension_numbers<[1], [0], [0], [1], [0, 0, 1, 1], [], []>, precision = #tpu.contract_precision<fp32>} : vector<8x32xf32>, vector<32x96xf32>, vector<8x96xf32> -> vector<8x96xf32>
    %36 = vector.extract_strided_slice %35 {offsets = [0, 0], sizes = [8, 32], strides = [1, 1]} : vector<8x96xf32> to vector<8x32xf32>
    %37 = vector.extract_strided_slice %35 {offsets = [0, 32], sizes = [8, 32], strides = [1, 1]} : vector<8x96xf32> to vector<8x32xf32>
    %38 = vector.extract_strided_slice %35 {offsets = [0, 64], sizes = [8, 32], strides = [1, 1]} : vector<8x96xf32> to vector<8x32xf32>
    %cst_14 = arith.constant 0.000000e+00 : f32
    %39 = vector.broadcast %cst_14 : f32 to vector<8x8xf32>
    %40 = vector.extract_strided_slice %36 {offsets = [0, 0], sizes = [8, 8], strides = [1, 1]} : vector<8x32xf32> to vector<8x8xf32>
    %41 = vector.extract_strided_slice %37 {offsets = [0, 0], sizes = [8, 8], strides = [1, 1]} : vector<8x32xf32> to vector<8x8xf32>
    %42 = vector.extract_strided_slice %38 {offsets = [0, 0], sizes = [8, 8], strides = [1, 1]} : vector<8x32xf32> to vector<8x8xf32>
    %cst_15 = arith.constant dense<0.000000e+00> : vector<8x8xf32>
    %43 = tpu.matmul %40, %41, %cst_15 {dimension_numbers = #tpu.dot_dimension_numbers<[1], [1], [0], [0], [0, 0, 1, 0], [], []>, precision = #tpu.contract_precision<fp32>} : vector<8x8xf32>, vector<8x8xf32>, vector<8x8xf32> -> vector<8x8xf32>
    %cst_16 = arith.constant 0.353553385 : f32
    %44 = vector.broadcast %cst_16 : f32 to vector<8x8xf32>
    %45 = arith.mulf %43, %44 : vector<8x8xf32>
    %cst_17 = arith.constant dense<0xFF800000> : vector<8xf32>
    %46 = vector.multi_reduction <maximumf>, %45, %cst_17 [1] : vector<8x8xf32> to vector<8xf32>
    %47 = vector.shape_cast %46 : vector<8xf32> to vector<8x1xf32>
    %48 = vector.broadcast %47 : vector<8x1xf32> to vector<8x8xf32>
    %49 = arith.subf %45, %48 : vector<8x8xf32>
    %50 = math.exp %49 : vector<8x8xf32>
    %cst_18 = arith.constant dense<0.000000e+00> : vector<8xf32>
    %51 = vector.multi_reduction <add>, %50, %cst_18 [1] : vector<8x8xf32> to vector<8xf32>
    %52 = vector.shape_cast %51 : vector<8xf32> to vector<8x1xf32>
    %53 = vector.broadcast %52 : vector<8x1xf32> to vector<8x8xf32>
    %54 = arith.divf %50, %53 : vector<8x8xf32>
    %c0_19 = arith.constant 0 : index
    %c0_20 = arith.constant 0 : index
    %c0_21 = arith.constant 0 : index
    %c0_22 = arith.constant 0 : index
    %55 = vector.load %arg18[%c0_19, %c0_20, %c0_21, %c0_22] : memref<1x4x8x8xf32, #tpu.memory_space<vmem>>, vector<1x1x8x8xf32>
    %56 = vector.shape_cast %55 : vector<1x1x8x8xf32> to vector<8x8xf32>
    %57 = vector.shape_cast %54 : vector<8x8xf32> to vector<1x1x8x8xf32>
    tpu.vector_store %arg18[%c0_19, %c0_20, %c0_21, %c0_22], %57 {strides = array<i32>} : memref<1x4x8x8xf32, #tpu.memory_space<vmem>>, vector<1x1x8x8xf32>,
    %58 = arith.addf %39, %54 : vector<8x8xf32>
    %cst_23 = arith.constant dense<0.000000e+00> : vector<8x8xf32>
    %59 = tpu.matmul %54, %42, %cst_23 {dimension_numbers = #tpu.dot_dimension_numbers<[1], [0], [0], [1], [0, 0, 1, 1], [], []>, precision = #tpu.contract_precision<fp32>} : vector<8x8xf32>, vector<8x8xf32>, vector<8x8xf32> -> vector<8x8xf32>
    %60 = vector.extract_strided_slice %36 {offsets = [0, 8], sizes = [8, 8], strides = [1, 1]} : vector<8x32xf32> to vector<8x8xf32>
    %61 = vector.extract_strided_slice %37 {offsets = [0, 8], sizes = [8, 8], strides = [1, 1]} : vector<8x32xf32> to vector<8x8xf32>
    %62 = vector.extract_strided_slice %38 {offsets = [0, 8], sizes = [8, 8], strides = [1, 1]} : vector<8x32xf32> to vector<8x8xf32>
    %cst_24 = arith.constant dense<0.000000e+00> : vector<8x8xf32>
    %63 = tpu.matmul %60, %61, %cst_24 {dimension_numbers = #tpu.dot_dimension_numbers<[1], [1], [0], [0], [0, 0, 1, 0], [], []>, precision = #tpu.contract_precision<fp32>} : vector<8x8xf32>, vector<8x8xf32>, vector<8x8xf32> -> vector<8x8xf32>
    %cst_25 = arith.constant 0.353553385 : f32
    %64 = vector.broadcast %cst_25 : f32 to vector<8x8xf32>
    %65 = arith.mulf %63, %64 : vector<8x8xf32>
    %cst_26 = arith.constant dense<0xFF800000> : vector<8xf32>
    %66 = vector.multi_reduction <maximumf>, %65, %cst_26 [1] : vector<8x8xf32> to vector<8xf32>
    %67 = vector.shape_cast %66 : vector<8xf32> to vector<8x1xf32>
    %68 = vector.broadcast %67 : vector<8x1xf32> to vector<8x8xf32>
    %69 = arith.subf %65, %68 : vector<8x8xf32>
    %70 = math.exp %69 : vector<8x8xf32>
    %cst_27 = arith.constant dense<0.000000e+00> : vector<8xf32>
    %71 = vector.multi_reduction <add>, %70, %cst_27 [1] : vector<8x8xf32> to vector<8xf32>
    %72 = vector.shape_cast %71 : vector<8xf32> to vector<8x1xf32>
    %73 = vector.broadcast %72 : vector<8x1xf32> to vector<8x8xf32>
    %74 = arith.divf %70, %73 : vector<8x8xf32>
    %c0_28 = arith.constant 0 : index
    %c1 = arith.constant 1 : index
    %c0_29 = arith.constant 0 : index
    %c0_30 = arith.constant 0 : index
    %75 = vector.load %arg18[%c0_28, %c1, %c0_29, %c0_30] : memref<1x4x8x8xf32, #tpu.memory_space<vmem>>, vector<1x1x8x8xf32>
    %76 = vector.shape_cast %75 : vector<1x1x8x8xf32> to vector<8x8xf32>
    %77 = vector.shape_cast %74 : vector<8x8xf32> to vector<1x1x8x8xf32>
    tpu.vector_store %arg18[%c0_28, %c1, %c0_29, %c0_30], %77 {strides = array<i32>} : memref<1x4x8x8xf32, #tpu.memory_space<vmem>>, vector<1x1x8x8xf32>,
    %78 = arith.addf %58, %74 : vector<8x8xf32>
    %cst_31 = arith.constant dense<0.000000e+00> : vector<8x8xf32>
    %79 = tpu.matmul %74, %62, %cst_31 {dimension_numbers = #tpu.dot_dimension_numbers<[1], [0], [0], [1], [0, 0, 1, 1], [], []>, precision = #tpu.contract_precision<fp32>} : vector<8x8xf32>, vector<8x8xf32>, vector<8x8xf32> -> vector<8x8xf32>
    %80 = vector.extract_strided_slice %36 {offsets = [0, 16], sizes = [8, 8], strides = [1, 1]} : vector<8x32xf32> to vector<8x8xf32>
    %81 = vector.extract_strided_slice %37 {offsets = [0, 16], sizes = [8, 8], strides = [1, 1]} : vector<8x32xf32> to vector<8x8xf32>
    %82 = vector.extract_strided_slice %38 {offsets = [0, 16], sizes = [8, 8], strides = [1, 1]} : vector<8x32xf32> to vector<8x8xf32>
    %cst_32 = arith.constant dense<0.000000e+00> : vector<8x8xf32>
    %83 = tpu.matmul %80, %81, %cst_32 {dimension_numbers = #tpu.dot_dimension_numbers<[1], [1], [0], [0], [0, 0, 1, 0], [], []>, precision = #tpu.contract_precision<fp32>} : vector<8x8xf32>, vector<8x8xf32>, vector<8x8xf32> -> vector<8x8xf32>
    %cst_33 = arith.constant 0.353553385 : f32
    %84 = vector.broadcast %cst_33 : f32 to vector<8x8xf32>
    %85 = arith.mulf %83, %84 : vector<8x8xf32>
    %cst_34 = arith.constant dense<0xFF800000> : vector<8xf32>
    %86 = vector.multi_reduction <maximumf>, %85, %cst_34 [1] : vector<8x8xf32> to vector<8xf32>
    %87 = vector.shape_cast %86 : vector<8xf32> to vector<8x1xf32>
    %88 = vector.broadcast %87 : vector<8x1xf32> to vector<8x8xf32>
    %89 = arith.subf %85, %88 : vector<8x8xf32>
    %90 = math.exp %89 : vector<8x8xf32>
    %cst_35 = arith.constant dense<0.000000e+00> : vector<8xf32>
    %91 = vector.multi_reduction <add>, %90, %cst_35 [1] : vector<8x8xf32> to vector<8xf32>
    %92 = vector.shape_cast %91 : vector<8xf32> to vector<8x1xf32>
    %93 = vector.broadcast %92 : vector<8x1xf32> to vector<8x8xf32>
    %94 = arith.divf %90, %93 : vector<8x8xf32>
    %c0_36 = arith.constant 0 : index
    %c2 = arith.constant 2 : index
    %c0_37 = arith.constant 0 : index
    %c0_38 = arith.constant 0 : index
    %95 = vector.load %arg18[%c0_36, %c2, %c0_37, %c0_38] : memref<1x4x8x8xf32, #tpu.memory_space<vmem>>, vector<1x1x8x8xf32>
    %96 = vector.shape_cast %95 : vector<1x1x8x8xf32> to vector<8x8xf32>
    %97 = vector.shape_cast %94 : vector<8x8xf32> to vector<1x1x8x8xf32>
    tpu.vector_store %arg18[%c0_36, %c2, %c0_37, %c0_38], %97 {strides = array<i32>} : memref<1x4x8x8xf32, #tpu.memory_space<vmem>>, vector<1x1x8x8xf32>,
    %98 = arith.addf %78, %94 : vector<8x8xf32>
    %cst_39 = arith.constant dense<0.000000e+00> : vector<8x8xf32>
    %99 = tpu.matmul %94, %82, %cst_39 {dimension_numbers = #tpu.dot_dimension_numbers<[1], [0], [0], [1], [0, 0, 1, 1], [], []>, precision = #tpu.contract_precision<fp32>} : vector<8x8xf32>, vector<8x8xf32>, vector<8x8xf32> -> vector<8x8xf32>
    %100 = vector.extract_strided_slice %36 {offsets = [0, 24], sizes = [8, 8], strides = [1, 1]} : vector<8x32xf32> to vector<8x8xf32>
    %101 = vector.extract_strided_slice %37 {offsets = [0, 24], sizes = [8, 8], strides = [1, 1]} : vector<8x32xf32> to vector<8x8xf32>
    %102 = vector.extract_strided_slice %38 {offsets = [0, 24], sizes = [8, 8], strides = [1, 1]} : vector<8x32xf32> to vector<8x8xf32>
    %cst_40 = arith.constant dense<0.000000e+00> : vector<8x8xf32>
    %103 = tpu.matmul %100, %101, %cst_40 {dimension_numbers = #tpu.dot_dimension_numbers<[1], [1], [0], [0], [0, 0, 1, 0], [], []>, precision = #tpu.contract_precision<fp32>} : vector<8x8xf32>, vector<8x8xf32>, vector<8x8xf32> -> vector<8x8xf32>
    %cst_41 = arith.constant 0.353553385 : f32
    %104 = vector.broadcast %cst_41 : f32 to vector<8x8xf32>
    %105 = arith.mulf %103, %104 : vector<8x8xf32>
    %cst_42 = arith.constant dense<0xFF800000> : vector<8xf32>
    %106 = vector.multi_reduction <maximumf>, %105, %cst_42 [1] : vector<8x8xf32> to vector<8xf32>
    %107 = vector.shape_cast %106 : vector<8xf32> to vector<8x1xf32>
    %108 = vector.broadcast %107 : vector<8x1xf32> to vector<8x8xf32>
    %109 = arith.subf %105, %108 : vector<8x8xf32>
    %110 = math.exp %109 : vector<8x8xf32>
    %cst_43 = arith.constant dense<0.000000e+00> : vector<8xf32>
    %111 = vector.multi_reduction <add>, %110, %cst_43 [1] : vector<8x8xf32> to vector<8xf32>
    %112 = vector.shape_cast %111 : vector<8xf32> to vector<8x1xf32>
    %113 = vector.broadcast %112 : vector<8x1xf32> to vector<8x8xf32>
    %114 = arith.divf %110, %113 : vector<8x8xf32>
    %c0_44 = arith.constant 0 : index
    %c3 = arith.constant 3 : index
    %c0_45 = arith.constant 0 : index
    %c0_46 = arith.constant 0 : index
    %115 = vector.load %arg18[%c0_44, %c3, %c0_45, %c0_46] : memref<1x4x8x8xf32, #tpu.memory_space<vmem>>, vector<1x1x8x8xf32>
    %116 = vector.shape_cast %115 : vector<1x1x8x8xf32> to vector<8x8xf32>
    %117 = vector.shape_cast %114 : vector<8x8xf32> to vector<1x1x8x8xf32>
    tpu.vector_store %arg18[%c0_44, %c3, %c0_45, %c0_46], %117 {strides = array<i32>} : memref<1x4x8x8xf32, #tpu.memory_space<vmem>>, vector<1x1x8x8xf32>,
    %118 = arith.addf %98, %114 : vector<8x8xf32>
    %cst_47 = arith.constant dense<0.000000e+00> : vector<8x8xf32>
    %119 = tpu.matmul %114, %102, %cst_47 {dimension_numbers = #tpu.dot_dimension_numbers<[1], [0], [0], [1], [0, 0, 1, 1], [], []>, precision = #tpu.contract_precision<fp32>} : vector<8x8xf32>, vector<8x8xf32>, vector<8x8xf32> -> vector<8x8xf32>
    %cst_48 = arith.constant 2.500000e-01 : f32
    %120 = vector.broadcast %cst_48 : f32 to vector<8x8xf32>
    %121 = arith.mulf %118, %120 : vector<8x8xf32>
    %cst_49 = arith.constant 9.99999993E-9 : f32
    %122 = vector.broadcast %cst_49 : f32 to vector<8x8xf32>
    %123 = arith.addf %121, %122 : vector<8x8xf32>
    %124 = math.log %123 : vector<8x8xf32>
    %cst_50 = arith.constant -2.07944155 : f32
    %125 = vector.broadcast %cst_50 : f32 to vector<8x8xf32>
    %126 = arith.subf %124, %125 : vector<8x8xf32>
    %127 = arith.mulf %123, %126 : vector<8x8xf32>
    %cst_51 = arith.constant 1.000000e+00 : f32
    %128 = vector.broadcast %cst_51 : f32 to vector<1x8xf32>
    "tpu.trace_start"() <{level = 10 : i32, message = "ak,qk->aq"}> : () -> ()
    %cst_52 = arith.constant dense<0.000000e+00> : vector<1x8xf32>
    %129 = tpu.matmul %128, %127, %cst_52 {dimension_numbers = #tpu.dot_dimension_numbers<[1], [1], [0], [0], [0, 0, 1, 0], [], []>, precision = #tpu.contract_precision<fp32>} : vector<1x8xf32>, vector<8x8xf32>, vector<1x8xf32> -> vector<1x8xf32>
    "tpu.trace_stop"() : () -> ()
    %c0_53 = arith.constant 0 : index
    %c0_54 = arith.constant 0 : index
    %130 = vector.load %arg20[%c0_53, %c0_54] : memref<1x8xf32, #tpu.memory_space<vmem>>, vector<1x8xf32>
    %131 = arith.addf %130, %129 : vector<1x8xf32>
    %c0_55 = arith.constant 0 : index
    %c0_56 = arith.constant 0 : index
    %132 = vector.load %arg20[%c0_55, %c0_56] : memref<1x8xf32, #tpu.memory_space<vmem>>, vector<1x8xf32>
    tpu.vector_store %arg20[%c0_55, %c0_56], %131 {strides = array<i32>} : memref<1x8xf32, #tpu.memory_space<vmem>>, vector<1x8xf32>,
    %133 = tpu.concatenate %59, %79, %99, %119 in 1 : vector<8x8xf32>, vector<8x8xf32>, vector<8x8xf32>, vector<8x8xf32> -> vector<8x32xf32>
    %cst_57 = arith.constant dense<0.000000e+00> : vector<8x32xf32>
    %134 = tpu.matmul %133, %9, %cst_57 {dimension_numbers = #tpu.dot_dimension_numbers<[1], [0], [0], [1], [0, 0, 1, 1], [], []>, precision = #tpu.contract_precision<fp32>} : vector<8x32xf32>, vector<32x32xf32>, vector<8x32xf32> -> vector<8x32xf32>
    %135 = vector.shape_cast %24 : vector<32xf32> to vector<1x32xf32>
    %136 = vector.broadcast %135 : vector<1x32xf32> to vector<8x32xf32>
    %137 = arith.addf %134, %136 : vector<8x32xf32>
    %138 = arith.addf %3, %137 : vector<8x32xf32>
    %cst_58 = arith.constant dense<0.000000e+00> : vector<8xf32>
    %139 = vector.multi_reduction <add>, %138, %cst_58 [1] : vector<8x32xf32> to vector<8xf32>
    %140 = vector.shape_cast %139 : vector<8xf32> to vector<8x1xf32>
    %cst_59 = arith.constant 3.200000e+01 : f32
    %141 = vector.broadcast %cst_59 : f32 to vector<8x1xf32>
    %142 = arith.divf %140, %141 : vector<8x1xf32>
    %143 = vector.broadcast %142 : vector<8x1xf32> to vector<8x32xf32>
    %144 = arith.subf %138, %143 : vector<8x32xf32>
    %145 = arith.mulf %144, %144 : vector<8x32xf32>
    %cst_60 = arith.constant dense<0.000000e+00> : vector<8xf32>
    %146 = vector.multi_reduction <add>, %145, %cst_60 [1] : vector<8x32xf32> to vector<8xf32>
    %147 = vector.shape_cast %146 : vector<8xf32> to vector<8x1xf32>
    %cst_61 = arith.constant 3.200000e+01 : f32
    %148 = vector.broadcast %cst_61 : f32 to vector<8x1xf32>
    %149 = arith.divf %147, %148 : vector<8x1xf32>
    %150 = vector.broadcast %142 : vector<8x1xf32> to vector<8x32xf32>
    %151 = arith.subf %138, %150 : vector<8x32xf32>
    %cst_62 = arith.constant 9.99999974E-6 : f32
    %152 = vector.broadcast %cst_62 : f32 to vector<8x1xf32>
    %153 = arith.addf %149, %152 : vector<8x1xf32>
    %154 = math.rsqrt %153 : vector<8x1xf32>
    %155 = vector.broadcast %154 : vector<8x1xf32> to vector<8x32xf32>
    %156 = arith.mulf %151, %155 : vector<8x32xf32>
    %157 = vector.shape_cast %26 : vector<32xf32> to vector<1x32xf32>
    %158 = vector.broadcast %157 : vector<1x32xf32> to vector<8x32xf32>
    %159 = arith.mulf %156, %158 : vector<8x32xf32>
    %160 = vector.shape_cast %28 : vector<32xf32> to vector<1x32xf32>
    %161 = vector.broadcast %160 : vector<1x32xf32> to vector<8x32xf32>
    %162 = arith.addf %159, %161 : vector<8x32xf32>
    %cst_63 = arith.constant dense<0.000000e+00> : vector<8x64xf32>
    %163 = tpu.matmul %162, %12, %cst_63 {dimension_numbers = #tpu.dot_dimension_numbers<[1], [0], [0], [1], [0, 0, 1, 1], [], []>, precision = #tpu.contract_precision<fp32>} : vector<8x32xf32>, vector<32x64xf32>, vector<8x64xf32> -> vector<8x64xf32>
    %164 = vector.shape_cast %19 : vector<64xf32> to vector<1x64xf32>
    %165 = vector.broadcast %164 : vector<1x64xf32> to vector<8x64xf32>
    %166 = arith.addf %163, %165 : vector<8x64xf32>
    %cst_64 = arith.constant 0.000000e+00 : f32
    %167 = vector.broadcast %cst_64 : f32 to vector<8x64xf32>
    %168 = arith.maximumf %166, %167 : vector<8x64xf32>
    %cst_65 = arith.constant dense<0.000000e+00> : vector<8x32xf32>
    %169 = tpu.matmul %168, %15, %cst_65 {dimension_numbers = #tpu.dot_dimension_numbers<[1], [0], [0], [1], [0, 0, 1, 1], [], []>, precision = #tpu.contract_precision<fp32>} : vector<8x64xf32>, vector<64x32xf32>, vector<8x32xf32> -> vector<8x32xf32>
    %170 = vector.shape_cast %34 : vector<32xf32> to vector<1x32xf32>
    %171 = vector.broadcast %170 : vector<1x32xf32> to vector<8x32xf32>
    %172 = arith.addf %169, %171 : vector<8x32xf32>
    %173 = arith.addf %162, %172 : vector<8x32xf32>
    %cst_66 = arith.constant dense<0.000000e+00> : vector<8xf32>
    %174 = vector.multi_reduction <add>, %173, %cst_66 [1] : vector<8x32xf32> to vector<8xf32>
    %175 = vector.shape_cast %174 : vector<8xf32> to vector<8x1xf32>
    %cst_67 = arith.constant 3.200000e+01 : f32
    %176 = vector.broadcast %cst_67 : f32 to vector<8x1xf32>
    %177 = arith.divf %175, %176 : vector<8x1xf32>
    %178 = vector.broadcast %177 : vector<8x1xf32> to vector<8x32xf32>
    %179 = arith.subf %173, %178 : vector<8x32xf32>
    %180 = arith.mulf %179, %179 : vector<8x32xf32>
    %cst_68 = arith.constant dense<0.000000e+00> : vector<8xf32>
    %181 = vector.multi_reduction <add>, %180, %cst_68 [1] : vector<8x32xf32> to vector<8xf32>
    %182 = vector.shape_cast %181 : vector<8xf32> to vector<8x1xf32>
    %cst_69 = arith.constant 3.200000e+01 : f32
    %183 = vector.broadcast %cst_69 : f32 to vector<8x1xf32>
    %184 = arith.divf %182, %183 : vector<8x1xf32>
    %185 = vector.broadcast %177 : vector<8x1xf32> to vector<8x32xf32>
    %186 = arith.subf %173, %185 : vector<8x32xf32>
    %cst_70 = arith.constant 9.99999974E-6 : f32
    %187 = vector.broadcast %cst_70 : f32 to vector<8x1xf32>
    %188 = arith.addf %184, %187 : vector<8x1xf32>
    %189 = math.rsqrt %188 : vector<8x1xf32>
    %190 = vector.broadcast %189 : vector<8x1xf32> to vector<8x32xf32>
    %191 = arith.mulf %186, %190 : vector<8x32xf32>
    %192 = vector.shape_cast %30 : vector<32xf32> to vector<1x32xf32>
    %193 = vector.broadcast %192 : vector<1x32xf32> to vector<8x32xf32>
    %194 = arith.mulf %191, %193 : vector<8x32xf32>
    %195 = vector.shape_cast %32 : vector<32xf32> to vector<1x32xf32>
    %196 = vector.broadcast %195 : vector<1x32xf32> to vector<8x32xf32>
    %197 = arith.addf %194, %196 : vector<8x32xf32>
    %c0_71 = arith.constant 0 : index
    %c0_72 = arith.constant 0 : index
    %198 = vector.load %arg19[%c0_71, %c0_72] : memref<8x32xf32, #tpu.memory_space<vmem>>, vector<8x32xf32>
    tpu.vector_store %arg19[%c0_71, %c0_72], %197 {strides = array<i32>} : memref<8x32xf32, #tpu.memory_space<vmem>>, vector<8x32xf32>,
    %c1_i32 = arith.constant 1 : i32
    %199 = arith.cmpi eq, %arg1, %c1_i32 : i32
    %200 = arith.extui %199 : i1 to i32
    %c0_i32_73 = arith.constant 0 : i32
    %201 = arith.cmpi ne, %200, %c0_i32_73 : i32
    scf.if %201 {
      %c0_74 = arith.constant 0 : index
      %c0_75 = arith.constant 0 : index
      %202 = vector.load %arg20[%c0_74, %c0_75] : memref<1x8xf32, #tpu.memory_space<vmem>>, vector<1x8xf32>
      %c0_76 = arith.constant 0 : index
      %c0_77 = arith.constant 0 : index
      %c0_78 = arith.constant 0 : index
      %203 = vector.load %arg16[%c0_76, %c0_77, %c0_78] : memref<1x1x8xf32, #tpu.memory_space<vmem>>, vector<1x1x8xf32>
      %204 = vector.shape_cast %203 : vector<1x1x8xf32> to vector<1x8xf32>
      %205 = vector.shape_cast %202 : vector<1x8xf32> to vector<1x1x8xf32>
      tpu.vector_store %arg16[%c0_76, %c0_77, %c0_78], %205 {strides = array<i32>} : memref<1x1x8xf32, #tpu.memory_space<vmem>>, vector<1x1x8xf32>,
      %c0_79 = arith.constant 0 : index
      %c0_80 = arith.constant 0 : index
      %c0_81 = arith.constant 0 : index
      %206 = vector.load %arg17[%c0_79, %c0_80, %c0_81] : memref<1x8x32xf32, #tpu.memory_space<vmem>>, vector<1x8x32xf32>
      %207 = vector.shape_cast %206 : vector<1x8x32xf32> to vector<8x32xf32>
      %208 = vector.shape_cast %197 : vector<8x32xf32> to vector<1x8x32xf32>
      tpu.vector_store %arg17[%c0_79, %c0_80, %c0_81], %208 {strides = array<i32>} : memref<1x8x32xf32, #tpu.memory_space<vmem>>, vector<1x8x32xf32>,
      %c0_82 = arith.constant 0 : index
      %c0_83 = arith.constant 0 : index
      %209 = vector.load %arg11[%c0_82, %c0_83] : memref<32x24xf32, #tpu.memory_space<vmem>>, vector<32x24xf32>
      %cst_84 = arith.constant dense<0.000000e+00> : vector<8x24xf32>
      %210 = tpu.matmul %197, %209, %cst_84 {dimension_numbers = #tpu.dot_dimension_numbers<[1], [0], [0], [1], [0, 0, 1, 1], [], []>, precision = #tpu.contract_precision<fp32>} : vector<8x32xf32>, vector<32x24xf32>, vector<8x24xf32> -> vector<8x24xf32>
      %c0_85 = arith.constant 0 : index
      %c0_86 = arith.constant 0 : index
      %211 = vector.load %arg12[%c0_85, %c0_86] : memref<1x24xf32, #tpu.memory_space<vmem>>, vector<1x24xf32>
      %212 = vector.shape_cast %211 : vector<1x24xf32> to vector<24xf32>
      %213 = vector.shape_cast %212 : vector<24xf32> to vector<1x24xf32>
      %214 = vector.broadcast %213 : vector<1x24xf32> to vector<8x24xf32>
      %215 = arith.addf %210, %214 : vector<8x24xf32>
      %c0_87 = arith.constant 0 : index
      %c0_88 = arith.constant 0 : index
      %c0_89 = arith.constant 0 : index
      %216 = vector.load %arg14[%c0_87, %c0_88, %c0_89] : memref<1x8x24xf32, #tpu.memory_space<vmem>>, vector<1x8x24xf32>
      %217 = vector.shape_cast %216 : vector<1x8x24xf32> to vector<8x24xf32>
      %218 = vector.shape_cast %215 : vector<8x24xf32> to vector<1x8x24xf32>
      tpu.vector_store %arg14[%c0_87, %c0_88, %c0_89], %218 {strides = array<i32>} : memref<1x8x24xf32, #tpu.memory_space<vmem>>, vector<1x8x24xf32>,
      %219 = vector.extract_strided_slice %215 {offsets = [0, 8], sizes = [8, 16], strides = [1, 1]} : vector<8x24xf32> to vector<8x16xf32>
      %cst_90 = arith.constant 0.000000e+00 : f32
      %220 = vector.broadcast %cst_90 : f32 to vector<8x16xf32>
      %221 = arith.maximumf %219, %220 : vector<8x16xf32>
      %c0_91 = arith.constant 0 : index
      %c0_92 = arith.constant 0 : index
      %222 = vector.load %arg13[%c0_91, %c0_92] : memref<2x16xf32, #tpu.memory_space<vmem>>, vector<2x16xf32>
      %223 = vector.extract_strided_slice %222 {offsets = [0, 0], sizes = [1, 16], strides = [1, 1]} : vector<2x16xf32> to vector<1x16xf32>
      "tpu.trace_start"() <{level = 10 : i32, message = "aj,qj->aq"}> : () -> ()
      %cst_93 = arith.constant dense<0.000000e+00> : vector<1x8xf32>
      %224 = tpu.matmul %223, %221, %cst_93 {dimension_numbers = #tpu.dot_dimension_numbers<[1], [1], [0], [0], [0, 0, 1, 0], [], []>, precision = #tpu.contract_precision<fp32>} : vector<1x16xf32>, vector<8x16xf32>, vector<1x8xf32> -> vector<1x8xf32>
      "tpu.trace_stop"() : () -> ()
      %225 = vector.extract_strided_slice %222 {offsets = [1, 0], sizes = [1, 1], strides = [1, 1]} : vector<2x16xf32> to vector<1x1xf32>
      %226 = vector.broadcast %225 : vector<1x1xf32> to vector<1x8xf32>
      %227 = arith.addf %224, %226 : vector<1x8xf32>
      %228 = arith.negf %227 : vector<1x8xf32>
      %229 = math.exp %228 : vector<1x8xf32>
      %cst_94 = arith.constant 1.000000e+00 : f32
      %230 = vector.broadcast %cst_94 : f32 to vector<1x8xf32>
      %231 = arith.addf %230, %229 : vector<1x8xf32>
      %232 = arith.divf %230, %231 : vector<1x8xf32>
      %c0_95 = arith.constant 0 : index
      %c0_96 = arith.constant 0 : index
      %c0_97 = arith.constant 0 : index
      %233 = vector.load %arg15[%c0_95, %c0_96, %c0_97] : memref<1x1x8xf32, #tpu.memory_space<vmem>>, vector<1x1x8xf32>
      %234 = vector.shape_cast %233 : vector<1x1x8xf32> to vector<1x8xf32>
      %235 = vector.shape_cast %232 : vector<1x8xf32> to vector<1x1x8xf32>
      tpu.vector_store %arg15[%c0_95, %c0_96, %c0_97], %235 {strides = array<i32>} : memref<1x1x8xf32, #tpu.memory_space<vmem>>, vector<1x1x8xf32>,
    } else {
    }
    return
  }
  func.func @transform_0(%arg0: i32, %arg1: i32) -> (i32, i32, i32) {
    %c0_i32 = arith.constant 0 : i32
    %c0_i32_0 = arith.constant 0 : i32
    %c0_i32_1 = arith.constant 0 : i32
    return %arg0, %c0_i32, %c0_i32_0 : i32, i32, i32
  }
  func.func @transform_1(%arg0: i32, %arg1: i32) -> (i32, i32) {
    %c0_i32 = arith.constant 0 : i32
    %c0_i32_0 = arith.constant 0 : i32
    %c0_i32_1 = arith.constant 0 : i32
    return %c0_i32, %c0_i32_0 : i32, i32
  }
  func.func @transform_2(%arg0: i32, %arg1: i32) -> (i32, i32) {
    %c0_i32 = arith.constant 0 : i32
    %c0_i32_0 = arith.constant 0 : i32
    %c0_i32_1 = arith.constant 0 : i32
    return %c0_i32, %c0_i32_0 : i32, i32
  }
  func.func @transform_3(%arg0: i32, %arg1: i32) -> (i32, i32, i32) {
    %c0_i32 = arith.constant 0 : i32
    %c0_i32_0 = arith.constant 0 : i32
    %c0_i32_1 = arith.constant 0 : i32
    %c0_i32_2 = arith.constant 0 : i32
    return %c0_i32, %c0_i32_0, %c0_i32_1 : i32, i32, i32
  }
  func.func @transform_4(%arg0: i32, %arg1: i32) -> (i32, i32, i32) {
    %c0_i32 = arith.constant 0 : i32
    %c0_i32_0 = arith.constant 0 : i32
    %c0_i32_1 = arith.constant 0 : i32
    %c0_i32_2 = arith.constant 0 : i32
    return %c0_i32, %c0_i32_0, %c0_i32_1 : i32, i32, i32
  }
  func.func @transform_5(%arg0: i32, %arg1: i32) -> (i32, i32, i32) {
    %c0_i32 = arith.constant 0 : i32
    %c0_i32_0 = arith.constant 0 : i32
    %c0_i32_1 = arith.constant 0 : i32
    %c0_i32_2 = arith.constant 0 : i32
    return %c0_i32, %c0_i32_0, %c0_i32_1 : i32, i32, i32
  }
  func.func @transform_6(%arg0: i32, %arg1: i32) -> (i32, i32, i32) {
    %c0_i32 = arith.constant 0 : i32
    %c0_i32_0 = arith.constant 0 : i32
    %c0_i32_1 = arith.constant 0 : i32
    %c0_i32_2 = arith.constant 0 : i32
    return %c0_i32, %c0_i32_0, %c0_i32_1 : i32, i32, i32
  }
  func.func @transform_7(%arg0: i32, %arg1: i32) -> (i32, i32, i32) {
    %c0_i32 = arith.constant 0 : i32
    %c0_i32_0 = arith.constant 0 : i32
    %c0_i32_1 = arith.constant 0 : i32
    %c0_i32_2 = arith.constant 0 : i32
    return %c0_i32, %c0_i32_0, %c0_i32_1 : i32, i32, i32
  }
  func.func @transform_8(%arg0: i32, %arg1: i32) -> (i32, i32, i32) {
    %c0_i32 = arith.constant 0 : i32
    %c0_i32_0 = arith.constant 0 : i32
    %c0_i32_1 = arith.constant 0 : i32
    %c0_i32_2 = arith.constant 0 : i32
    return %c0_i32, %c0_i32_0, %c0_i32_1 : i32, i32, i32
  }
  func.func @transform_9(%arg0: i32, %arg1: i32) -> (i32, i32) {
    %c0_i32 = arith.constant 0 : i32
    %c0_i32_0 = arith.constant 0 : i32
    %c0_i32_1 = arith.constant 0 : i32
    return %c0_i32, %c0_i32_0 : i32, i32
  }
  func.func @transform_10(%arg0: i32, %arg1: i32) -> (i32, i32) {
    %c0_i32 = arith.constant 0 : i32
    %c0_i32_0 = arith.constant 0 : i32
    %c0_i32_1 = arith.constant 0 : i32
    return %c0_i32, %c0_i32_0 : i32, i32
  }
  func.func @transform_11(%arg0: i32, %arg1: i32) -> (i32, i32) {
    %c0_i32 = arith.constant 0 : i32
    %c0_i32_0 = arith.constant 0 : i32
    %c0_i32_1 = arith.constant 0 : i32
    return %c0_i32, %c0_i32_0 : i32, i32
  }
  func.func @transform_12(%arg0: i32, %arg1: i32) -> (i32, i32, i32) {
    %c0_i32 = arith.constant 0 : i32
    %c0_i32_0 = arith.constant 0 : i32
    %c0_i32_1 = arith.constant 0 : i32
    return %arg0, %c0_i32, %c0_i32_0 : i32, i32, i32
  }
  func.func @transform_13(%arg0: i32, %arg1: i32) -> (i32, i32, i32) {
    %c0_i32 = arith.constant 0 : i32
    %c0_i32_0 = arith.constant 0 : i32
    %c0_i32_1 = arith.constant 0 : i32
    return %arg0, %c0_i32, %c0_i32_0 : i32, i32, i32
  }
  func.func @transform_14(%arg0: i32, %arg1: i32) -> (i32, i32, i32) {
    %c0_i32 = arith.constant 0 : i32
    %c0_i32_0 = arith.constant 0 : i32
    %c0_i32_1 = arith.constant 0 : i32
    return %arg0, %c0_i32, %c0_i32_0 : i32, i32, i32
  }
  func.func @transform_15(%arg0: i32, %arg1: i32) -> (i32, i32, i32) {
    %c0_i32 = arith.constant 0 : i32
    %c0_i32_0 = arith.constant 0 : i32
    %c0_i32_1 = arith.constant 0 : i32
    return %arg0, %c0_i32, %c0_i32_0 : i32, i32, i32
  }
  func.func @transform_16(%arg0: i32, %arg1: i32) -> (i32, i32, i32, i32) {
    %c2_i32 = arith.constant 2 : i32
    %0 = arith.muli %arg0, %c2_i32 : i32
    %1 = arith.addi %0, %arg1 : i32
    %c0_i32 = arith.constant 0 : i32
    %c0_i32_0 = arith.constant 0 : i32
    %c0_i32_1 = arith.constant 0 : i32
    %c0_i32_2 = arith.constant 0 : i32
    return %1, %c0_i32, %c0_i32_0, %c0_i32_1 : i32, i32, i32, i32
  }
}

</mosaic_0001>

<bundles_post_ra>
// kernel: tpu_custom_call.1
= control target key start
LH: loop header
LB: loop body
LE: loop exit
PB: predicated region body
PF: predicated region fallthrough
CT: control target
= control target key end

     0   :  { %s12609_s0 = inlined_call_operand.hbm [shape: f32[2,8,8], index: 0, kind: input, shape index: {}]   ;;  %s12610_s1 = inlined_call_operand.hbm [shape: f32[8,32], index: 1, kind: input, shape index: {}]   ;;  %s12611_s2 = inlined_call_operand.hbm [shape: f32[8,32], index: 2, kind: input, shape index: {}]   ;;  %s12612_s3 = inlined_call_operand.hbm [shape: f32[2,32,96], index: 3, kind: input, shape index: {}]   ;;  %s12613_s4 = inlined_call_operand.hbm [shape: f32[2,32,32], index: 4, kind: input, shape index: {}]   ;;  %s12614_s5 = inlined_call_operand.hbm [shape: f32[2,6,32], index: 5, kind: input, shape index: {}]   ;;  %s12615_s6 = inlined_call_operand.hbm [shape: f32[2,32,64], index: 6, kind: input, shape index: {}]   ;;  %s12616_s7 = inlined_call_operand.hbm [shape: f32[2,1,64], index: 7, kind: input, shape index: {}]   ;;  %s12617_s8 = inlined_call_operand.hbm [shape: f32[2,64,32], index: 8, kind: input, shape index: {}]   ;;  %s12618_s9 = inlined_call_operand.hbm [shape: f32[32,24], index: 9, kind: input, shape index: {}]   ;;  %s12619_s10 = inlined_call_operand.hbm [shape: f32[1,24], index: 10, kind: input, shape index: {}]   ;;  %s12620_s11 = inlined_call_operand.hbm [shape: f32[2,16], index: 11, kind: input, shape index: {}]   ;;  %s12621_s12 = inlined_call_operand.hbm [shape: f32[2,8,24], index: 12, kind: output, shape index: {0}]   ;;  %s12622_s13 = inlined_call_operand.hbm [shape: f32[2,1,8], index: 13, kind: output, shape index: {1}]   ;;  %s12623_s14 = inlined_call_operand.hbm [shape: f32[2,1,8], index: 14, kind: output, shape index: {2}]   ;;  %s12624_s15 = inlined_call_operand.hbm [shape: f32[2,8,32], index: 15, kind: output, shape index: {3}]   ;;  %s12625_s16 = inlined_call_operand.hbm [shape: f32[4,4,8,8], index: 16, kind: output, shape index: {4}]  }
   0x1   :  { %12661 = sst [smem:[#allocation53_spill]] %s12609_s0 }
   0x2   :  { %12662 = sst [smem:[#allocation54_spill]] %s12610_s1 }
   0x3   :  { %12663 = sst [smem:[#allocation55_spill]] %s12611_s2 }
   0x4   :  { %12664 = sst [smem:[#allocation56_spill]] %s12612_s3 }
   0x5   :  { %12665 = sst [smem:[#allocation57_spill]] %s12613_s4 }
   0x6   :  { %12666 = sst [smem:[#allocation58_spill]] %s12614_s5 }
   0x7   :  { %12667 = sst [smem:[#allocation59_spill]] %s12615_s6 }
   0x8   :  { %12668 = sst [smem:[#allocation60_spill]] %s12616_s7 }
   0x9   :  { %12669 = sst [smem:[#allocation61_spill]] %s12617_s8 }
   0xa   :  { %12670 = sst [smem:[#allocation62_spill]] %s12618_s9 }
   0xb   :  { %12671 = sst [smem:[#allocation63_spill]] %s12619_s10 }
   0xc   :  { %12672 = sst [smem:[#allocation64_spill]] %s12620_s11 }
   0xd   :  { %12673 = sst [smem:[#allocation65_spill]] %s12621_s12 }
   0xe   :  { %12674 = sst [smem:[#allocation66_spill]] %s12622_s13 }
   0xf   :  { %12675 = sst [smem:[#allocation67_spill]] %s12623_s14 }
  0x10   :  { %12676 = sst [smem:[#allocation68_spill]] %s12624_s15 }
  0x11   :  { %12677 = sst [smem:[#allocation69_spill]] %s12625_s16 }
  0x12   :  { %22 = vsyncpa [#allocation5], 0 }
  0x13   :  { %24 = vsyncpa [#allocation5 + $0x1], 0 }
  0x14   :  { %25 = vsyncpa [#allocation8], 0 }
  0x15   :  { %26 = vsyncpa [#allocation11], 0 }
  0x16   :  { %27 = vsyncpa [#allocation14], 0 }
  0x17   :  { %28 = vsyncpa [#allocation17], 0 }
  0x18   :  { %29 = vsyncpa [#allocation20], 0 }
  0x19   :  { %30 = vsyncpa [#allocation23], 0 }
  0x1a   :  { %31 = vsyncpa [#allocation6], 0 }
  0x1b   :  { %33 = vsyncpa [#allocation6 + $0x1], 0 }
  0x1c   :  { %34 = vsyncpa [#allocation26], 0 }
  0x1d   :  { %36 = vsyncpa [#allocation26 + $0x1], 0 }
  0x1e   :  { %37 = vsyncpa [#allocation29], 0 }
  0x1f   :  { %39 = vsyncpa [#allocation29 + $0x1], 0  ;;  %s11302_s21 = smov 0   ;;  %s11304_s22 = smov 0  }
  0x20   :  { %s11306_s23 = smov 0   ;;  %s11308_s24 = smov 0  }
  0x21   :  { %s11310_s25 = smov 0   ;;  %s11312_s26 = smov 0  }
  0x22   :  { %s11314_s27 = smov 0   ;;  %s11316_s28 = smov 0  }
  0x23   :  { %s11318_s29 = smov 0   ;;  %s11320_s30 = smov 0  }
  0x24   :  { %s11322_s0 = smov 0  }
  0x25 LB: > { %12678 = sst [smem:[#allocation42_spill]] %s11127_s21  ;;  %s11358_s17 = sadd.s32 4294967295, %s11167_s0   ;;  %s11167_s0 = sphi %s11322_s0, %s45_s0   ;;  %s11163_s30 = sphi %s11320_s30, %s12770_s30   ;;  %s11159_s29 = sphi %s11318_s29, %s12769_s29   ;;  %s11155_s28 = sphi %s11316_s28, %s12768_s28   ;;  %s11151_s27 = sphi %s11314_s27, %s12767_s27   ;;  %s11147_s26 = sphi %s11312_s26, %s12775_s26   ;;  %s11143_s25 = sphi %s11310_s25, %s12774_s25   ;;  %s11139_s24 = sphi %s11308_s24, %s12773_s24   ;;  %s11135_s23 = sphi %s11306_s23, %s12772_s23   ;;  %s11131_s22 = sphi %s11304_s22, %s12771_s22   ;;  %s11127_s21 = sphi %s11302_s21, %s12764_s21  }
  0x26   : > { %12679 = sst [smem:[#allocation43_spill]] %s11131_s22  ;;  %p8847_p0 = scmp.ge.s32.totalorder %s11167_s0, 1 }
  0x27   : > { %12680 = sst [smem:[#allocation44_spill]] %s11135_s23  ;;  %p12636_p1 = scmp.eq.s32.totalorder %s11358_s17, 0 }
  0x28   : > { %12681 = sst [smem:[#allocation45_spill]] %s11151_s27  ;;  %p453_p2 = scmp.lt.s32.totalorder %s11167_s0, 5 }
  0x29   : > { %12682 = sst [smem:[#allocation46_spill]] %s11155_s28  ;;  %s11169_s19 = smov [#allocation7]  }
  0x2a   : > { %12683 = sst [smem:[#allocation47_spill]] %s11159_s29  ;;  %p11363_p3 = pnand %p8847_p0, %p453_p2 }
  0x2b   : > { %12684 = sst [smem:[#allocation48_spill]] %s11163_s30  ;;  %s466_s20 = sshll.u32 %s11169_s19, 4  ;;  %s467_s20 = int_to_ptr.vmem [resolvable:$true] %s466_s20 }
  0x2c   : > { %12685 = sst [smem:[#allocation49_spill]] %s11358_s17  ;;  %p10323_p4 = pneg %p11363_p3 }
  0x2d   : > { %s12686_s18 = scalar_select %p11363_p3, 1, 0 }
  0x2e   : > { %s11170_s16 = smov [#allocation10]   ;;  %p11371_p5 = pnand %p10323_p4, %p12636_p1 }
  0x2f   : > { %12687 = sst [smem:[#allocation50_spill]] %s12686_s18  ;;  %s487_s14 = sshll.u32 %s11170_s16, 4  ;;  %s11375_s14 = int_to_ptr.vmem [resolvable:$true] %s487_s14 }
  0x30   : > { %s11171_s15 = smov [#allocation13]   ;;  %s12689_s1 = sld [smem:[#allocation54_spill]] }
  0x31   : > { %s11377_s13 = sshll.u32 %s11171_s15, 4  ;;  %p11387_p7 = pneg %p11371_p5  ;;  %s514_s13 = int_to_ptr.vmem [resolvable:$true] %s11377_s13 }
  0x36   : > { %s10559_s19 = scalar_lea.hbm %s12689_s1, 128 }
  0x37   : > { %p10560_p6 = scmp.ne.s32.totalorder %s12689_s1, %s10559_s19  ;;  %p10566_p10 = scmp.lt.u32.totalorder %s10559_s19, %s12689_s1 }
  0x39   : > { %p10562_p8 = pnand %p11387_p7, %p10560_p6 }
  0x3b   : > { %p10563_p9 = pneg %p10562_p8 }
  0x3d   : > { %p10568_p11 = pnand %p10566_p10, %p10563_p9 }
  0x3f   : > { %10571 = shalt.err (!%p10568_p11)
}
  0x40   : > { %s10572_s27 = scalar_lea.vmem %s467_s20, 128  ;;  %p10580_p2 = scmp.lt.s32.totalorder %s467_s20, %s467_s20 }
  0x41   : > { %p10573_p12 = scmp.ne.s32.totalorder %s467_s20, %s10572_s27  ;;  %p10581_p4 = scmp.lt.s32.totalorder %s10572_s27, %s10572_s27 }
  0x43   : > { %p10575_p13 = pnand %p10573_p12, %p11387_p7  ;;  %p10582_p1 = por %p10581_p4, %p10580_p2 }
  0x45   : > { %p10576_p0 = pneg %p10575_p13 }
  0x47   : > { %p10583_p3 = pnand %p10582_p1, %p10576_p0 }
  0x49   : > { %10586 = shalt.err (!%p10583_p3)
}
  0x4a   : > { %10326 = dma.hbm_to_vmem [thread:$0]  (!%p11371_p5), %s12689_s1, 128, %s467_s20, [#allocation8]  }
  0x4b   : > { %s12691_s3 = sld [smem:[#allocation56_spill]] }
  0x51   : > { %s10587_s19 = scalar_lea.hbm %s12691_s3, 1024 }
  0x52   : > { %p10588_p6 = scmp.ne.s32.totalorder %s12691_s3, %s10587_s19  ;;  %p10594_p1 = scmp.lt.u32.totalorder %s10587_s19, %s12691_s3 }
  0x54   : > { %p10590_p8 = pnand %p10588_p6, %p11387_p7 }
  0x56   : > { %p10591_p9 = pneg %p10590_p8 }
  0x58   : > { %p10596_p3 = pnand %p10594_p1, %p10591_p9 }
  0x5a   : > { %10599 = shalt.err (!%p10596_p3)
}
  0x5b   : > { %s10600_s20 = scalar_lea.vmem %s11375_s14, 1024  ;;  %p10608_p13 = scmp.lt.s32.totalorder %s11375_s14, %s11375_s14 }
  0x5c   : > { %p10601_p10 = scmp.ne.s32.totalorder %s11375_s14, %s10600_s20  ;;  %p10609_p0 = scmp.lt.s32.totalorder %s10600_s20, %s10600_s20 }
  0x5e   : > { %p10603_p11 = pnand %p10601_p10, %p11387_p7  ;;  %p10610_p2 = por %p10609_p0, %p10608_p13 }
  0x60   : > { %p10604_p12 = pneg %p10603_p11 }
  0x62   : > { %p10611_p4 = pnand %p10610_p2, %p10604_p12 }
  0x64   : > { %10614 = shalt.err (!%p10611_p4)
}
  0x65   : > { %s12643_s23 = smov 128   ;;  %s12645_s17 = smov 8  }
  0x66   : > { %10332 = dma.hbm_to_vmem [thread:$0]  (!%p11371_p5), %s12691_s3, 1024, %s11375_s14, [#allocation11], %s12643_s23, %s12643_s23, %s12645_s17  }
  0x67   : > { %s12692_s5 = sld [smem:[#allocation58_spill]] }
  0x6d   : > { %s10615_s19 = scalar_lea.hbm %s12692_s5, 256 }
  0x6e   : > { %p10616_p6 = scmp.ne.s32.totalorder %s12692_s5, %s10615_s19  ;;  %p10622_p1 = scmp.lt.u32.totalorder %s10615_s19, %s12692_s5 }
  0x70   : > { %p10618_p8 = pnand %p10616_p6, %p11387_p7 }
  0x72   : > { %p10619_p9 = pneg %p10618_p8 }
  0x74   : > { %p10624_p3 = pnand %p10622_p1, %p10619_p9 }
  0x76   : > { %10627 = shalt.err (!%p10624_p3)
}
  0x77   : > { %s10628_s21 = scalar_lea.vmem %s514_s13, 256  ;;  %p10636_p13 = scmp.lt.s32.totalorder %s514_s13, %s514_s13 }
  0x78   : > { %p10629_p10 = scmp.ne.s32.totalorder %s514_s13, %s10628_s21  ;;  %p10637_p0 = scmp.lt.s32.totalorder %s10628_s21, %s10628_s21 }
  0x7a   : > { %p10631_p11 = pnand %p10629_p10, %p11387_p7  ;;  %p10638_p2 = por %p10637_p0, %p10636_p13 }
  0x7c   : > { %p10632_p12 = pneg %p10631_p11 }
  0x7e   : > { %p10639_p4 = pnand %p10638_p2, %p10632_p12 }
  0x80   : > { %10642 = shalt.err (!%p10639_p4)
}
  0x81   : > { %10338 = dma.hbm_to_vmem [thread:$0]  (!%p11371_p5), %s12692_s5, 256, %s514_s13, [#allocation14], %s12643_s23, %s12643_s23, %s12645_s17  }
  0x82   : > { %s11174_s28 = smov [#allocation16]   ;;  %s12693_s7 = sld [smem:[#allocation60_spill]] }
  0x83   : > { %s539_s22 = sshll.u32 %s11174_s28, 4  ;;  %s540_s22 = int_to_ptr.vmem [resolvable:$true] %s539_s22 }
  0x88   : > { %s10643_s15 = scalar_lea.hbm %s12693_s7, 32 }
  0x89   : > { %p10644_p6 = scmp.ne.s32.totalorder %s12693_s7, %s10643_s15  ;;  %p10650_p1 = scmp.lt.u32.totalorder %s10643_s15, %s12693_s7 }
  0x8b   : > { %p10646_p8 = pnand %p10644_p6, %p11387_p7 }
  0x8d   : > { %p10647_p9 = pneg %p10646_p8 }
  0x8f   : > { %p10652_p3 = pnand %p10650_p1, %p10647_p9 }
  0x91   : > { %10655 = shalt.err (!%p10652_p3)
}
  0x92   : > { %s10656_s13 = scalar_lea.vmem %s540_s22, 32  ;;  %p10664_p13 = scmp.lt.s32.totalorder %s540_s22, %s540_s22 }
  0x93   : > { %p10657_p10 = scmp.ne.s32.totalorder %s540_s22, %s10656_s13  ;;  %p10665_p0 = scmp.lt.s32.totalorder %s10656_s13, %s10656_s13 }
  0x95   : > { %p10659_p11 = pnand %p10657_p10, %p11387_p7  ;;  %p10666_p2 = por %p10665_p0, %p10664_p13 }
  0x97   : > { %p10660_p12 = pneg %p10659_p11 }
  0x99   : > { %p10667_p4 = pnand %p10666_p2, %p10660_p12 }
  0x9b   : > { %10670 = shalt.err (!%p10667_p4)
}
  0x9c   : > { %s11175_s1 = smov 16   ;;  %s11176_s14 = smov 1  }
  0x9d   : > { %10344 = dma.hbm_to_vmem [thread:$0]  (!%p11371_p5), %s12693_s7, 32, %s540_s22, [#allocation17], %s11175_s1, %s11175_s1, %s11176_s14  }
  0x9e   : > { %s11177_s18 = smov [#allocation19]   ;;  %s11178_s15 = smov [#allocation9]  }
  0x9f   : > { %s565_s19 = sshll.u32 %s11177_s18, 4  ;;  %s477_s27 = sshll.u32 %s11178_s15, 4  ;;  %s566_s19 = int_to_ptr.vmem [resolvable:$true] %s565_s19  ;;  %s11469_s27 = int_to_ptr.vmem [resolvable:$true] %s477_s27 }
  0xa0   : > { %s12694_s9 = sld [smem:[#allocation62_spill]] }
  0xa6   : > { %s10671_s13 = scalar_lea.hbm %s12694_s9, 512 }
  0xa7   : > { %p10672_p6 = scmp.ne.s32.totalorder %s12694_s9, %s10671_s13  ;;  %p10678_p1 = scmp.lt.u32.totalorder %s10671_s13, %s12694_s9 }
  0xa9   : > { %p10674_p8 = pnand %p10672_p6, %p11387_p7 }
  0xab   : > { %p10675_p9 = pneg %p10674_p8 }
  0xad   : > { %p10680_p3 = pnand %p10678_p1, %p10675_p9 }
  0xaf   : > { %10683 = shalt.err (!%p10680_p3)
}
  0xb0   : > { %s10684_s1 = scalar_lea.vmem %s566_s19, 512  ;;  %p10692_p13 = scmp.lt.s32.totalorder %s566_s19, %s566_s19 }
  0xb1   : > { %p10685_p10 = scmp.ne.s32.totalorder %s566_s19, %s10684_s1  ;;  %p10693_p0 = scmp.lt.s32.totalorder %s10684_s1, %s10684_s1 }
  0xb3   : > { %p10687_p11 = pnand %p10685_p10, %p11387_p7  ;;  %p10694_p2 = por %p10693_p0, %p10692_p13 }
  0xb5   : > { %p10688_p12 = pneg %p10687_p11 }
  0xb7   : > { %p10695_p4 = pnand %p10694_p2, %p10688_p12 }
  0xb9   : > { %10698 = shalt.err (!%p10695_p4)
}
  0xba   : > { %s12695_s23 = smov 8   ;;  %s12696_s17 = smov 128  }
  0xbb   : > { %10350 = dma.hbm_to_vmem [thread:$0]  (!%p11371_p5), %s12694_s9, 512, %s566_s19, [#allocation20], %s12696_s17, %s12696_s17, %s12695_s23  }
  0xbc   : > { %s12697_s2 = sld [smem:[#allocation55_spill]] }
  0xc2   : > { %s10699_s20 = scalar_lea.hbm %s12697_s2, 128 }
  0xc3   : > { %p10700_p6 = scmp.ne.s32.totalorder %s12697_s2, %s10699_s20  ;;  %p10706_p1 = scmp.lt.u32.totalorder %s10699_s20, %s12697_s2 }
  0xc5   : > { %p10702_p8 = pnand %p10700_p6, %p11387_p7 }
  0xc7   : > { %p10703_p9 = pneg %p10702_p8 }
  0xc9   : > { %p10708_p3 = pnand %p10706_p1, %p10703_p9 }
  0xcb   : > { %10711 = shalt.err (!%p10708_p3)
}
  0xcc   : > { %s10712_s19 = scalar_lea.vmem %s11469_s27, 128  ;;  %p10720_p13 = scmp.lt.s32.totalorder %s11469_s27, %s11469_s27 }
  0xcd   : > { %p10713_p10 = scmp.ne.s32.totalorder %s11469_s27, %s10712_s19  ;;  %p10721_p0 = scmp.lt.s32.totalorder %s10712_s19, %s10712_s19 }
  0xcf   : > { %p10715_p11 = pnand %p10713_p10, %p11387_p7  ;;  %p10722_p2 = por %p10721_p0, %p10720_p13 }
  0xd1   : > { %p10716_p12 = pneg %p10715_p11 }
  0xd3   : > { %p10723_p4 = pnand %p10722_p2, %p10716_p12 }
  0xd5   : > { %10726 = shalt.err (!%p10723_p4)
}
  0xd6   : > { %10329 = dma.hbm_to_vmem [thread:$0]  (!%p11371_p5), %s12697_s2, 128, %s11469_s27, [#allocation8]  }
  0xd7   : > { %s11179_s28 = smov [#allocation12]   ;;  %s11180_s15 = smov [#allocation15]  }
  0xd8   : > { %s500_s18 = sshll.u32 %s11179_s28, 4  ;;  %s526_s20 = sshll.u32 %s11180_s15, 4  ;;  %s501_s18 = int_to_ptr.vmem [resolvable:$true] %s500_s18  ;;  %s11515_s20 = int_to_ptr.vmem [resolvable:$true] %s526_s20 }
  0xd9   : > { %s12698_s4 = sld [smem:[#allocation57_spill]] }
  0xdf   : > { %s10727_s3 = scalar_lea.hbm %s12698_s4, 1024 }
  0xe0   : > { %p10728_p6 = scmp.ne.s32.totalorder %s12698_s4, %s10727_s3  ;;  %p10734_p1 = scmp.lt.u32.totalorder %s10727_s3, %s12698_s4 }
  0xe2   : > { %p10730_p8 = pnand %p10728_p6, %p11387_p7 }
  0xe4   : > { %p10731_p9 = pneg %p10730_p8 }
  0xe6   : > { %p10736_p3 = pnand %p10734_p1, %p10731_p9 }
  0xe8   : > { %10739 = shalt.err (!%p10736_p3)
}
  0xe9   : > { %s10740_s14 = scalar_lea.vmem %s501_s18, 1024  ;;  %p10748_p13 = scmp.lt.s32.totalorder %s501_s18, %s501_s18 }
  0xea   : > { %p10741_p10 = scmp.ne.s32.totalorder %s501_s18, %s10740_s14  ;;  %p10749_p0 = scmp.lt.s32.totalorder %s10740_s14, %s10740_s14 }
  0xec   : > { %p10743_p11 = pnand %p10741_p10, %p11387_p7  ;;  %p10750_p2 = por %p10749_p0, %p10748_p13 }
  0xee   : > { %p10744_p12 = pneg %p10743_p11 }
  0xf0   : > { %p10751_p4 = pnand %p10750_p2, %p10744_p12 }
  0xf2   : > { %10754 = shalt.err (!%p10751_p4)
}
  0xf3   : > { %10335 = dma.hbm_to_vmem [thread:$0]  (!%p11371_p5), %s12698_s4, 1024, %s501_s18, [#allocation11], %s12696_s17, %s12696_s17, %s12695_s23  }
  0xf4   : > { %s12699_s6 = sld [smem:[#allocation59_spill]] }
  0xfa   : > { %s10755_s3 = scalar_lea.hbm %s12699_s6, 1024 }
  0xfb   : > { %p10756_p6 = scmp.ne.s32.totalorder %s12699_s6, %s10755_s3  ;;  %p10762_p1 = scmp.lt.u32.totalorder %s10755_s3, %s12699_s6 }
  0xfd   : > { %p10758_p8 = pnand %p10756_p6, %p11387_p7 }
  0xff   : > { %p10759_p9 = pneg %p10758_p8 }
 0x101   : > { %p10764_p3 = pnand %p10762_p1, %p10759_p9 }
 0x103   : > { %10767 = shalt.err (!%p10764_p3)
}
 0x104   : > { %s10768_s18 = scalar_lea.vmem %s11515_s20, 1024  ;;  %p10776_p13 = scmp.lt.s32.totalorder %s11515_s20, %s11515_s20 }
 0x105   : > { %p10769_p10 = scmp.ne.s32.totalorder %s11515_s20, %s10768_s18  ;;  %p10777_p0 = scmp.lt.s32.totalorder %s10768_s18, %s10768_s18 }
 0x107   : > { %p10771_p11 = pnand %p10769_p10, %p11387_p7  ;;  %p10778_p2 = por %p10777_p0, %p10776_p13 }
 0x109   : > { %p10772_p12 = pneg %p10771_p11 }
 0x10b   : > { %p10779_p4 = pnand %p10778_p2, %p10772_p12 }
 0x10d   : > { %10782 = shalt.err (!%p10779_p4)
}
 0x10e   : > { %10341 = dma.hbm_to_vmem [thread:$0]  (!%p11371_p5), %s12699_s6, 1024, %s11515_s20, [#allocation14], %s12696_s17, %s12696_s17, %s12695_s23  }
 0x10f   : > { %s11181_s15 = smov [#allocation18]   ;;  %s11182_s13 = smov [#allocation21]  }
 0x110   : > { %s552_s21 = sshll.u32 %s11181_s15, 4  ;;  %s579_s3 = sshll.u32 %s11182_s13, 4  ;;  %s553_s21 = int_to_ptr.vmem [resolvable:$true] %s552_s21  ;;  %s11564_s3 = int_to_ptr.vmem [resolvable:$true] %s579_s3 }
 0x111   : > { %s12700_s8 = sld [smem:[#allocation61_spill]] }
 0x117   : > { %s10783_s1 = scalar_lea.hbm %s12700_s8, 2048 }
 0x118   : > { %p10784_p6 = scmp.ne.s32.totalorder %s12700_s8, %s10783_s1  ;;  %p10790_p1 = scmp.lt.u32.totalorder %s10783_s1, %s12700_s8 }
 0x11a   : > { %p10786_p8 = pnand %p10784_p6, %p11387_p7 }
 0x11c   : > { %p10787_p9 = pneg %p10786_p8 }
 0x11e   : > { %p10792_p3 = pnand %p10790_p1, %p10787_p9 }
 0x120   : > { %10795 = shalt.err (!%p10792_p3)
}
 0x121   : > { %s10796_s28 = scalar_lea.vmem %s553_s21, 2048  ;;  %p10804_p13 = scmp.lt.s32.totalorder %s553_s21, %s553_s21 }
 0x122   : > { %p10797_p10 = scmp.ne.s32.totalorder %s553_s21, %s10796_s28  ;;  %p10805_p0 = scmp.lt.s32.totalorder %s10796_s28, %s10796_s28 }
 0x124   : > { %p10799_p11 = pnand %p10797_p10, %p11387_p7  ;;  %p10806_p2 = por %p10805_p0, %p10804_p13 }
 0x126   : > { %p10800_p12 = pneg %p10799_p11 }
 0x128   : > { %p10807_p4 = pnand %p10806_p2, %p10800_p12 }
 0x12a   : > { %10810 = shalt.err (!%p10807_p4)
}
 0x12b   : > { %10347 = dma.hbm_to_vmem [thread:$0]  (!%p11371_p5), %s12700_s8, 2048, %s553_s21, [#allocation17], %s12696_s17, %s12696_s17, %s12695_s23  }
 0x12c   : > { %s12701_s10 = sld [smem:[#allocation63_spill]] }
 0x132   : > { %s10811_s1 = scalar_lea.hbm %s12701_s10, 16 }
 0x133   : > { %p10812_p6 = scmp.ne.s32.totalorder %s12701_s10, %s10811_s1  ;;  %p10818_p1 = scmp.lt.u32.totalorder %s10811_s1, %s12701_s10 }
 0x135   : > { %p10814_p8 = pnand %p10812_p6, %p11387_p7 }
 0x137   : > { %p10815_p9 = pneg %p10814_p8 }
 0x139   : > { %p10820_p3 = pnand %p10818_p1, %p10815_p9 }
 0x13b   : > { %10823 = shalt.err (!%p10820_p3)
}
 0x13c   : > { %s10824_s23 = scalar_lea.vmem %s11564_s3, 16  ;;  %s10831_s17 = scalar_lea.vmem %s11564_s3, 32 }
 0x13d   : > { %p10825_p10 = scmp.ne.s32.totalorder %s11564_s3, %s10824_s23  ;;  %p10832_p13 = scmp.lt.s32.totalorder %s11564_s3, %s11564_s3 }
 0x13e   : > { %p10833_p0 = scmp.lt.s32.totalorder %s10831_s17, %s10824_s23 }
 0x13f   : > { %p10827_p11 = pnand %p10825_p10, %p11387_p7 }
 0x140   : > { %p10834_p2 = por %p10833_p0, %p10832_p13 }
 0x141   : > { %p10828_p12 = pneg %p10827_p11 }
 0x143   : > { %p10835_p4 = pnand %p10834_p2, %p10828_p12 }
 0x145   : > { %10838 = shalt.err (!%p10835_p4)
}
 0x146   : > { %10353 = dma.hbm_to_vmem [thread:$0]  (!%p11371_p5), %s12701_s10, 16, %s11564_s3, [#allocation20]  }
 0x147   : > { %s11183_s15 = smov [#allocation22]   ;;  %s12702_s11 = sld [smem:[#allocation64_spill]] }
 0x148   : > { %s590_s13 = sshll.u32 %s11183_s15, 4  ;;  %s591_s13 = int_to_ptr.vmem [resolvable:$true] %s590_s13 }
 0x14d   : > { %s10839_s1 = scalar_lea.hbm %s12702_s11, 32 }
 0x14e   : > { %p10840_p6 = scmp.ne.s32.totalorder %s12702_s11, %s10839_s1  ;;  %p10846_p1 = scmp.lt.u32.totalorder %s10839_s1, %s12702_s11 }
 0x150   : > { %p10842_p8 = pnand %p10840_p6, %p11387_p7 }
 0x152   : > { %p10843_p9 = pneg %p10842_p8 }
 0x154   : > { %p10848_p3 = pnand %p10846_p1, %p10843_p9 }
 0x156   : > { %10851 = shalt.err (!%p10848_p3)
}
 0x157   : > { %s10852_s3 = scalar_lea.vmem %s591_s13, 32  ;;  %p10860_p13 = scmp.lt.s32.totalorder %s591_s13, %s591_s13 }
 0x158   : > { %p10853_p10 = scmp.ne.s32.totalorder %s591_s13, %s10852_s3  ;;  %p10861_p0 = scmp.lt.s32.totalorder %s10852_s3, %s10852_s3 }
 0x15a   : > { %p10855_p11 = pnand %p10853_p10, %p11387_p7  ;;  %p10862_p2 = por %p10861_p0, %p10860_p13 }
 0x15c   : > { %p10856_p12 = pneg %p10855_p11 }
 0x15e   : > { %p10863_p4 = pnand %p10862_p2, %p10856_p12 }
 0x160   : > { %10866 = shalt.err (!%p10863_p4)
}
 0x161   : > { %s12703_s16 = sld [smem:[#allocation49_spill]]  ;;  %s12647_s21 = sadd.s32 4294967294, %s11167_s0  }
 0x162   : > { %10356 = dma.hbm_to_vmem [thread:$0]  (!%p11371_p5), %s12702_s11, 32, %s591_s13, [#allocation23]  }
 0x163   : > { %s54_s12 = sadd.s32 1, %s11159_s29  ;;  %s57_s28 = sadd.s32 1, %s11163_s30 }
 0x164   : > { %p55_p7 = scmp.ge.s32.totalorder %s54_s12, 2  ;;  %s64_s15 = sadd.s32 1, %s11147_s26 }
 0x165   : > { %p71_p6 = scmp.ne.s32.totalorder %s11147_s26, %s11143_s25  ;;  %p72_p8 = scmp.eq.s32.totalorder %s11167_s0, 0 }
 0x166   : > { %s12777_s12 = smov (%p55_p7, %s54_s12), 0  ;;  %s12705_s22 = sld [smem:[#allocation44_spill]] }
 0x167   : > { %12704 = sst [smem:[#allocation51_spill]] %s12777_s12  ;;  %s12779_s28 = smov (!%p55_p7, %s57_s28), %s11163_s30 }
 0x168   : > { %p11639_p9 = por %p72_p8, %p71_p6  ;;  %p77_p5 = scmp.ne.s32.totalorder %s11143_s25, %s11139_s24 }
 0x169   : > { %s12707_s13 = sld [smem:[#allocation43_spill]]  ;;  %p59_p1 = scmp.ge.s32.totalorder %s12779_s28, 2 }
 0x16a   : > { %p332_p3 = scmp.eq.s32.totalorder %s12703_s16, 3  ;;  %p12708_p10 = scmp.eq.s32.totalorder %s12703_s16, 0 }
 0x16b   : > { %s12709_s1 = sld [smem:[#allocation42_spill]]  ;;  %p11654_p12 = scmp.eq.s32.totalorder %s12647_s21, 3 }
 0x16c   : > { %p11648_p11 = por %p12708_p10, %p77_p5  ;;  %s12781_s28 = smov (%p59_p1, %s12779_s28), 0 }
 0x16d   : > { %12712 = sst [smem:[#allocation52_spill]] %s12781_s28  ;;  %p11662_p13 = por %p332_p3, %p71_p6 }
 0x16e   : > { %p11668_p0 = por %p11654_p12, %p77_p5  ;;  %s61_s3 = ssub.s32 %s11163_s30, %s12781_s28 }
 0x16f   : > { %s12713_s14 = scalar_select %p11662_p13, 1, 0 }
 0x170   : > { %s12714_s20 = scalar_select %p11668_p0, 1, 0 }
 0x171   : > { %s8845_s23 = sshll.u32 %s11163_s30, 1  ;;  %p62_p2 = scmp.eq.s32.totalorder %s61_s3, 0 }
 0x172   : > { %s423_s17 = sadd.s32 %s11159_s29, %s8845_s23  ;;  %s8846_s21 = sshll.u32 %s12781_s28, 1 }
 0x173   : > { %s429_s2 = sadd.s32 1, %s12705_s22  ;;  %s425_s5 = sadd.s32 %s8846_s21, %s12777_s12 }
 0x174   : > { %s11679_s4 = scalar_select %p62_p2, %s11147_s26, %s64_s15  }
 0x175   : > { %p439_p4 = scmp.ne.s32.totalorder %s12705_s22, %s12707_s13  ;;  %s426_s6 = ssub.s32 %s423_s17, %s425_s5 }
 0x176   : > { %p445_p7 = scmp.ne.s32.totalorder %s12707_s13, %s12709_s1  ;;  %p427_p6 = scmp.eq.s32.totalorder %s426_s6, 0 }
 0x177   : > { %p11688_p8 = por %p439_p4, %p332_p3  ;;  %p10388_p1 = scmp.lt.s32.totalorder %s11167_s0, 4 }
 0x178   : > { %p11694_p5 = por %p445_p7, %p11654_p12  ;;  %s12783_s22 = smov (!%p427_p6, %s12705_s22), %s429_s2 }
 0x179   : > { %s12715_s7 = scalar_select %p11688_p8, 1, 0 }
 0x17a   : > { %s12716_s8 = scalar_select %p11694_p5, 1, 0 }
 0x17b   : > { %s601_s15 = sand.u32 1, %s11147_s26   ;;  %s8861_s3 = sshll.u32 %s11163_s30, 7 }
 0x17c   : > { %s8860_s21 = sshll.u32 %s601_s15, 3  ;;  %s12717_s13 = sld [smem:[#allocation53_spill]] }
 0x17d   : > { %s605_s16 = scalar_lea.vmem [#allocation4], %s8860_s21  ;;  %p11711_p3 = pnand %p10388_p1, %p11639_p9 }
 0x17e   : > { %s612_s1 = sshll.u32 %s605_s16, 4  ;;  %s602_s2 = scalar_lea.sflag [#allocation5], %s601_s15  ;;  %s11715_s1 = int_to_ptr.vmem [resolvable:$true] %s612_s1 }
 0x17f   : > { %p10869_p12 = pneg %p11711_p3 }
 0x182   : > { %s11707_s6 = scalar_lea.hbm %s12717_s13, %s8861_s3  ;;  %s10872_s19 = scalar_lea.hbm %s12717_s13, 256 }
 0x183   : > { %s10867_s17 = scalar_lea.hbm %s11707_s6, 128  ;;  %p10873_p9 = scmp.lt.u32.totalorder %s11707_s6, %s12717_s13 }
 0x184   : > { %p10868_p10 = scmp.ne.s32.totalorder %s11707_s6, %s10867_s17  ;;  %p10874_p7 = scmp.lt.u32.totalorder %s10872_s19, %s10867_s17 }
 0x185   : > { %p10876_p1 = scmp.lt.u32.totalorder %s10867_s17, %s11707_s6 }
 0x186   : > { %p10870_p2 = pnand %p10869_p12, %p10868_p10  ;;  %p10875_p6 = por %p10874_p7, %p10873_p9 }
 0x188   : > { %p10871_p4 = pneg %p10870_p2  ;;  %p10877_p5 = por %p10876_p1, %p10875_p6 }
 0x18a   : > { %p10878_p0 = pnand %p10877_p5, %p10871_p4 }
 0x18c   : > { %10881 = shalt.err (!%p10878_p0)
}
 0x18d   : > { %s10882_s15 = scalar_lea.vmem %s11715_s1, 128  ;;  %s11184_s16 = smov [#allocation4]  }
 0x18e   : > { %p10883_p10 = scmp.ne.s32.totalorder %s11715_s1, %s10882_s15  ;;  %s10887_s3 = sshll.u32 %s11184_s16, 4  ;;  %s10888_s3 = int_to_ptr.vmem [resolvable:$false] %s10887_s3 }
 0x18f   : > { %s10889_s21 = scalar_lea.vmem %s10888_s3, 256  ;;  %p10890_p13 = scmp.lt.s32.totalorder %s11715_s1, %s10888_s3 }
 0x190   : > { %p10885_p2 = pnand %p10883_p10, %p10869_p12  ;;  %p10891_p9 = scmp.lt.s32.totalorder %s10889_s21, %s10882_s15 }
 0x192   : > { %p10886_p8 = pneg %p10885_p2  ;;  %p10892_p7 = por %p10891_p9, %p10890_p13 }
 0x194   : > { %p10893_p6 = pnand %p10892_p7, %p10886_p8 }
 0x196   : > { %10896 = shalt.err (!%p10893_p6)
}
 0x197   : > { %10360 = dma.hbm_to_vmem [thread:$0]  (!%p11711_p3), %s11707_s6, 128, %s11715_s1, %s602_s2  }
 0x198   : > { %s12719_s17 = sld [smem:[#allocation50_spill]] }
 0x19e   : > { %p12720_p0 = scmp.ne.s32.totalorder %s12719_s17, 0 }
 0x19f   : > { %s11745_s19 = sand.u32 (!%p12720_p0), 1, %s11143_s25  }
 0x1a0   : > { %621 = sbr.rel (%p12720_p0) target bundleno = 4379 (0x111b), region = 68  ;;  %s11748_s23 = sshll.u32 (!%p12720_p0), %s11745_s19, 3 }
 0x1a1   : > { %s624_s5 = scalar_lea.sflag (!%p12720_p0), [#allocation5], %s11745_s19  ;;  %s627_s15 = scalar_lea.vmem (!%p12720_p0), [#allocation4], %s11748_s23 }
 0x1a7   : > { %11082 = dma.done.wait (%p11648_p11), %s624_s5, 128  }
 0x1a8   : > { %11084 = vsyncadd (%p11648_p11), %s624_s5, 4294967168  ;;  %s12721_s6 = sld [smem:[#allocation49_spill]] }
 0x1ae   : > { %p12722_p13 = scmp.eq.s32.totalorder %s12721_s6, 0 }
 0x1b0   : > { %11086 = dma.done.wait (%p12722_p13), [#allocation8], 256   ;;  %p12723_p8 = pmov %p12722_p13 }
 0x1b2   : > { %11088 = vsyncadd (%p12723_p8), [#allocation8], 4294967040  ;;  %p12724_p5 = pmov %p12723_p8 }
 0x1b4   : > { %11090 = dma.done.wait (%p12724_p5), [#allocation11], 2048   ;;  %p12725_p3 = pmov %p12724_p5 }
 0x1b6   : > { %11092 = vsyncadd (%p12725_p3), [#allocation11], 4294965248  ;;  %p12726_p12 = pmov %p12725_p3 }
 0x1b7   : > { %p12727_p4 = pmov %p12725_p3 }
 0x1b8   : > { %11094 = dma.done.wait (%p12726_p12), [#allocation14], 1280  }
 0x1b9   : > { %11096 = vsyncadd (%p12727_p4), [#allocation14], 4294966016  ;;  %p12728_p11 = pmov %p12725_p3 }
 0x1ba   : > { %p12729_p1 = pmov %p12725_p3 }
 0x1bb   : > { %11098 = dma.done.wait (%p12728_p11), [#allocation17], 2080  }
 0x1bc   : > { %11100 = vsyncadd (%p12729_p1), [#allocation17], 4294965216  ;;  %p12730_p10 = pmov %p12729_p1 }
 0x1bd   : > { %p12731_p2 = pmov %p12729_p1 }
 0x1be   : > { %11102 = dma.done.wait (%p12730_p10), [#allocation20], 528  }
 0x1bf   : > { %11104 = vsyncadd (%p12731_p2), [#allocation20], 4294966768  ;;  %p12732_p9 = pmov %p12729_p1 }
 0x1c0   : > { %p12733_p7 = pmov %p12729_p1 }
 0x1c1   : > { %11106 = dma.done.wait (%p12732_p9), [#allocation23], 32  }
 0x1c2   : > { %11108 = vsyncadd (%p12733_p7), [#allocation23], 4294967264  ;;  %s12734_s27 = sld [smem:[#allocation43_spill]]  ;;  %s12651_s21 = scalar_lea.vmem [#allocation28], %s11748_s23 }
 0x1c3   : > { %s12735_s5 = sld [smem:[#allocation45_spill]] }
 0x1c8   : > { %s735_s1 = sand.u32 1, %s12734_s27  }
 0x1c9   : > { %s8877_s18 = sshll.u32 %s735_s1, 5  ;;  %p8878_p6 = scmp.ne.s32.totalorder %s12735_s5, 0 }
 0x1ca   : > { %s11785_s17 = scalar_lea.vmem [#allocation30], %s8877_s18  ;;  %vm1199_vm0 = vcmask (!%p8878_p6), 57344   ;;  %v745_v0 = vld [vmem:[#allocation7] sm:$0xff] (!%p8878_p6)  ;;  %v744_v1 = vld [vmem:[%s627_s15] sm:$0xff] (!%p8878_p6)  ;;  %vm747_vm1 = vcmask (!%p8878_p6), 64512   ;;  %v11185_v2 = vmov (!%p8878_p6), 0.0  }
 0x1cb   : > { %743 = sbr.rel (%p8878_p6) target bundleno = 703 (0x2bf), region = 120  ;;  %9227 = vmatprep.subr.mxu0 (!%p8878_p6), %v11185_v2  ;;  %1200 = vst.msk [vmem:[#allocation3] sm:$0x1] (!%p8878_p6), %vm1199_vm0, %v11185_v2  ;;  %v752_v3 = vand.u32 (!%p8878_p6), 4294901760, %v745_v0  ;;  %vm11186_vm2 = vmmov (!%p8878_p6), 0   ;;  %v749_v4 = vsel (!%p8878_p6), %vm747_vm1, %v744_v1, 0  ;;  %9212 = vmatprep.subr.mxu1 (!%p8878_p6), %v11185_v2 }
 0x1cc   : > { %9229 = vmatprep.mubr.msk.f32.mxu0 (!%p8878_p6), %vm11186_vm2, %v11185_v2  ;;  %v817_v5 = vand.u32 (!%p8878_p6), 4294901760, %v749_v4  ;;  %9214 = vmatprep.mubr.msk.f32.mxu1 (!%p8878_p6), %vm11186_vm2, %v11185_v2  ;;  %v746_v16 = vld [vmem:[#allocation9] sm:$0xff] (!%p8878_p6)  ;;  %vm1197_vm3 = vcmask (!%p8878_p6), 261120  }
 0x1cd   : > { %v829_v6 = vsub.f32 (!%p8878_p6), %v745_v0, %v752_v3  ;;  %9228 = vmatpush3.msra.mxu0 (!%p8878_p6), %v752_v3  ;;  %9213 = vmatpush3.msra.mxu1 (!%p8878_p6), %v752_v3 }
 0x1ce   : > { %v818_v7 = vsub.f32 (!%p8878_p6), %v749_v4, %v817_v5  ;;  %9217 = vmatprep.subr.mxu1 (!%p8878_p6), %v11185_v2  ;;  %9232 = vmatprep.subr.mxu0 (!%p8878_p6), %v11185_v2 }
 0x1cf   : > { %v830_v8 = vand.u32 (!%p8878_p6), 4294901760, %v829_v6 }
 0x1d0   : > { %v819_v9 = vand.u32 (!%p8878_p6), 4294901760, %v818_v7 }
 0x1d1   : > { %v831_v10 = vsub.f32 (!%p8878_p6), %v829_v6, %v830_v8 }
 0x1d2   : > { %9230 = vmatmul.mubr.f32.vlgmr.msra.gmra.mrb[0].mxu0 %v819_v9  ;;  %v820_v11 = vsub.f32 %v818_v7, %v819_v9 }
 0x1d3   : > { %v832_v12 = vand.u32 4294901760, %v831_v10  ;;  %9233 = vmatpush3.msra.mxu0 %v830_v8  ;;  %9234 = vmatprep.mubr.msk.f32.mxu0 %vm11186_vm2, %v11185_v2 }
 0x1d4   : > { %v821_v13 = vand.u32 4294901760, %v820_v11  ;;  %9237 = vmatprep.subr.mxu0 %v11185_v2 }
 0x1d6   : > { %9215 = vmatmul.mubr.f32.vlgmr.msra.gmra.mrb[0].mxu1 %v821_v13 }
 0x1d7   : > { %9218 = vmatpush3.msra.mxu1 %v832_v12  ;;  %9219 = vmatprep.mubr.msk.f32.mxu1 %vm11186_vm2, %v11185_v2 }
 0x1d8   : > { %9222 = vmatprep.subr.mxu1 %v11185_v2 }
 0x1da   : > { %9235 = vmatmul.mubr.f32.vlgmr.msra.gmra.mrb[0].mxu0 %v817_v5 }
 0x1db   : > { %9238 = vmatpush3.msra.mxu0 %v752_v3  ;;  %9239 = vmatprep.mubr.msk.f32.mxu0 %vm11186_vm2, %v11185_v2 }
 0x1de   : > { %9220 = vmatmul.mubr.f32.vlgmr.msra.gmra.mrb[0].mxu1 %v817_v5 }
 0x1df   : > { %9223 = vmatpush3.msra.mxu1 %v829_v6  ;;  %9224 = vmatprep.mubr.msk.f32.mxu1 %vm11186_vm2, %v11185_v2 }
 0x1e2   : > { %9240 = vmatmul.mubr.f32.vlgmr.msra.gmra.mrb[0].mxu0 %v817_v5 }
 0x1e6   : > { %9225 = vmatmul.mubr.f32.vlgmr.msra.gmra.mrb[0].mxu1 %v818_v7 }
 0x2b5   : > { %v1193_v14 = vpop.f32.mrb[0].mxu0 }
 0x2b6   : > { %v9241_v15 = vpop.f32.mrb[1].mxu0 }
 0x2b9   : > { %v973_v17 = vpop.f32.mrb[0].mxu1 }
 0x2ba   : > { %v10136_v18 = vadd.f32 %v973_v17, %v746_v16  ;;  %v9226_v19 = vpop.f32.mrb[1].mxu1 }
 0x2bc   : > { %v10137_v20 = vadd.f32 %v10136_v18, %v1193_v14 }
 0x2be   : > { %1198 = vst.msk [vmem:[#allocation2] sm:$0xff] %vm1197_vm3, %v10137_v20 }
 0x2bf PF: > { %s12736_s15 = sld [smem:[#allocation45_spill]]  ;;  %vm1233_vm4 = vcmask 261120   ;;  %v11187_v22 = vmov 0.0|0.0   ;;  %vm11188_vm5 = vmmov 0   ;;  %v11189_v23 = vmov 0.0   ;;  %s11190_s1 = smov 88  }
 0x2c0   : > { %9926 = vmatprep.subr.bf16.mxu0 %v11187_v22  ;;  %9261 = vmatprep.mubr.msk.f32.mxu0 %vm11188_vm5, %v11189_v23  ;;  %s11191_s18 = smov 96   ;;  %s11192_s5 = smov 112   ;;  %vm1725_vm6 = vcmask 64512   ;;  %vm5880_vm7 = vcmask 130048   ;;  %vm5882_vm8 = vcmask 195584   ;;  %vm5865_vm9 = vcmask 57344  }
 0x2c1   : > { %9920 = vmatprep.subr.bf16.mxu1 %v11187_v22  ;;  %9250 = vmatprep.mubr.msk.f32.mxu1 %vm11188_vm5, %v11189_v23  ;;  %s11194_s16 = smov 104   ;;  %s11195_s2 = smov 80   ;;  %vm6900_vm10 = vcmask 523264  }
 0x2c2   : > { %s11196_s3 = smov 72  }
 0x2c5   : > { %s11795_s6 = sshll.u32 %s12736_s15, 5  ;;  %v1201_v21 = vld [vmem:[#allocation2] sm:$0xff]  ;;  %p8890_p0 = scmp.ne.s32.totalorder %s12736_s15, 1 }
 0x2c6   : > { %v1235_v24 = vsel %vm1233_vm4, %v1201_v21, 0  ;;  %s1203_s27 = scalar_lea.vmem [#allocation10], %s11795_s6  ;;  %vm11207_vm11 = vmmov (!%p8890_p0), 0  }
 0x2c7   : > { %v1204_v25 = vld [vmem:[%s1203_s27] sm:$0xff]  ;;  %v1205_v26 = vld [vmem:[%s1203_s27 + $0x8] sm:$0xff]  ;;  %v1206_v27 = vld [vmem:[%s1203_s27 + $0x10] sm:$0xff]  ;;  %v11802_v28 = vand.u32 4294901760, %v1235_v24 }
 0x2c8   : > { %v1238_v29 = vand.u32 4294901760, %v1204_v25  ;;  %v1241_v30 = vand.u32 4294901760, %v1205_v26  ;;  %v1207_v31 = vld [vmem:[%s1203_s27 + $0x18] sm:$0xff]  ;;  %v1244_v32 = vand.u32 4294901760, %v1206_v27  ;;  %s11193_s27 = smov 120  }
 0x2c9   : > { %v1247_v33 = vand.u32 4294901760, %v1207_v31  ;;  %v1307_v34 = vsub.f32 %v1235_v24, %v11802_v28 }
 0x2ca   : > { %v1318_v35 = vsub.f32 %v1204_v25, %v1238_v29  ;;  %v1325_v36 = vsub.f32 %v1205_v26, %v1241_v30  ;;  %v1332_v37 = vsub.f32 %v1206_v27, %v1244_v32  ;;  %v9921_v38 = vpack.c.bf16 %v1241_v30, %v1238_v29 }
 0x2cb   : > { %v1339_v39 = vsub.f32 %v1207_v31, %v1247_v33  ;;  %v1308_v40 = vand.u32 4294901760, %v1307_v34  ;;  %v9924_v49 = vpack.c.bf16 %v1247_v33, %v1244_v32 }
 0x2cc   : > { %v1319_v41 = vand.u32 4294901760, %v1318_v35  ;;  %v1326_v42 = vand.u32 4294901760, %v1325_v36  ;;  %v1333_v43 = vand.u32 4294901760, %v1332_v37  ;;  %9922 = vmatpush3.bf16.msra.mxu1 %v9921_v38  ;;  %v9933_v58 = vpack.c.bf16 %v1325_v36, %v1318_v35 }
 0x2cd   : > { %v1340_v44 = vand.u32 4294901760, %v1339_v39  ;;  %9923 = vmatprep.subr.bf16.mxu1 %v11187_v22  ;;  %v1309_v45 = vsub.f32 %v1307_v34, %v1308_v40  ;;  %v9936_v59 = vpack.c.bf16 %v1339_v39, %v1332_v37 }
 0x2ce   : > { %v1320_v46 = vsub.f32 %v1318_v35, %v1319_v41  ;;  %v1327_v47 = vsub.f32 %v1325_v36, %v1326_v42  ;;  %v1334_v48 = vsub.f32 %v1332_v37, %v1333_v43  ;;  %v9945_v60 = vpack.c.bf16 %v1326_v42, %v1319_v41 }
 0x2cf   : > { %v1341_v50 = vsub.f32 %v1339_v39, %v1340_v44  ;;  %v1310_v51 = vand.u32 4294901760, %v1309_v45  ;;  %v9948_v61 = vpack.c.bf16 %v1340_v44, %v1333_v43 }
 0x2d0   : > { %v1321_v52 = vand.u32 4294901760, %v1320_v46  ;;  %v1328_v53 = vand.u32 4294901760, %v1327_v47  ;;  %v1335_v54 = vand.u32 4294901760, %v1334_v48  ;;  %9925 = vmatpush3.bf16.msra.mxu1 %v9924_v49 }
 0x2d1   : > { %v1342_v55 = vand.u32 4294901760, %v1341_v50  ;;  %9308 = vmatprep.subr.mxu1 %v11189_v23 }
 0x2d2   : > { %v9927_v56 = vpack.c.bf16 %v1328_v53, %v1321_v52 }
 0x2d3   : > { %9251 = vmatmul.mubr.f32.vlgmr.msra.gmra.mrb[0].mxu1 %v1310_v51  ;;  %v9930_v57 = vpack.c.bf16 %v1342_v55, %v1335_v54 }
 0x2d4   : > { %9928 = vmatpush3.bf16.msra.mxu0 %v9927_v56  ;;  %9310 = vmatprep.mubr.msk.f32.mxu1 %vm11188_vm5, %v11189_v23 }
 0x2d5   : > { %9929 = vmatprep.subr.bf16.mxu0 %v11187_v22 }
 0x2d8   : > { %9931 = vmatpush3.bf16.msra.mxu0 %v9930_v57 }
 0x2d9   : > { %9932 = vmatprep.subr.bf16.mxu0 %v11187_v22 }
 0x2db   : > { %9262 = vmatmul.mubr.f32.vlgmr.msra.gmra.mrb[0].mxu0 %v11802_v28 }
 0x2dc   : > { %9934 = vmatpush3.bf16.msra.mxu0 %v9933_v58  ;;  %9272 = vmatprep.mubr.msk.f32.mxu0 %vm11188_vm5, %v11189_v23 }
 0x2dd   : > { %9935 = vmatprep.subr.bf16.mxu0 %v11187_v22 }
 0x2e0   : > { %9937 = vmatpush3.bf16.msra.mxu0 %v9936_v59 }
 0x2e1   : > { %9938 = vmatprep.subr.bf16.mxu0 %v11187_v22 }
 0x2e3   : > { %9273 = vmatmul.mubr.f32.vlgmr.msra.gmra.mrb[0].mxu0 %v1307_v34 }
 0x2e4   : > { %9940 = vmatpush3.bf16.msra.mxu0 %v9921_v38  ;;  %9283 = vmatprep.mubr.msk.f32.mxu0 %vm11188_vm5, %v11189_v23 }
 0x2e5   : > { %9941 = vmatprep.subr.bf16.mxu0 %v11187_v22 }
 0x2e8   : > { %9943 = vmatpush3.bf16.msra.mxu0 %v9924_v49 }
 0x2e9   : > { %9944 = vmatprep.subr.bf16.mxu0 %v11187_v22 }
 0x2eb   : > { %9284 = vmatmul.mubr.f32.vlgmr.msra.gmra.mrb[0].mxu0 %v1308_v40 }
 0x2ec   : > { %9946 = vmatpush3.bf16.msra.mxu0 %v9945_v60  ;;  %9294 = vmatprep.mubr.msk.f32.mxu0 %vm11188_vm5, %v11189_v23 }
 0x2ed   : > { %9947 = vmatprep.subr.bf16.mxu0 %v11187_v22 }
 0x2f0   : > { %9949 = vmatpush3.bf16.msra.mxu0 %v9948_v61 }
 0x2f1   : > { %9950 = vmatprep.subr.bf16.mxu0 %v11187_v22 }
 0x2f3   : > { %9295 = vmatmul.mubr.f32.vlgmr.msra.gmra.mrb[0].mxu0 %v11802_v28 }
 0x2f4   : > { %9952 = vmatpush3.bf16.msra.mxu0 %v9921_v38  ;;  %9305 = vmatprep.mubr.msk.f32.mxu0 %vm11188_vm5, %v11189_v23 }
 0x2f5   : > { %9953 = vmatprep.subr.bf16.mxu0 %v11187_v22 }
 0x2f8   : > { %9955 = vmatpush3.bf16.msra.mxu0 %v9924_v49 }
 0x2f9   : > { %9368 = vmatprep.subr.mxu0 %v11189_v23 }
 0x2fb   : > { %9306 = vmatmul.mubr.f32.vlgmr.msra.gmra.mrb[0].mxu0 %v11802_v28 }
 0x2fc   : > { %9370 = vmatprep.mubr.msk.f32.mxu0 %vm11188_vm5, %v11189_v23 }
 0x3a6   : > { %v1312_v62 = vpop.f32.mrb[0].mxu1 }
 0x3a7   : > { %v9252_v63 = vpop.f32.mrb[1].mxu1 }
 0x3ce   : > { %v1718_v0 = vpop.f32.mrb[0].mxu0 }
 0x3cf   : > { %v11835_v1 = vadd.f32 %v1718_v0, %v1312_v62  ;;  %v9307_v2 = vpop.f32.mrb[1].mxu0 }
 0x3d1   : > { %2644 = vrot.lane.b32.xlu1 %v11835_v1, %s11190_s1  ;;  %1723 = vrot.lane.b32.xlu0 %v11835_v1, %s11191_s18  ;;  %v1726_v3 = vsel %vm1725_vm6, %v11835_v1, 0  ;;  %s11200_s1 = smov 40   ;;  %s12650_s18 = smov 8  }
 0x3d2   : > { %v11846_v4 = vand.u32 4294901760, %v1726_v3 }
 0x3d4   : > { %v1797_v5 = vsub.f32 %v1726_v3, %v11846_v4 }
 0x3d5   : > { %3563 = vrot.lane.b32.xlu1 %v11835_v1, %s11192_s5  ;;  %2642 = vrot.lane.b32.xlu0 %v11835_v1, %s11193_s27  ;;  %s1208_s5 = scalar_lea.vmem [#allocation12], %s11795_s6  ;;  %s11204_s27 = smov 16  }
 0x3d6   : > { %v1798_v6 = vand.u32 4294901760, %v1797_v5 }
 0x3d8   : > { %v1799_v11 = vsub.f32 %v1797_v5, %v1798_v6 }
 0x3d9   : > { %4484 = vrot.lane.b32.xlu1 %v11835_v1, %s11194_s16  ;;  %3565 = vrot.lane.b32.xlu0 %v11835_v1, %s11195_s2  ;;  %s11197_s2 = smov 64   ;;  %s11198_s16 = smov 56  }
 0x3da   : > { %v1800_v18 = vand.u32 4294901760, %v1799_v11 }
 0x3dd   : > { %4486 = vrot.lane.b32.xlu0 %v11835_v1, %s11196_s3  ;;  %s11199_s3 = smov 48  }
 0x443   : > { %v2645_v7 = vpop.permute.xlu1 %2644  ;;  %v1724_v8 = vpop.permute.xlu0 %1723 }
 0x444   : > { %v2648_v9 = vsel %vm1725_vm6, %v2645_v7, 0  ;;  %v1728_v10 = vsel %vm1725_vm6, %v1724_v8, 0 }
 0x445   : > { %v11851_v12 = vand.u32 4294901760, %v2648_v9  ;;  %v1731_v13 = vand.u32 4294901760, %v1728_v10 }
 0x447   : > { %v2728_v14 = vsub.f32 %v2648_v9, %v11851_v12  ;;  %v1808_v15 = vsub.f32 %v1728_v10, %v1731_v13  ;;  %9369 = vmatpush3.xpose.msra.mxu0 %v11851_v12  ;;  %9309 = vmatpush3.xpose.msra.mxu1 %v1731_v13  ;;  %v2643_v16 = vpop.permute.xlu0 %2642  ;;  %v3564_v32 = vpop.permute.xlu1 %3563 }
 0x448   : > { %v2646_v17 = vsel %vm1725_vm6, %v2643_v16, 0  ;;  %9313 = vmatprep.subr.mxu1 %v11189_v23  ;;  %9373 = vmatprep.subr.mxu0 %v11189_v23  ;;  %v3567_v34 = vsel %vm1725_vm6, %v3564_v32, 0 }
 0x449   : > { %v1809_v19 = vand.u32 4294901760, %v1808_v15  ;;  %v11858_v20 = vand.u32 4294901760, %v2646_v17  ;;  %v2729_v21 = vand.u32 4294901760, %v2728_v14  ;;  %v3637_v36 = vand.u32 4294901760, %v3567_v34 }
 0x44a   : > { %9311 = vmatmul.mubr.f32.vlgmr.msra.gmra.mrb[2].mxu1 %v1800_v18 }
 0x44b   : > { %v1810_v24 = vsub.f32 %v1808_v15, %v1809_v19  ;;  %v2717_v25 = vsub.f32 %v2646_v17, %v11858_v20  ;;  %9315 = vmatprep.mubr.msk.f32.mxu1 %vm11188_vm5, %v11189_v23  ;;  %v2730_v28 = vsub.f32 %v2728_v14, %v2729_v21  ;;  %v3566_v33 = vpop.permute.xlu0 %3565  ;;  %v3638_v38 = vsub.f32 %v3567_v34, %v3637_v36  ;;  %v4485_v46 = vpop.permute.xlu1 %4484 }
 0x44c   : > { %v3569_v35 = vsel %vm1725_vm6, %v3566_v33, 0  ;;  %v4488_v48 = vsel %vm1725_vm6, %v4485_v46, 0 }
 0x44d   : > { %v1811_v26 = vand.u32 4294901760, %v1810_v24  ;;  %v2718_v27 = vand.u32 4294901760, %v2717_v25  ;;  %v2731_v31 = vand.u32 4294901760, %v2730_v28  ;;  %v3572_v37 = vand.u32 4294901760, %v3569_v35 }
 0x44e   : > { %v3639_v40 = vand.u32 4294901760, %v3638_v38  ;;  %v4558_v50 = vand.u32 4294901760, %v4488_v48 }
 0x44f   : > { %v2719_v29 = vsub.f32 %v2717_v25, %v2718_v27  ;;  %9314 = vmatpush3.xpose.msra.mxu1 %v1811_v26  ;;  %v3649_v39 = vsub.f32 %v3569_v35, %v3572_v37  ;;  %v4487_v47 = vpop.permute.xlu0 %4486 }
 0x450   : > { %9318 = vmatprep.subr.mxu1 %v11189_v23  ;;  %v3640_v42 = vsub.f32 %v3638_v38, %v3639_v40  ;;  %v4490_v49 = vsel %vm1725_vm6, %v4487_v47, 0  ;;  %v4559_v52 = vsub.f32 %v4488_v48, %v4558_v50 }
 0x451   : > { %v2720_v30 = vand.u32 4294901760, %v2719_v29  ;;  %v3650_v41 = vand.u32 4294901760, %v3649_v39  ;;  %v4493_v51 = vand.u32 4294901760, %v4490_v49 }
 0x452   : > { %9316 = vmatmul.mubr.f32.vlgmr.msra.gmra.mrb[2].mxu1 %v11846_v4  ;;  %v3641_v44 = vand.u32 4294901760, %v3640_v42  ;;  %v4560_v54 = vand.u32 4294901760, %v4559_v52 }
 0x453   : > { %9319 = vmatpush3.xpose.msra.mxu1 %v1808_v15  ;;  %9371 = vmatmul.mubr.f32.vlgmr.msra.gmra.mrb[2].mxu0 %v2720_v30  ;;  %v3651_v43 = vsub.f32 %v3649_v39, %v3650_v41  ;;  %v4570_v53 = vsub.f32 %v4490_v49, %v4493_v51 }
 0x454   : > { %9374 = vmatpush3.xpose.msra.mxu0 %v2731_v31  ;;  %9320 = vmatprep.mubr.msk.f32.mxu1 %vm11188_vm5, %v11189_v23  ;;  %v4561_v56 = vsub.f32 %v4559_v52, %v4560_v54 }
 0x455   : > { %9323 = vmatprep.subr.mxu1 %v11189_v23  ;;  %9375 = vmatprep.mubr.msk.f32.mxu0 %vm11188_vm5, %v11189_v23  ;;  %v3652_v45 = vand.u32 4294901760, %v3651_v43  ;;  %v4571_v55 = vand.u32 4294901760, %v4570_v53 }
 0x456   : > { %9378 = vmatprep.subr.mxu0 %v11189_v23  ;;  %v4562_v58 = vand.u32 4294901760, %v4561_v56 }
 0x457   : > { %v4572_v57 = vsub.f32 %v4570_v53, %v4571_v55 }
 0x459   : > { %v4573_v59 = vand.u32 4294901760, %v4572_v57 }
 0x45a   : > { %9321 = vmatmul.mubr.f32.vlgmr.msra.gmra.mrb[2].mxu1 %v1797_v5 }
 0x45b   : > { %9324 = vmatpush3.xpose.msra.mxu1 %v1731_v13  ;;  %9376 = vmatmul.mubr.f32.vlgmr.msra.gmra.mrb[2].mxu0 %v11858_v20 }
 0x45c   : > { %9379 = vmatpush3.xpose.msra.mxu0 %v2728_v14  ;;  %9325 = vmatprep.mubr.msk.f32.mxu1 %vm11188_vm5, %v11189_v23 }
 0x45d   : > { %9328 = vmatprep.subr.mxu1 %v11189_v23  ;;  %9380 = vmatprep.mubr.msk.f32.mxu0 %vm11188_vm5, %v11189_v23 }
 0x45e   : > { %9383 = vmatprep.subr.mxu0 %v11189_v23 }
 0x462   : > { %9326 = vmatmul.mubr.f32.vlgmr.msra.gmra.mrb[2].mxu1 %v1798_v6 }
 0x463   : > { %9329 = vmatpush3.xpose.msra.mxu1 %v1809_v19  ;;  %9381 = vmatmul.mubr.f32.vlgmr.msra.gmra.mrb[2].mxu0 %v2717_v25 }
 0x464   : > { %9384 = vmatpush3.xpose.msra.mxu0 %v11851_v12  ;;  %9330 = vmatprep.mubr.msk.f32.mxu1 %vm11188_vm5, %v11189_v23 }
 0x465   : > { %9333 = vmatprep.subr.mxu1 %v11189_v23  ;;  %9385 = vmatprep.mubr.msk.f32.mxu0 %vm11188_vm5, %v11189_v23 }
 0x466   : > { %9388 = vmatprep.subr.mxu0 %v11189_v23 }
 0x46a   : > { %9331 = vmatmul.mubr.f32.vlgmr.msra.gmra.mrb[2].mxu1 %v11846_v4 }
 0x46b   : > { %9334 = vmatpush3.xpose.msra.mxu1 %v1731_v13  ;;  %9386 = vmatmul.mubr.f32.vlgmr.msra.gmra.mrb[2].mxu0 %v2718_v27 }
 0x46c   : > { %9389 = vmatpush3.xpose.msra.mxu0 %v2729_v21  ;;  %9335 = vmatprep.mubr.msk.f32.mxu1 %vm11188_vm5, %v11189_v23 }
 0x46d   : > { %9390 = vmatprep.mubr.msk.f32.mxu0 %vm11188_vm5, %v11189_v23  ;;  %9393 = vmatprep.subr.mxu0 %v11189_v23 }
 0x46e   : > { %9338 = vmatprep.subr.mxu1 %v11189_v23 }
 0x472   : > { %9336 = vmatmul.mubr.f32.vlgmr.msra.gmra.mrb[2].mxu1 %v11846_v4 }
 0x473   : > { %9391 = vmatmul.mubr.f32.vlgmr.msra.gmra.mrb[2].mxu0 %v11858_v20  ;;  %9340 = vmatprep.mubr.msk.f32.mxu1 %vm11188_vm5, %v11189_v23 }
 0x474   : > { %9394 = vmatpush3.xpose.msra.mxu0 %v11851_v12  ;;  %9395 = vmatprep.mubr.msk.f32.mxu0 %vm11188_vm5, %v11189_v23 }
 0x475   : > { %9428 = vmatprep.subr.mxu0 %v11189_v23 }
 0x47b   : > { %9396 = vmatmul.mubr.f32.vlgmr.msra.gmra.mrb[2].mxu0 %v11858_v20 }
 0x47c   : > { %9429 = vmatpush3.xpose.msra.mxu0 %v3572_v37  ;;  %9430 = vmatprep.mubr.msk.f32.mxu0 %vm11188_vm5, %v11189_v23 }
 0x47d   : > { %9433 = vmatprep.subr.mxu0 %v11189_v23 }
 0x47f   : > { %9431 = vmatmul.mubr.f32.vlgmr.msra.gmra.mrb[4].mxu0 %v3641_v44 }
 0x480   : > { %9434 = vmatpush3.xpose.msra.mxu0 %v3652_v45  ;;  %9435 = vmatprep.mubr.msk.f32.mxu0 %vm11188_vm5, %v11189_v23 }
 0x481   : > { %9438 = vmatprep.subr.mxu0 %v11189_v23 }
 0x487   : > { %9436 = vmatmul.mubr.f32.vlgmr.msra.gmra.mrb[4].mxu0 %v3637_v36 }
 0x488   : > { %9439 = vmatpush3.xpose.msra.mxu0 %v3649_v39  ;;  %9440 = vmatprep.mubr.msk.f32.mxu0 %vm11188_vm5, %v11189_v23 }
 0x489   : > { %9443 = vmatprep.subr.mxu0 %v11189_v23 }
 0x48f   : > { %9441 = vmatmul.mubr.f32.vlgmr.msra.gmra.mrb[4].mxu0 %v3638_v38 }
 0x490   : > { %9444 = vmatpush3.xpose.msra.mxu0 %v3572_v37  ;;  %9445 = vmatprep.mubr.msk.f32.mxu0 %vm11188_vm5, %v11189_v23 }
 0x491   : > { %9448 = vmatprep.subr.mxu0 %v11189_v23 }
 0x497   : > { %9446 = vmatmul.mubr.f32.vlgmr.msra.gmra.mrb[4].mxu0 %v3639_v40 }
 0x498   : > { %9449 = vmatpush3.xpose.msra.mxu0 %v3650_v41  ;;  %9450 = vmatprep.mubr.msk.f32.mxu0 %vm11188_vm5, %v11189_v23 }
 0x499   : > { %9453 = vmatprep.subr.mxu0 %v11189_v23 }
 0x49f   : > { %9451 = vmatmul.mubr.f32.vlgmr.msra.gmra.mrb[4].mxu0 %v3637_v36 }
 0x4a0   : > { %9454 = vmatpush3.xpose.msra.mxu0 %v3572_v37  ;;  %9455 = vmatprep.mubr.msk.f32.mxu0 %vm11188_vm5, %v11189_v23 }
 0x4a1   : > { %9488 = vmatprep.subr.mxu0 %v11189_v23 }
 0x4a7   : > { %9456 = vmatmul.mubr.f32.vlgmr.msra.gmra.mrb[4].mxu0 %v3637_v36 }
 0x4a8   : > { %9489 = vmatpush3.xpose.msra.mxu0 %v4493_v51  ;;  %9490 = vmatprep.mubr.msk.f32.mxu0 %vm11188_vm5, %v11189_v23 }
 0x4a9   : > { %9493 = vmatprep.subr.mxu0 %v11189_v23 }
 0x4ab   : > { %9491 = vmatmul.mubr.f32.vlgmr.msra.gmra.mrb[6].mxu0 %v4562_v58 }
 0x4ac   : > { %9494 = vmatpush3.xpose.msra.mxu0 %v4573_v59  ;;  %9495 = vmatprep.mubr.msk.f32.mxu0 %vm11188_vm5, %v11189_v23 }
 0x4ad   : > { %9498 = vmatprep.subr.mxu0 %v11189_v23 }
 0x4b3   : > { %9496 = vmatmul.mubr.f32.vlgmr.msra.gmra.mrb[6].mxu0 %v4558_v50 }
 0x4b4   : > { %9499 = vmatpush3.xpose.msra.mxu0 %v4570_v53  ;;  %9500 = vmatprep.mubr.msk.f32.mxu0 %vm11188_vm5, %v11189_v23 }
 0x4b5   : > { %9503 = vmatprep.subr.mxu0 %v11189_v23 }
 0x4bb   : > { %9501 = vmatmul.mubr.f32.vlgmr.msra.gmra.mrb[6].mxu0 %v4559_v52 }
 0x4bc   : > { %9504 = vmatpush3.xpose.msra.mxu0 %v4493_v51  ;;  %9505 = vmatprep.mubr.msk.f32.mxu0 %vm11188_vm5, %v11189_v23 }
 0x4bd   : > { %9508 = vmatprep.subr.mxu0 %v11189_v23 }
 0x4c3   : > { %9506 = vmatmul.mubr.f32.vlgmr.msra.gmra.mrb[6].mxu0 %v4560_v54 }
 0x4c4   : > { %9509 = vmatpush3.xpose.msra.mxu0 %v4571_v55  ;;  %9510 = vmatprep.mubr.msk.f32.mxu0 %vm11188_vm5, %v11189_v23 }
 0x4c5   : > { %9513 = vmatprep.subr.mxu0 %v11189_v23 }
 0x4cb   : > { %9511 = vmatmul.mubr.f32.vlgmr.msra.gmra.mrb[6].mxu0 %v4558_v50 }
 0x4cc   : > { %9514 = vmatpush3.xpose.msra.mxu0 %v4493_v51  ;;  %9515 = vmatprep.mubr.msk.f32.mxu0 %vm11188_vm5, %v11189_v23 }
 0x4cd   : > { %9548 = vmatprep.subr.mxu0 %v11189_v23 }
 0x4d3   : > { %9516 = vmatmul.mubr.f32.vlgmr.msra.gmra.mrb[6].mxu0 %v4558_v50 }
 0x4d4   : > { %9550 = vmatprep.mubr.msk.f32.mxu0 %vm11188_vm5, %v11189_v23 }
 0x545   : > { %v2172_v60 = vpop.f32.mrb[2].mxu1 }
 0x546   : > { %v2176_v61 = vmul.f32 0.35355338, %v2172_v60  ;;  %v9337_v62 = vpop.f32.mrb[3].mxu1 }
 0x548   : > { %v2177_v63 = vsel %vm1725_vm6, %v2176_v61, -inf }
 0x549   : > { %2178 = vmax.xlane.f32.xlu1 %v2177_v63 }
 0x54e   : > { %v3092_v0 = vpop.f32.mrb[2].mxu0 }
 0x54f   : > { %v3096_v2 = vmul.f32 0.35355338, %v3092_v0  ;;  %v9397_v3 = vpop.f32.mrb[3].mxu0 }
 0x551   : > { %v3097_v4 = vsel %vm1725_vm6, %v3096_v2, -inf }
 0x552   : > { %3098 = vmax.xlane.f32.xlu0 %v3097_v4 }
 0x57a   : > { %v4013_v5 = vpop.f32.mrb[4].mxu0 }
 0x57b   : > { %v4017_v6 = vmul.f32 0.35355338, %v4013_v5  ;;  %v9457_v7 = vpop.f32.mrb[5].mxu0 }
 0x57d   : > { %v4018_v8 = vsel %vm1725_vm6, %v4017_v6, -inf }
 0x57e   : > { %4019 = vmax.xlane.f32.xlu1 %v4018_v8 }
 0x5a6   : > { %v4934_v9 = vpop.f32.mrb[6].mxu0 }
 0x5a7   : > { %v4938_v10 = vmul.f32 0.35355338, %v4934_v9  ;;  %v9517_v11 = vpop.f32.mrb[7].mxu0 }
 0x5a9   : > { %v4939_v12 = vsel %vm1725_vm6, %v4938_v10, -inf }
 0x5aa   : > { %4940 = vmax.xlane.f32.xlu1 %v4939_v12 }
 0x5d6   : > { %v2179_v13 = vpop.xlane.xlu1 %2178 }
 0x5d7   : > { %v2180_v14 = vsub.f32 %v2176_v61, %v2179_v13 }
 0x5d9   : > { %v2181_v15 = vmul.f32 1.442695, %v2180_v14 }
 0x5db   : > { %10531 = vpow2.f32 %v2181_v15 }
 0x5df   : > { %v3099_v16 = vpop.xlane.xlu0 %3098 }
 0x5e0   : > { %v3100_v17 = vsub.f32 %v3096_v2, %v3099_v16 }
 0x5e2   : > { %v3101_v18 = vmul.f32 1.442695, %v3100_v17 }
 0x5e4   : > { %10533 = vpow2.f32 %v3101_v18 }
 0x5e5   : > { %v10532_v19 = vpop.eup %10531 }
 0x5e6   : > { %v2183_v20 = vsel %vm1725_vm6, %v10532_v19, 0.0 }
 0x5e7   : > { %2184 = vadd.xlane.f32.xlu0 %v2183_v20 }
 0x5ee   : > { %v10534_v21 = vpop.eup %10533 }
 0x5ef   : > { %v3103_v24 = vsel %vm1725_vm6, %v10534_v21, 0.0 }
 0x5f0   : > { %3104 = vadd.xlane.f32.xlu1 %v3103_v24 }
 0x5fd   : > { %2190 = vrot.lane.b32.xlu0 %v11835_v1, %s11197_s2  ;;  %s11205_s2 = smov 24  }
 0x601   : > { %3111 = vrot.lane.b32.xlu1 %v11835_v1, %s11198_s16  ;;  %s8881_s16 = sshll.u32 %s12736_s15, 3 }
 0x605   : > { %4032 = vrot.lane.b32.xlu1 %v11835_v1, %s11199_s3  ;;  %s1231_s3 = scalar_lea.vmem [#allocation13], %s8881_s16  ;;  %s11209_s16 = smov (!%p8890_p0), 120  }
 0x60b   : > { %v4020_v25 = vpop.xlane.xlu1 %4019 }
 0x60c   : > { %v4021_v26 = vsub.f32 %v4017_v6, %v4020_v25 }
 0x60e   : > { %v4022_v27 = vmul.f32 1.442695, %v4021_v26  ;;  %v11201_v26 = vmov 0  }
 0x610   : > { %10535 = vpow2.f32 %v4022_v27  ;;  %v5412_v27 = vsel %vm1725_vm6, 1.0, %v11201_v26 }
 0x61a   : > { %v11952_v28 = vpop.eup %10535 }
 0x61b   : > { %v4024_v29 = vsel %vm1725_vm6, %v11952_v28, 0.0 }
 0x61c   : > { %4025 = vadd.xlane.f32.xlu0 %v4024_v29 }
 0x632   : > { %4953 = vrot.lane.b32.xlu0 %v11835_v1, %s11200_s1  ;;  %s1213_s1 = scalar_lea.vmem [#allocation15], %s11795_s6  ;;  %s8880_s6 = sshll.u32 %s12736_s15, 6 }
 0x637   : > { %v4941_v30 = vpop.xlane.xlu1 %4940 }
 0x638   : > { %v4942_v31 = vsub.f32 %v4938_v10, %v4941_v30 }
 0x63a   : > { %v4943_v32 = vmul.f32 1.442695, %v4942_v31 }
 0x63c   : > { %10537 = vpow2.f32 %v4943_v32 }
 0x646   : > { %v11957_v33 = vpop.eup %10537 }
 0x647   : > { %v4945_v34 = vsel %vm1725_vm6, %v11957_v33, 0.0 }
 0x648   : > { %4946 = vadd.xlane.f32.xlu1 %v4945_v34 }
 0x674   : > { %v2185_v35 = vpop.xlane.xlu0 %2184 }
 0x675   : > { %10539 = vrcp.f32 %v2185_v35 }
 0x678   : > { %v2191_v36 = vpop.permute.xlu0 %2190 }
 0x679   : > { %v2197_v37 = vand.u32 4294901760, %v2191_v36 }
 0x67b   : > { %9339 = vmatpush3.msra.mxu1 %v2197_v37  ;;  %v2274_v40 = vsub.f32 %v2191_v36, %v2197_v37 }
 0x67c   : > { %9343 = vmatprep.subr.mxu1 %v11189_v23 }
 0x67d   : > { %v3105_v1 = vpop.xlane.xlu1 %3104  ;;  %v2275_v43 = vand.u32 4294901760, %v2274_v40 }
 0x67e   : > { %10541 = vrcp.f32 %v3105_v1 }
 0x67f   : > { %v10540_v38 = vpop.eup %10539  ;;  %v2276_v47 = vsub.f32 %v2274_v40, %v2275_v43 }
 0x680   : > { %v2187_v39 = vmul.f32 %v10540_v38, %v10532_v19 }
 0x681   : > { %v2277_v52 = vand.u32 4294901760, %v2276_v47  ;;  %v3112_v54 = vpop.permute.xlu1 %3111  ;;  %v11202_v47 = vmov 1.0  }
 0x682   : > { %2188 = vst.msk [vmem:[%s11785_s17] sm:$0xff] %vm1725_vm6, %v2187_v39  ;;  %v2194_v41 = vsel %vm1725_vm6, %v2187_v39, 0  ;;  %v3118_v56 = vand.u32 4294901760, %v3112_v54 }
 0x683   : > { %v2262_v42 = vand.u32 4294901760, %v2194_v41 }
 0x684   : > { %v3195_v59 = vsub.f32 %v3112_v54, %v3118_v56 }
 0x685   : > { %v2263_v44 = vsub.f32 %v2194_v41, %v2262_v42  ;;  %v4033_v6 = vpop.permute.xlu1 %4032 }
 0x686   : > { %v3196_v61 = vand.u32 4294901760, %v3195_v59  ;;  %v12006_v8 = vand.u32 4294901760, %v4033_v6 }
 0x687   : > { %v2264_v45 = vand.u32 4294901760, %v2263_v44 }
 0x688   : > { %v10542_v46 = vpop.eup %10541  ;;  %v3197_v0 = vsub.f32 %v3195_v59, %v3196_v61  ;;  %v4116_v11 = vsub.f32 %v4033_v6, %v12006_v8 }
 0x689   : > { %v3107_v48 = vmul.f32 %v10542_v46, %v10534_v21  ;;  %v2265_v49 = vsub.f32 %v2263_v44, %v2264_v45 }
 0x68a   : > { %v3198_v4 = vand.u32 4294901760, %v3197_v0  ;;  %v4117_v13 = vand.u32 4294901760, %v4116_v11 }
 0x68b   : > { %8882 = vst.msk [vmem:[%s11785_s17 + $0x8] sm:$0xff] %vm1725_vm6, %v3107_v48  ;;  %v11967_v50 = vadd.f32 %v3107_v48, %v2187_v39  ;;  %v2266_v51 = vand.u32 4294901760, %v2265_v49  ;;  %v3115_v53 = vsel %vm1725_vm6, %v3107_v48, 0 }
 0x68c   : > { %v3183_v55 = vand.u32 4294901760, %v3115_v53  ;;  %v4118_v16 = vsub.f32 %v4116_v11, %v4117_v13 }
 0x68d   : > { %9341 = vmatmul.mubr.f32.vlgmr.msra.gmra.mrb[4].mxu1 %v2266_v51 }
 0x68e   : > { %9344 = vmatpush3.msra.mxu1 %v2277_v52  ;;  %9345 = vmatprep.mubr.msk.f32.mxu1 %vm11188_vm5, %v11189_v23  ;;  %v3184_v58 = vsub.f32 %v3115_v53, %v3183_v55  ;;  %v4119_v21 = vand.u32 4294901760, %v4118_v16 }
 0x68f   : > { %9348 = vmatprep.subr.mxu1 %v11189_v23 }
 0x690   : > { %v3185_v60 = vand.u32 4294901760, %v3184_v58 }
 0x692   : > { %v3186_v62 = vsub.f32 %v3184_v58, %v3185_v60 }
 0x694   : > { %v3187_v3 = vand.u32 4294901760, %v3186_v62 }
 0x695   : > { %9346 = vmatmul.mubr.f32.vlgmr.msra.gmra.mrb[4].mxu1 %v2262_v42 }
 0x696   : > { %9349 = vmatpush3.msra.mxu1 %v2274_v40  ;;  %9350 = vmatprep.mubr.msk.f32.mxu1 %vm11188_vm5, %v11189_v23 }
 0x697   : > { %9353 = vmatprep.subr.mxu1 %v11189_v23 }
 0x69d   : > { %9351 = vmatmul.mubr.f32.vlgmr.msra.gmra.mrb[4].mxu1 %v2263_v44 }
 0x69e   : > { %9354 = vmatpush3.msra.mxu1 %v2197_v37  ;;  %9355 = vmatprep.mubr.msk.f32.mxu1 %vm11188_vm5, %v11189_v23 }
 0x69f   : > { %9358 = vmatprep.subr.mxu1 %v11189_v23 }
 0x6a5   : > { %9356 = vmatmul.mubr.f32.vlgmr.msra.gmra.mrb[4].mxu1 %v2264_v45 }
 0x6a6   : > { %9359 = vmatpush3.msra.mxu1 %v2275_v43  ;;  %9360 = vmatprep.mubr.msk.f32.mxu1 %vm11188_vm5, %v11189_v23 }
 0x6a7   : > { %9363 = vmatprep.subr.mxu1 %v11189_v23 }
 0x6a9   : > { %v4026_v57 = vpop.xlane.xlu0 %4025 }
 0x6aa   : > { %10543 = vrcp.f32 %v4026_v57 }
 0x6ad   : > { %9361 = vmatmul.mubr.f32.vlgmr.msra.gmra.mrb[4].mxu1 %v2262_v42  ;;  %v4954_v38 = vpop.permute.xlu0 %4953 }
 0x6ae   : > { %9364 = vmatpush3.msra.mxu1 %v2197_v37  ;;  %9365 = vmatprep.mubr.msk.f32.mxu1 %vm11188_vm5, %v11189_v23  ;;  %v4960_v41 = vand.u32 4294901760, %v4954_v38 }
 0x6af   : > { %9398 = vmatprep.subr.mxu1 %v11189_v23 }
 0x6b0   : > { %v5037_v44 = vsub.f32 %v4954_v38, %v4960_v41 }
 0x6b2   : > { %v5038_v46 = vand.u32 4294901760, %v5037_v44 }
 0x6b4   : > { %v10544_v63 = vpop.eup %10543  ;;  %v5039_v49 = vsub.f32 %v5037_v44, %v5038_v46 }
 0x6b5   : > { %v4028_v2 = vmul.f32 %v10544_v63, %v11952_v28  ;;  %9366 = vmatmul.mubr.f32.vlgmr.msra.gmra.mrb[4].mxu1 %v2262_v42  ;;  %v12029_v28 = vsub.f32 %v5412_v27, %v5412_v27 }
 0x6b6   : > { %9399 = vmatpush3.msra.mxu1 %v3118_v56  ;;  %9400 = vmatprep.mubr.msk.f32.mxu1 %vm11188_vm5, %v11189_v23  ;;  %v5040_v51 = vand.u32 4294901760, %v5039_v49 }
 0x6b7   : > { %8883 = vst.msk [vmem:[%s11785_s17 + $0x10] sm:$0xff] %vm1725_vm6, %v4028_v2  ;;  %9403 = vmatprep.subr.mxu1 %v11189_v23  ;;  %v4036_v5 = vsel %vm1725_vm6, %v4028_v2, 0  ;;  %v4031_v18 = vadd.f32 %v4028_v2, %v11967_v50  ;;  %v5485_v31 = vand.u32 4294901760, %v12029_v28 }
 0x6b8   : > { %v12004_v7 = vand.u32 4294901760, %v4036_v5 }
 0x6b9   : > { %9401 = vmatmul.mubr.f32.vlgmr.msra.gmra.mrb[6].mxu1 %v3187_v3  ;;  %v5486_v34 = vsub.f32 %v12029_v28, %v5485_v31 }
 0x6ba   : > { %9404 = vmatpush3.msra.mxu1 %v3198_v4  ;;  %9405 = vmatprep.mubr.msk.f32.mxu1 %vm11188_vm5, %v11189_v23  ;;  %v4105_v10 = vsub.f32 %v4036_v5, %v12004_v7 }
 0x6bb   : > { %9408 = vmatprep.subr.mxu1 %v11189_v23  ;;  %v5487_v37 = vand.u32 4294901760, %v5486_v34 }
 0x6bc   : > { %v4106_v12 = vand.u32 4294901760, %v4105_v10 }
 0x6be   : > { %v4107_v14 = vsub.f32 %v4105_v10, %v4106_v12 }
 0x6c0   : > { %v4108_v19 = vand.u32 4294901760, %v4107_v14 }
 0x6c1   : > { %9406 = vmatmul.mubr.f32.vlgmr.msra.gmra.mrb[6].mxu1 %v3183_v55 }
 0x6c2   : > { %9409 = vmatpush3.msra.mxu1 %v3195_v59  ;;  %9410 = vmatprep.mubr.msk.f32.mxu1 %vm11188_vm5, %v11189_v23  ;;  %v1210_v59 = vld [vmem:[%s1208_s5 + $0x8] sm:$0xff] }
 0x6c3   : > { %9413 = vmatprep.subr.mxu1 %v11189_v23 }
 0x6c9   : > { %9411 = vmatmul.mubr.f32.vlgmr.msra.gmra.mrb[6].mxu1 %v3184_v58  ;;  %v1209_v58 = vld [vmem:[%s1208_s5] sm:$0xff] }
 0x6ca   : > { %9414 = vmatpush3.msra.mxu1 %v3118_v56  ;;  %9415 = vmatprep.mubr.msk.f32.mxu1 %vm11188_vm5, %v11189_v23 }
 0x6cb   : > { %9418 = vmatprep.subr.mxu1 %v11189_v23 }
 0x6d1   : > { %9416 = vmatmul.mubr.f32.vlgmr.msra.gmra.mrb[6].mxu1 %v3185_v60  ;;  %v5892_v60 = vand.u32 4294901760, %v1209_v58 }
 0x6d2   : > { %9419 = vmatpush3.msra.mxu1 %v3196_v61  ;;  %9420 = vmatprep.mubr.msk.f32.mxu1 %vm11188_vm5, %v11189_v23  ;;  %v5895_v61 = vand.u32 4294901760, %v1210_v59 }
 0x6d3   : > { %9423 = vmatprep.subr.mxu1 %v11189_v23  ;;  %v12104_v62 = vsub.f32 %v1209_v58, %v5892_v60 }
 0x6d4   : > { %v12106_v63 = vsub.f32 %v1210_v59, %v5895_v61 }
 0x6d5   : > { %v4947_v9 = vpop.xlane.xlu1 %4946  ;;  %v5973_v0 = vand.u32 4294901760, %v12104_v62 }
 0x6d6   : > { %10545 = vrcp.f32 %v4947_v9  ;;  %v5980_v2 = vand.u32 4294901760, %v12106_v63  ;;  %v9969_v27 = vpack.c.bf16 %v12106_v63, %v12104_v62 }
 0x6d7   : > { %v5974_v3 = vsub.f32 %v12104_v62, %v5973_v0 }
 0x6d8   : > { %v5981_v4 = vsub.f32 %v12106_v63, %v5980_v2  ;;  %v5884_v63 = vlaneseq }
 0x6d9   : > { %9421 = vmatmul.mubr.f32.vlgmr.msra.gmra.mrb[6].mxu1 %v3183_v55  ;;  %v5975_v5 = vand.u32 4294901760, %v5974_v3 }
 0x6da   : > { %9424 = vmatpush3.msra.mxu1 %v3118_v56  ;;  %9425 = vmatprep.mubr.msk.f32.mxu1 %vm11188_vm5, %v11189_v23  ;;  %v5982_v6 = vand.u32 4294901760, %v5981_v4 }
 0x6db   : > { %9458 = vmatprep.subr.mxu1 %v11189_v23 }
 0x6e0   : > { %v10546_v15 = vpop.eup %10545 }
 0x6e1   : > { %v4949_v17 = vmul.f32 %v10546_v15, %v11957_v33  ;;  %9426 = vmatmul.mubr.f32.vlgmr.msra.gmra.mrb[6].mxu1 %v3183_v55 }
 0x6e2   : > { %9459 = vmatpush3.msra.mxu1 %v12006_v8  ;;  %9460 = vmatprep.mubr.msk.f32.mxu1 %vm11188_vm5, %v11189_v23 }
 0x6e3   : > { %8884 = vst.msk [vmem:[%s11785_s17 + $0x18] sm:$0xff] %vm1725_vm6, %v4949_v17  ;;  %9463 = vmatprep.subr.mxu1 %v11189_v23  ;;  %v4952_v20 = vadd.f32 %v4949_v17, %v4031_v18  ;;  %v4957_v1 = vsel %vm1725_vm6, %v4949_v17, 0 }
 0x6e4   : > { %v5025_v40 = vand.u32 4294901760, %v4957_v1 }
 0x6e5   : > { %9461 = vmatmul.mubr.f32.vlgmr.msra.gmra.mrb[8].mxu1 %v4108_v19  ;;  %v5405_v24 = vmul.f32 0.25, %v4952_v20 }
 0x6e6   : > { %9464 = vmatpush3.msra.mxu1 %v4119_v21  ;;  %9465 = vmatprep.mubr.msk.f32.mxu1 %vm11188_vm5, %v11189_v23  ;;  %v5026_v43 = vsub.f32 %v4957_v1, %v5025_v40 }
 0x6e7   : > { %9468 = vmatprep.subr.mxu1 %v11189_v23  ;;  %v5406_v25 = vadd.f32 1e-08, %v5405_v24 }
 0x6e8   : > { %v5027_v45 = vand.u32 4294901760, %v5026_v43 }
 0x6e9   : > { %10547 = vlog2.f32 %v5406_v25 }
 0x6ea   : > { %v5028_v48 = vsub.f32 %v5026_v43, %v5027_v45 }
 0x6ec   : > { %v5029_v50 = vand.u32 4294901760, %v5028_v48 }
 0x6ed   : > { %9466 = vmatmul.mubr.f32.vlgmr.msra.gmra.mrb[8].mxu1 %v12004_v7 }
 0x6ee   : > { %9469 = vmatpush3.msra.mxu1 %v4116_v11  ;;  %9470 = vmatprep.mubr.msk.f32.mxu1 %vm11188_vm5, %v11189_v23  ;;  %v1212_v11 = vld [vmem:[%s1208_s5 + $0x18] sm:$0xff] }
 0x6ef   : > { %9473 = vmatprep.subr.mxu1 %v11189_v23 }
 0x6f3   : > { %v10548_v29 = vpop.eup %10547 }
 0x6f4   : > { %v5408_v30 = vmul.f32 0.6931472, %v10548_v29 }
 0x6f5   : > { %9471 = vmatmul.mubr.f32.vlgmr.msra.gmra.mrb[8].mxu1 %v4105_v10  ;;  %v1211_v10 = vld [vmem:[%s1208_s5 + $0x10] sm:$0xff]  ;;  %s12188_s5 = scalar_lea.vmem [#allocation18], %s8880_s6 }
 0x6f6   : > { %9474 = vmatpush3.msra.mxu1 %v12006_v8  ;;  %9475 = vmatprep.mubr.msk.f32.mxu1 %vm11188_vm5, %v11189_v23  ;;  %v8885_v32 = vadd.f32 2.0794415, %v5408_v30 }
 0x6f7   : > { %9478 = vmatprep.subr.mxu1 %v11189_v23 }
 0x6f8   : > { %v5410_v33 = vmul.f32 %v8885_v32, %v5406_v25  ;;  %v9957_v25 = vpack.c.bf16 %v5895_v61, %v5892_v60  ;;  %v5863_v60 = vld [vmem:[#allocation3] sm:$0x1] }
 0x6fa   : > { %v5415_v35 = vsel %vm1725_vm6, %v5410_v33, 0 }
 0x6fb   : > { %v12040_v36 = vand.u32 4294901760, %v5415_v35 }
 0x6fd   : > { %9476 = vmatmul.mubr.f32.vlgmr.msra.gmra.mrb[8].mxu1 %v4106_v12  ;;  %9549 = vmatpush3.xpose.msra.mxu0 %v12040_v36  ;;  %v5495_v39 = vsub.f32 %v5415_v35, %v12040_v36  ;;  %v5898_v12 = vand.u32 4294901760, %v1211_v10 }
 0x6fe   : > { %9479 = vmatpush3.msra.mxu1 %v4117_v13  ;;  %9558 = vmatprep.subr.mxu0 %v11189_v23  ;;  %v5901_v13 = vand.u32 4294901760, %v1212_v11 }
 0x6ff   : > { %9480 = vmatprep.mubr.msk.f32.mxu1 %vm11188_vm5, %v11189_v23  ;;  %9483 = vmatprep.subr.mxu1 %v11189_v23  ;;  %v5496_v42 = vand.u32 4294901760, %v5495_v39  ;;  %v12113_v14 = vsub.f32 %v1211_v10, %v5898_v12 }
 0x700   : > { %9551 = vmatmul.mubr.f32.vlgmr.msra.gmra.mrb[8].mxu0 %v5487_v37  ;;  %v12115_v15 = vsub.f32 %v1212_v11, %v5901_v13  ;;  %v9960_v26 = vpack.c.bf16 %v5901_v13, %v5898_v12 }
 0x701   : > { %9559 = vmatpush3.xpose.msra.mxu0 %v5495_v39  ;;  %9560 = vmatprep.mubr.msk.f32.mxu0 %vm11188_vm5, %v11189_v23  ;;  %v5497_v52 = vsub.f32 %v5495_v39, %v5496_v42  ;;  %v5987_v16 = vand.u32 4294901760, %v12113_v14 }
 0x702   : > { %9568 = vmatprep.subr.mxu0 %v11189_v23  ;;  %v5994_v17 = vand.u32 4294901760, %v12115_v15  ;;  %v9972_v30 = vpack.c.bf16 %v12115_v15, %v12113_v14 }
 0x703   : > { %v5498_v53 = vand.u32 4294901760, %v5497_v52  ;;  %v5988_v18 = vsub.f32 %v12113_v14, %v5987_v16 }
 0x704   : > { %9561 = vmatmul.mubr.f32.vlgmr.msra.gmra.mrb[10].mxu0 %v12029_v28  ;;  %v5995_v19 = vsub.f32 %v12115_v15, %v5994_v17  ;;  %v9984_v32 = vpack.c.bf16 %v5994_v17, %v5987_v16 }
 0x705   : > { %9481 = vmatmul.mubr.f32.vlgmr.msra.gmra.mrb[8].mxu1 %v12004_v7  ;;  %9569 = vmatpush3.xpose.msra.mxu0 %v5496_v42  ;;  %v5989_v20 = vand.u32 4294901760, %v5988_v18 }
 0x706   : > { %9484 = vmatpush3.msra.mxu1 %v12006_v8  ;;  %9485 = vmatprep.mubr.msk.f32.mxu1 %vm11188_vm5, %v11189_v23  ;;  %v5996_v21 = vand.u32 4294901760, %v5995_v19 }
 0x707   : > { %9518 = vmatprep.subr.mxu1 %v11189_v23  ;;  %9570 = vmatprep.mubr.msk.f32.mxu0 %vm11188_vm5, %v11189_v23 }
 0x708   : > { %9956 = vmatprep.subr.bf16.mxu0 %v11187_v22  ;;  %9571 = vmatmul.mubr.msk.f32.vlgmr.msra.gmra.mrb[12].mxu0 %vm1725_vm6, %v11202_v47  ;;  %v9966_v24 = vpack.c.bf16 %v5996_v21, %v5989_v20 }
 0x709   : > { %9586 = vmatprep.mubr.msk.f32.mxu0 %vm11188_vm5, %v11189_v23  ;;  %9958 = vmatpush3.bf16.msra.mxu0 %v9957_v25 }
 0x70a   : > { %9959 = vmatprep.subr.bf16.mxu0 %v11187_v22 }
 0x70d   : > { %9486 = vmatmul.mubr.f32.vlgmr.msra.gmra.mrb[8].mxu1 %v12004_v7  ;;  %v9963_v7 = vpack.c.bf16 %v5982_v6, %v5975_v5  ;;  %9961 = vmatpush3.bf16.msra.mxu0 %v9960_v26  ;;  %v12158_v5 = vld [vmem:[%s1231_s3] sm:$0x3f]  ;;  %s12739_s3 = scalar_lea.vmem (!%p8890_p0), [#allocation25], %s11745_s19 }
 0x70e   : > { %9519 = vmatpush3.msra.mxu1 %v4960_v41  ;;  %9520 = vmatprep.mubr.msk.f32.mxu1 %vm11188_vm5, %v11189_v23 }
 0x70f   : > { %9523 = vmatprep.subr.mxu1 %v11189_v23  ;;  %9968 = vmatprep.subr.bf16.mxu0 %v11187_v22 }
 0x711   : > { %9521 = vmatmul.mubr.f32.vlgmr.msra.gmra.mrb[10].mxu1 %v5029_v50 }
 0x712   : > { %9524 = vmatpush3.msra.mxu1 %v5040_v51  ;;  %9525 = vmatprep.mubr.msk.f32.mxu1 %vm11188_vm5, %v11189_v23 }
 0x713   : > { %9528 = vmatprep.subr.mxu1 %v11189_v23 }
 0x719   : > { %9526 = vmatmul.mubr.f32.vlgmr.msra.gmra.mrb[10].mxu1 %v5025_v40 }
 0x71a   : > { %9529 = vmatpush3.msra.mxu1 %v5037_v44  ;;  %9530 = vmatprep.mubr.msk.f32.mxu1 %vm11188_vm5, %v11189_v23 }
 0x71b   : > { %9533 = vmatprep.subr.mxu1 %v11189_v23 }
 0x721   : > { %9531 = vmatmul.mubr.f32.vlgmr.msra.gmra.mrb[10].mxu1 %v5026_v43 }
 0x722   : > { %9534 = vmatpush3.msra.mxu1 %v4960_v41  ;;  %9535 = vmatprep.mubr.msk.f32.mxu1 %vm11188_vm5, %v11189_v23 }
 0x723   : > { %9538 = vmatprep.subr.mxu1 %v11189_v23 }
 0x729   : > { %9536 = vmatmul.mubr.f32.vlgmr.msra.gmra.mrb[10].mxu1 %v5027_v45 }
 0x72a   : > { %9539 = vmatpush3.msra.mxu1 %v5038_v46  ;;  %9540 = vmatprep.mubr.msk.f32.mxu1 %vm11188_vm5, %v11189_v23 }
 0x72b   : > { %9543 = vmatprep.subr.mxu1 %v11189_v23 }
 0x731   : > { %9541 = vmatmul.mubr.f32.vlgmr.msra.gmra.mrb[10].mxu1 %v5025_v40 }
 0x732   : > { %9544 = vmatpush3.msra.mxu1 %v4960_v41  ;;  %9545 = vmatprep.mubr.msk.f32.mxu1 %vm11188_vm5, %v11189_v23 }
 0x733   : > { %9553 = vmatprep.subr.mxu1 %v11189_v23 }
 0x739   : > { %9546 = vmatmul.mubr.f32.vlgmr.msra.gmra.mrb[10].mxu1 %v5025_v40 }
 0x73a   : > { %9554 = vmatpush3.xpose.msra.mxu1 %v5498_v53  ;;  %9555 = vmatprep.mubr.msk.f32.mxu1 %vm11188_vm5, %v11189_v23 }
 0x73b   : > { %9563 = vmatprep.subr.mxu1 %v11189_v23 }
 0x73d   : > { %9556 = vmatmul.mubr.msk.f32.vlgmr.msra.gmra.mrb[12].mxu1 %vm1725_vm6, %v11202_v47 }
 0x73e   : > { %9564 = vmatpush3.xpose.msra.mxu1 %v12040_v36  ;;  %9565 = vmatprep.mubr.msk.f32.mxu1 %vm11188_vm5, %v11189_v23 }
 0x73f   : > { %9573 = vmatprep.subr.mxu1 %v11189_v23 }
 0x741   : > { %9566 = vmatmul.mubr.f32.vlgmr.msra.gmra.mrb[14].mxu1 %v5485_v31  ;;  %v9981_v31 = vpack.c.bf16 %v5980_v2, %v5973_v0  ;;  %v12155_v0 = vshrl.u32 %v5884_v63, 7 }
 0x742   : > { %9574 = vmatpush3.xpose.msra.mxu1 %v12040_v36  ;;  %9575 = vmatprep.mubr.msk.f32.mxu1 %vm11188_vm5, %v11189_v23 }
 0x743   : > { %9962 = vmatprep.subr.bf16.mxu1 %v11187_v22  ;;  %v5886_v4 = vsub.s32 0, %v12155_v0 }
 0x745   : > { %9576 = vmatmul.mubr.msk.f32.vlgmr.msra.gmra.mrb[16].mxu1 %vm1725_vm6, %v11202_v47  ;;  %v5887_v6 = vrot.slane %v12158_v5, %v5886_v4 }
 0x746   : > { %9597 = vmatprep.mubr.msk.f32.mxu1 %vm11188_vm5, %v11189_v23  ;;  %9964 = vmatpush3.bf16.msra.mxu1 %v9963_v7 }
 0x747   : > { %9965 = vmatprep.subr.bf16.mxu1 %v11187_v22 }
 0x74a   : > { %9967 = vmatpush3.bf16.msra.mxu1 %v9966_v24 }
 0x74b   : > { %9974 = vmatprep.subr.bf16.mxu1 %v11187_v22 }
 0x788   : > { %v12100_v54 = vpop.f32.mrb[4].mxu1 }
 0x789   : > { %v9367_v55 = vpop.f32.mrb[5].mxu1 }
 0x7b4   : > { %v3559_v56 = vpop.f32.mrb[6].mxu1 }
 0x7b5   : > { %5868 = vrot.lane.b32.xlu1 %v3559_v56, %s12650_s18  ;;  %v9427_v57 = vpop.f32.mrb[7].mxu1 }
 0x7d3   : > { %v5489_v34 = vpop.f32.mrb[8].mxu0 }
 0x7d4   : > { %v9552_v37 = vpop.f32.mrb[9].mxu0 }
 0x7d7   : > { %v5639_v38 = vpop.f32.mrb[10].mxu0 }
 0x7d8   : > { %v9562_v41 = vpop.f32.mrb[11].mxu0 }
 0x7db   : > { %v5787_v57 = vpop.f32.mrb[12].mxu0 }
 0x7dc   : > { %v9572_v59 = vpop.f32.mrb[13].mxu0 }
 0x7e0   : > { %v4480_v8 = vpop.f32.mrb[8].mxu1 }
 0x7e1   : > { %5872 = vrot.lane.b32.xlu0 %v4480_v8, %s11204_s27  ;;  %v9487_v9 = vpop.f32.mrb[9].mxu1  ;;  %s1228_s27 = scalar_lea.vmem [#allocation16], %s12736_s15  ;;  %s12737_s15 = scalar_lea.vmem (!%p8890_p0), [#allocation27], %s11745_s19 }
 0x80c   : > { %v5401_v28 = vpop.f32.mrb[10].mxu1 }
 0x80d   : > { %5876 = vrot.lane.b32.xlu0 %v5401_v28, %s11205_s2  ;;  %v9547_v29 = vpop.f32.mrb[11].mxu1  ;;  %s12738_s2 = scalar_lea.vmem (!%p8890_p0), [#allocation24], %s11748_s23 }
 0x810   : > { %v5565_v33 = vpop.f32.mrb[12].mxu1 }
 0x811   : > { %v9557_v35 = vpop.f32.mrb[13].mxu1  ;;  %v5566_v36 = vadd.f32 %v5565_v33, %v5489_v34  ;;  %v1214_v33 = vld [vmem:[%s1213_s1] sm:$0xff]  ;;  %v1215_v34 = vld [vmem:[%s1213_s1 + $0x8] sm:$0xff] }
 0x812   : > { %v1216_v35 = vld [vmem:[%s1213_s1 + $0x10] sm:$0xff]  ;;  %v6414_v37 = vand.u32 4294901760, %v1215_v34 }
 0x813   : > { %v5640_v40 = vadd.f32 %v5639_v38, %v5566_v36  ;;  %v6411_v36 = vand.u32 4294901760, %v1214_v33  ;;  %v6417_v38 = vand.u32 4294901760, %v1216_v35 }
 0x814   : > { %v5713_v1 = vpop.f32.mrb[14].mxu1 }
 0x815   : > { %v9567_v39 = vpop.f32.mrb[15].mxu1  ;;  %v5714_v56 = vadd.f32 %v5713_v1, %v5640_v40  ;;  %v1217_v1 = vld [vmem:[%s1213_s1 + $0x18] sm:$0xff]  ;;  %v12164_v40 = vpack.c.bf16 %v6414_v37, %v6411_v36  ;;  %v12166_v41 = vsub.f32 %v1214_v33, %v6411_v36 }
 0x816   : > { %v6420_v39 = vand.u32 4294901760, %v1217_v1 }
 0x817   : > { %v5788_v58 = vadd.f32 %v5787_v57, %v5714_v56 }
 0x818   : > { %v5859_v42 = vpop.f32.mrb[16].mxu1 }
 0x819   : > { %v9577_v43 = vpop.f32.mrb[17].mxu1  ;;  %v5860_v61 = vadd.f32 %v5859_v42, %v5788_v58  ;;  %v6498_v42 = vsub.f32 %v1215_v34, %v6414_v37  ;;  %v1224_v34 = vld [vmem:[%s12188_s5 + $0x20] sm:$0xff] }
 0x81a   : > { %v12168_v43 = vsub.f32 %v1216_v35, %v6417_v38  ;;  %v1225_v35 = vld [vmem:[%s12188_s5 + $0x28] sm:$0xff]  ;;  %v6917_v36 = vand.u32 4294901760, %v1224_v34 }
 0x81b   : > { %v5864_v62 = vadd.f32 %v5863_v60, %v5860_v61  ;;  %v10005_v60 = vpack.c.bf16 %v6498_v42, %v12166_v41  ;;  %v6920_v37 = vand.u32 4294901760, %v1225_v35 }
 0x81d   : > { %5866 = vst.msk [vmem:[#allocation3] sm:$0x1] %vm5865_vm9, %v5864_v62 }
 0x827   : > { %v5869_v44 = vpop.permute.xlu1 %5868 }
 0x828   : > { %v5879_v46 = vsel %vm1725_vm6, %v12100_v54, %v5869_v44  ;;  %v12170_v44 = vsub.f32 %v1217_v1, %v6420_v39  ;;  %v12246_v1 = vpack.c.bf16 %v6920_v37, %v6917_v36 }
 0x82a   : > { %v10008_v61 = vpack.c.bf16 %v12170_v44, %v12168_v43 }
 0x853   : > { %v5873_v45 = vpop.permute.xlu0 %5872 }
 0x854   : > { %v5881_v47 = vsel %vm5880_vm7, %v5879_v46, %v5873_v45  ;;  %v12173_v45 = vpack.c.bf16 %v6420_v39, %v6417_v38  ;;  %v6492_v46 = vand.u32 4294901760, %v12166_v41  ;;  %v1226_v38 = vld [vmem:[%s12188_s5 + $0x30] sm:$0xff]  ;;  %v1227_v39 = vld [vmem:[%s12188_s5 + $0x38] sm:$0xff] }
 0x87f   : > { %v5877_v48 = vpop.permute.xlu0 %5876 }
 0x880   : > { %v5883_v49 = vsel %vm5882_vm8, %v5881_v47, %v5877_v48  ;;  %v6499_v47 = vand.u32 4294901760, %v6498_v42  ;;  %v6493_v48 = vsub.f32 %v12166_v41, %v6492_v46  ;;  %v6926_v41 = vand.u32 4294901760, %v1227_v39 }
 0x881   : > { %v5889_v50 = vsel %vm1233_vm4, %v5883_v49, 0 }
 0x882   : > { %v5960_v51 = vand.u32 4294901760, %v5889_v50  ;;  %v6500_v49 = vsub.f32 %v6498_v42, %v6499_v47  ;;  %v10017_v62 = vpack.c.bf16 %v6499_v47, %v6492_v46  ;;  %v12262_v46 = vsub.f32 %v1225_v35, %v6920_v37 }
 0x884   : > { %v5961_v52 = vsub.f32 %v5889_v50, %v5960_v51  ;;  %9598 = vmatmul.mubr.f32.vlgmr.msra.gmra.mrb[18].mxu1 %v5960_v51  ;;  %v6494_v50 = vand.u32 4294901760, %v6493_v48  ;;  %v12267_v48 = vsub.f32 %v1227_v39, %v6926_v41 }
 0x885   : > { %9976 = vmatpush3.bf16.msra.mxu1 %v9957_v25  ;;  %9619 = vmatprep.mubr.msk.f32.mxu1 %vm11188_vm5, %v11189_v23 }
 0x886   : > { %9977 = vmatprep.subr.bf16.mxu1 %v11187_v22  ;;  %v5962_v53 = vand.u32 4294901760, %v5961_v52 }
 0x888   : > { %v5963_v55 = vsub.f32 %v5961_v52, %v5962_v53 }
 0x889   : > { %9979 = vmatpush3.bf16.msra.mxu1 %v9960_v26 }
 0x88a   : > { %9986 = vmatprep.subr.bf16.mxu1 %v11187_v22  ;;  %v5964_v54 = vand.u32 4294901760, %v5963_v55 }
 0x88c   : > { %9620 = vmatmul.mubr.f32.vlgmr.msra.gmra.mrb[20].mxu1 %v5962_v53  ;;  %9587 = vmatmul.mubr.f32.vlgmr.msra.gmra.mrb[14].mxu0 %v5964_v54  ;;  %v6513_v53 = vand.u32 4294901760, %v12170_v44 }
 0x88d   : > { %9970 = vmatpush3.bf16.msra.mxu0 %v9969_v27  ;;  %9988 = vmatpush3.bf16.msra.mxu1 %v9957_v25  ;;  %v10553_v25 = vld [vmem:[#allocation2] sm:$0xff] }
 0x88e   : > { %9971 = vmatprep.subr.bf16.mxu0 %v11187_v22  ;;  %9989 = vmatprep.subr.bf16.mxu1 %v11187_v22  ;;  %v6514_v56 = vsub.f32 %v12170_v44, %v6513_v53 }
 0x88f   : > { %9608 = vmatprep.mubr.msk.f32.mxu0 %vm11188_vm5, %v11189_v23  ;;  %9641 = vmatprep.mubr.msk.f32.mxu1 %vm11188_vm5, %v11189_v23 }
 0x890   : > { %v6515_v58 = vand.u32 4294901760, %v6514_v56 }
 0x891   : > { %9973 = vmatpush3.bf16.msra.mxu0 %v9972_v30  ;;  %9991 = vmatpush3.bf16.msra.mxu1 %v9960_v26 }
 0x892   : > { %9980 = vmatprep.subr.bf16.mxu0 %v11187_v22  ;;  %10028 = vmatprep.subr.bf16.mxu1 %v11187_v22 }
 0x894   : > { %9609 = vmatmul.mubr.f32.vlgmr.msra.gmra.mrb[16].mxu0 %v5961_v52  ;;  %9642 = vmatmul.mubr.f32.vlgmr.msra.gmra.mrb[22].mxu1 %v5960_v51  ;;  %v6506_v52 = vand.u32 4294901760, %v12168_v43 }
 0x895   : > { %9982 = vmatpush3.bf16.msra.mxu0 %v9981_v31  ;;  %9630 = vmatprep.mubr.msk.f32.mxu0 %vm11188_vm5, %v11189_v23 }
 0x896   : > { %9983 = vmatprep.subr.bf16.mxu0 %v11187_v22  ;;  %9726 = vmatprep.mubr.msk.f32.mxu1 %vm11188_vm5, %v11189_v23  ;;  %v6507_v54 = vsub.f32 %v12168_v43, %v6506_v52  ;;  %v10020_v63 = vpack.c.bf16 %v6513_v53, %v6506_v52 }
 0x898   : > { %v6508_v57 = vand.u32 4294901760, %v6507_v54 }
 0x899   : > { %9985 = vmatpush3.bf16.msra.mxu0 %v9984_v32 }
 0x89a   : > { %9992 = vmatprep.subr.bf16.mxu0 %v11187_v22  ;;  %v10002_v59 = vpack.c.bf16 %v6515_v58, %v6508_v57 }
 0x89c   : > { %9631 = vmatmul.mubr.f32.vlgmr.msra.gmra.mrb[18].mxu0 %v5960_v51  ;;  %v6501_v51 = vand.u32 4294901760, %v6500_v49 }
 0x89d   : > { %9652 = vmatprep.mubr.msk.f32.mxu0 %vm11188_vm5, %v11189_v23  ;;  %9994 = vmatpush3.bf16.msra.mxu0 %v12164_v40 }
 0x89e   : > { %9995 = vmatprep.subr.bf16.mxu0 %v11187_v22  ;;  %v9999_v55 = vpack.c.bf16 %v6501_v51, %v6494_v50 }
 0x8a1   : > { %9997 = vmatpush3.bf16.msra.mxu0 %v12173_v45 }
 0x8a2   : > { %9998 = vmatprep.subr.bf16.mxu0 %v11187_v22 }
 0x957   : > { %v6057_v2 = vpop.f32.mrb[18].mxu1 }
 0x958   : > { %v9599_v3 = vpop.f32.mrb[19].mxu1 }
 0x959   : > { %v1221_v3 = vld [vmem:[%s12188_s5 + $0x8] sm:$0xff] }
 0x95f   : > { %v6214_v7 = vpop.f32.mrb[20].mxu1  ;;  %v5966_v8 = vpop.f32.mrb[14].mxu0 }
 0x960   : > { %v5967_v9 = vadd.f32 %v5966_v8, %v5887_v6  ;;  %v9621_v10 = vpop.f32.mrb[21].mxu1  ;;  %v9588_v11 = vpop.f32.mrb[15].mxu0  ;;  %v6908_v6 = vand.u32 4294901760, %v1221_v3 }
 0x962   : > { %v6058_v12 = vadd.f32 %v6057_v2, %v5967_v9  ;;  %v1220_v2 = vld [vmem:[%s12188_s5] sm:$0xff]  ;;  %v12196_v9 = vsub.f32 %v1221_v3, %v6908_v6 }
 0x963   : > { %v6905_v4 = vand.u32 4294901760, %v1220_v2 }
 0x964   : > { %v6997_v50 = vand.u32 4294901760, %v12196_v9 }
 0x965   : > { %v12194_v8 = vsub.f32 %v1220_v2, %v6905_v4 }
 0x966   : > { %v6998_v52 = vsub.f32 %v12196_v9, %v6997_v50 }
 0x967   : > { %v6137_v13 = vpop.f32.mrb[16].mxu0  ;;  %v6372_v14 = vpop.f32.mrb[22].mxu1  ;;  %v6990_v49 = vand.u32 4294901760, %v12194_v8 }
 0x968   : > { %v6138_v15 = vadd.f32 %v6137_v13, %v6058_v12  ;;  %v9610_v16 = vpop.f32.mrb[17].mxu0  ;;  %v9643_v17 = vpop.f32.mrb[23].mxu1  ;;  %v6393_v13 = vsub.s32 1, %v12155_v0 }
 0x969   : > { %v6991_v51 = vsub.f32 %v12194_v8, %v6990_v49 }
 0x96a   : > { %v6215_v18 = vadd.f32 %v6214_v7, %v6138_v15  ;;  %v12192_v7 = vpack.c.bf16 %v6908_v6, %v6905_v4  ;;  %v6394_v15 = vrot.slane %v12158_v5, %v6393_v13 }
 0x96b   : > { %v6992_v53 = vand.u32 4294901760, %v6991_v51 }
 0x96c   : > { %10030 = vmatpush3.bf16.msra.mxu1 %v12192_v7 }
 0x96d   : > { %10031 = vmatprep.subr.bf16.mxu1 %v11187_v22 }
 0x96f   : > { %v6297_v19 = vpop.f32.mrb[18].mxu0 }
 0x970   : > { %v6298_v20 = vadd.f32 %v6297_v19, %v6215_v18  ;;  %v9632_v21 = vpop.f32.mrb[19].mxu0 }
 0x972   : > { %v6373_v24 = vadd.f32 %v6372_v14, %v6298_v20  ;;  %v6398_v14 = vsub.s32 2, %v12155_v0 }
 0x974   : > { %v6376_v26 = vadd.f32 %v10553_v25, %v6373_v24  ;;  %v6399_v18 = vrot.slane %v12158_v5, %v6398_v14 }
 0x976   : > { %v6377_v27 = vsel %vm1233_vm4, %v6376_v26, 0.0 }
 0x977   : > { %6378 = vadd.xlane.f32.xlu0 %v6377_v27 }
 0xa04   : > { %v6379_v28 = vpop.xlane.xlu0 %6378 }
 0xa05   : > { %v6381_v29 = vmul.f32 0.03125, %v6379_v28 }
 0xa07   : > { %v6382_v30 = vsub.f32 %v6376_v26, %v6381_v29  ;;  %v1222_v29 = vld [vmem:[%s12188_s5 + $0x10] sm:$0xff] }
 0xa09   : > { %v6383_v31 = vmul.f32 %v6382_v30, %v6382_v30 }
 0xa0b   : > { %v6384_v32 = vsel %vm1233_vm4, %v6383_v31, 0.0  ;;  %v6911_v31 = vand.u32 4294901760, %v1222_v29 }
 0xa0c   : > { %6385 = vadd.xlane.f32.xlu1 %v6384_v32 }
 0xa0d   : > { %v12256_v43 = vsub.f32 %v1222_v29, %v6911_v31 }
 0xa0f   : > { %v7004_v54 = vand.u32 4294901760, %v12256_v43 }
 0xa11   : > { %v7005_v58 = vsub.f32 %v12256_v43, %v7004_v54 }
 0xa99   : > { %v6386_v10 = vpop.xlane.xlu1 %6385 }
 0xa9a   : > { %v6387_v11 = vmul.f32 0.03125, %v6386_v10 }
 0xa9c   : > { %v6388_v12 = vadd.f32 1e-05, %v6387_v11 }
 0xa9e   : > { %10549 = vrsqrt.f32 %v6388_v12  ;;  %v7039_v12 = vand.u32 4294901760, %v12267_v48 }
 0xaa8   : > { %v10550_v16 = vpop.eup %10549 }
 0xaa9   : > { %v6390_v17 = vmul.f32 %v10550_v16, %v6382_v30  ;;  %v1223_v30 = vld [vmem:[%s12188_s5 + $0x18] sm:$0xff] }
 0xaaa   : > { %v6914_v32 = vand.u32 4294901760, %v1223_v30 }
 0xaab   : > { %v6395_v19 = vmul.f32 %v6394_v15, %v6390_v17  ;;  %v7040_v15 = vsub.f32 %v12267_v48, %v7039_v12 }
 0xaac   : > { %v12238_v33 = vpack.c.bf16 %v6914_v32, %v6911_v31  ;;  %v12258_v44 = vsub.f32 %v1223_v30, %v6914_v32  ;;  %v8889_v30 = vld [vmem:[%s1228_s27] ss:$0 sm:$0xff] }
 0xaad   : > { %v12204_v20 = vadd.f32 %v6399_v18, %v6395_v19  ;;  %v7041_v17 = vand.u32 4294901760, %v7040_v15  ;;  %v10053_v19 = vpack.c.bf16 %v12196_v9, %v12194_v8  ;;  %v7474_v15 = vld [vmem:[#allocation19 + $0x8] sm:$0xff] (!%p8890_p0) }
 0xaae   : > { %10033 = vmatpush3.bf16.msra.mxu1 %v12238_v33  ;;  %v7011_v56 = vand.u32 4294901760, %v12258_v44 }
 0xaaf   : > { %v6408_v21 = vsel %vm1233_vm4, %v12204_v20, 0  ;;  %10034 = vmatprep.subr.bf16.mxu1 %v11187_v22 }
 0xab0   : > { %v6479_v24 = vand.u32 4294901760, %v6408_v21 }
 0xab2   : > { %v6480_v25 = vsub.f32 %v6408_v21, %v6479_v24  ;;  %10036 = vmatpush3.bf16.msra.mxu1 %v12246_v1  ;;  %v10056_v21 = vpack.c.bf16 %v12258_v44, %v12256_v43 }
 0xab3   : > { %10037 = vmatprep.subr.bf16.mxu1 %v11187_v22 }
 0xab4   : > { %v6481_v26 = vand.u32 4294901760, %v6480_v25 }
 0xab6   : > { %v6482_v27 = vsub.f32 %v6480_v25, %v6481_v26 }
 0xab8   : > { %v6483_v28 = vand.u32 4294901760, %v6482_v27  ;;  %v10080_v27 = vpack.c.bf16 %v7011_v56, %v7004_v54 }
 0xaba   : > { %9653 = vmatmul.mubr.f32.vlgmr.msra.gmra.mrb[20].mxu0 %v6483_v28 }
 0xabb   : > { %10000 = vmatpush3.bf16.msra.mxu0 %v9999_v55  ;;  %9663 = vmatprep.mubr.msk.f32.mxu0 %vm11188_vm5, %v11189_v23  ;;  %v6999_v55 = vand.u32 4294901760, %v6998_v52 }
 0xabc   : > { %10001 = vmatprep.subr.bf16.mxu0 %v11187_v22 }
 0xabd   : > { %v10041_v57 = vpack.c.bf16 %v6999_v55, %v6992_v53 }
 0xabf   : > { %10003 = vmatpush3.bf16.msra.mxu0 %v10002_v59  ;;  %v7012_v59 = vsub.f32 %v12258_v44, %v7011_v56 }
 0xac0   : > { %10004 = vmatprep.subr.bf16.mxu0 %v11187_v22 }
 0xac2   : > { %9664 = vmatmul.mubr.f32.vlgmr.msra.gmra.mrb[20].mxu0 %v6479_v24 }
 0xac3   : > { %10006 = vmatpush3.bf16.msra.mxu0 %v10005_v60  ;;  %9674 = vmatprep.mubr.msk.f32.mxu0 %vm11188_vm5, %v11189_v23  ;;  %v7006_v60 = vand.u32 4294901760, %v7005_v58 }
 0xac4   : > { %10007 = vmatprep.subr.bf16.mxu0 %v11187_v22 }
 0xac7   : > { %10009 = vmatpush3.bf16.msra.mxu0 %v10008_v61  ;;  %v7013_v61 = vand.u32 4294901760, %v7012_v59 }
 0xac8   : > { %10010 = vmatprep.subr.bf16.mxu0 %v11187_v22 }
 0xac9   : > { %v10044_v2 = vpack.c.bf16 %v7013_v61, %v7006_v60 }
 0xaca   : > { %9675 = vmatmul.mubr.f32.vlgmr.msra.gmra.mrb[20].mxu0 %v6480_v25 }
 0xacb   : > { %10012 = vmatpush3.bf16.msra.mxu0 %v12164_v40  ;;  %9685 = vmatprep.mubr.msk.f32.mxu0 %vm11188_vm5, %v11189_v23 }
 0xacc   : > { %10013 = vmatprep.subr.bf16.mxu0 %v11187_v22 }
 0xacf   : > { %10015 = vmatpush3.bf16.msra.mxu0 %v12173_v45 }
 0xad0   : > { %10016 = vmatprep.subr.bf16.mxu0 %v11187_v22 }
 0xad2   : > { %9686 = vmatmul.mubr.f32.vlgmr.msra.gmra.mrb[20].mxu0 %v6481_v26  ;;  %v10077_v26 = vpack.c.bf16 %v6997_v50, %v6990_v49 }
 0xad3   : > { %10018 = vmatpush3.bf16.msra.mxu0 %v10017_v62  ;;  %9696 = vmatprep.mubr.msk.f32.mxu0 %vm11188_vm5, %v11189_v23 }
 0xad4   : > { %10019 = vmatprep.subr.bf16.mxu0 %v11187_v22 }
 0xad7   : > { %10021 = vmatpush3.bf16.msra.mxu0 %v10020_v63  ;;  %v7025_v63 = vand.u32 4294901760, %v12262_v46 }
 0xad8   : > { %10022 = vmatprep.subr.bf16.mxu0 %v11187_v22 }
 0xad9   : > { %v7026_v4 = vsub.f32 %v12262_v46, %v7025_v63 }
 0xada   : > { %9697 = vmatmul.mubr.f32.vlgmr.msra.gmra.mrb[20].mxu0 %v6479_v24 }
 0xadb   : > { %10024 = vmatpush3.bf16.msra.mxu0 %v12164_v40  ;;  %9707 = vmatprep.mubr.msk.f32.mxu0 %vm11188_vm5, %v11189_v23  ;;  %v6923_v40 = vand.u32 4294901760, %v1226_v38  ;;  %v7027_v10 = vand.u32 4294901760, %v7026_v4  ;;  %v7462_v4 = vsub.s32 4, %v12155_v0 }
 0xadc   : > { %10025 = vmatprep.subr.bf16.mxu0 %v11187_v22 }
 0xadd   : > { %v12254_v42 = vpack.c.bf16 %v6926_v41, %v6923_v40  ;;  %v12265_v47 = vsub.f32 %v1226_v38, %v6923_v40  ;;  %v6898_v41 = vsub.s32 5, %v12155_v0 }
 0xadf   : > { %10027 = vmatpush3.bf16.msra.mxu0 %v12173_v45  ;;  %v12260_v45 = vsub.f32 %v1224_v34, %v6917_v36  ;;  %10039 = vmatpush3.bf16.msra.mxu1 %v12254_v42  ;;  %v7032_v11 = vand.u32 4294901760, %v12265_v47  ;;  %v10062_v25 = vpack.c.bf16 %v12267_v48, %v12265_v47 }
 0xae0   : > { %10064 = vmatprep.subr.bf16.mxu0 %v11187_v22  ;;  %10040 = vmatprep.subr.bf16.mxu1 %v11187_v22 }
 0xae1   : > { %v7018_v62 = vand.u32 4294901760, %v12260_v45  ;;  %v7033_v14 = vsub.f32 %v12265_v47, %v7032_v11  ;;  %v10086_v29 = vpack.c.bf16 %v7039_v12, %v7032_v11 }
 0xae2   : > { %9708 = vmatmul.mubr.f32.vlgmr.msra.gmra.mrb[20].mxu0 %v6479_v24  ;;  %v10059_v24 = vpack.c.bf16 %v12262_v46, %v12260_v45 }
 0xae3   : > { %10066 = vmatpush3.bf16.msra.mxu0 %v12192_v7  ;;  %9783 = vmatprep.mubr.msk.f32.mxu0 %vm11188_vm5, %v11189_v23  ;;  %v7019_v3 = vsub.f32 %v12260_v45, %v7018_v62  ;;  %v7034_v16 = vand.u32 4294901760, %v7033_v14  ;;  %v10083_v28 = vpack.c.bf16 %v7025_v63, %v7018_v62  ;;  %v7473_v14 = vld [vmem:[#allocation19] sm:$0xff] (!%p8890_p0) }
 0xae4   : > { %10067 = vmatprep.subr.bf16.mxu0 %v11187_v22 }
 0xae5   : > { %v7020_v6 = vand.u32 4294901760, %v7019_v3  ;;  %v10050_v18 = vpack.c.bf16 %v7041_v17, %v7034_v16  ;;  %v7457_v3 = vsub.s32 3, %v12155_v0  ;;  %v7475_v16 = vld [vmem:[#allocation19 + $0x10] sm:$0xff] (!%p8890_p0)  ;;  %v11206_v0 = vmov (!%p8890_p0), 0.0|0.0  }
 0xae6   : > { %v7488_v17 = vand.u32 (!%p8890_p0), 4294901760, %v7473_v14 }
 0xae7   : > { %10069 = vmatpush3.bf16.msra.mxu0 %v12238_v33  ;;  %v10047_v13 = vpack.c.bf16 %v7027_v10, %v7020_v6  ;;  %v7463_v10 = vrot.slane %v12158_v5, %v7462_v4 }
 0xae8   : > { %10070 = vmatprep.subr.bf16.mxu0 %v11187_v22 }
 0xaeb   : > { %10072 = vmatpush3.bf16.msra.mxu0 %v12246_v1 }
 0xaec   : > { %10073 = vmatprep.subr.bf16.mxu0 %v11187_v22 }
 0xaef   : > { %10075 = vmatpush3.bf16.msra.mxu0 %v12254_v42 }
 0xaf0   : > { %10088 = vmatprep.subr.bf16.mxu0 %v11187_v22 }
 0xbb5   : > { %v6891_v31 = vpop.f32.mrb[20].mxu0 }
 0xbb6   : > { %v10147_v32 = vadd.f32 %v8889_v30, %v6891_v31  ;;  %v9709_v34 = vpop.f32.mrb[21].mxu0 }
 0xbb8   : > { %v6895_v8 = vmax.f32 %v10147_v32, 0.0 }
 0xbba   : > { %v6902_v9 = vsel %vm6900_vm10, %v6895_v8, 0 }
 0xbbb   : > { %v6977_v35 = vand.u32 4294901760, %v6902_v9 }
 0xbbd   : > { %v6978_v36 = vsub.f32 %v6902_v9, %v6977_v35 }
 0xbbf   : > { %v6979_v37 = vand.u32 4294901760, %v6978_v36 }
 0xbc1   : > { %9784 = vmatmul.mubr.f32.vlgmr.msra.gmra.mrb[22].mxu0 %v6979_v37  ;;  %v6980_v38 = vsub.f32 %v6978_v36, %v6979_v37 }
 0xbc2   : > { %10090 = vmatpush3.bf16.msra.mxu0 %v12192_v7  ;;  %9821 = vmatprep.mubr.msk.f32.mxu0 %vm11188_vm5, %v11189_v23 }
 0xbc3   : > { %10091 = vmatprep.subr.bf16.mxu0 %v11187_v22  ;;  %v6981_v39 = vand.u32 4294901760, %v6980_v38 }
 0xbc5   : > { %9727 = vmatmul.mubr.f32.vlgmr.msra.gmra.mrb[24].mxu1 %v6981_v39 }
 0xbc6   : > { %10042 = vmatpush3.bf16.msra.mxu1 %v10041_v57  ;;  %10093 = vmatpush3.bf16.msra.mxu0 %v12238_v33 }
 0xbc7   : > { %10043 = vmatprep.subr.bf16.mxu1 %v11187_v22  ;;  %10094 = vmatprep.subr.bf16.mxu0 %v11187_v22 }
 0xbc8   : > { %9745 = vmatprep.mubr.msk.f32.mxu1 %vm11188_vm5, %v11189_v23 }
 0xbca   : > { %10045 = vmatpush3.bf16.msra.mxu1 %v10044_v2  ;;  %10096 = vmatpush3.bf16.msra.mxu0 %v12246_v1 }
 0xbcb   : > { %10046 = vmatprep.subr.bf16.mxu1 %v11187_v22  ;;  %10097 = vmatprep.subr.bf16.mxu0 %v11187_v22 }
 0xbce   : > { %10048 = vmatpush3.bf16.msra.mxu1 %v10047_v13  ;;  %10099 = vmatpush3.bf16.msra.mxu0 %v12254_v42  ;;  %v6899_v42 = vrot.slane %v12158_v5, %v6898_v41 }
 0xbcf   : > { %10049 = vmatprep.subr.bf16.mxu1 %v11187_v22  ;;  %10106 = vmatprep.subr.bf16.mxu0 (!%p8890_p0), %v11206_v0 }
 0xbd1   : > { %9822 = vmatmul.mubr.f32.vlgmr.msra.gmra.mrb[24].mxu0 %v6977_v35 }
 0xbd2   : > { %10051 = vmatpush3.bf16.msra.mxu1 %v10050_v18  ;;  %v7476_v18 = vld [vmem:[#allocation19 + $0x18] sm:$0xff] (!%p8890_p0) }
 0xbd3   : > { %10052 = vmatprep.subr.bf16.mxu1 %v11187_v22 }
 0xbd5   : > { %9746 = vmatmul.mubr.f32.vlgmr.msra.gmra.mrb[26].mxu1 %v6977_v35 }
 0xbd6   : > { %10054 = vmatpush3.bf16.msra.mxu1 %v10053_v19  ;;  %9764 = vmatprep.mubr.msk.f32.mxu1 %vm11188_vm5, %v11189_v23  ;;  %v7494_v19 = vand.u32 (!%p8890_p0), 4294901760, %v7475_v16 }
 0xbd7   : > { %10055 = vmatprep.subr.bf16.mxu1 %v11187_v22 }
 0xbd8   : > { %v7582_v30 = vsub.f32 (!%p8890_p0), %v7475_v16, %v7494_v19 }
 0xbda   : > { %10057 = vmatpush3.bf16.msra.mxu1 %v10056_v21  ;;  %v11208_v21 = vmov (!%p8890_p0), 0.0  }
 0xbdb   : > { %10058 = vmatprep.subr.bf16.mxu1 %v11187_v22  ;;  %9843 = vmatprep.mubr.msk.f32.mxu0 (!%p8890_p0), %vm11207_vm11, %v11208_v21 }
 0xbde   : > { %10060 = vmatpush3.bf16.msra.mxu1 %v10059_v24 }
 0xbdf   : > { %10061 = vmatprep.subr.bf16.mxu1 %v11187_v22 }
 0xbe2   : > { %10063 = vmatpush3.bf16.msra.mxu1 %v10062_v25  ;;  %v7497_v25 = vand.u32 (!%p8890_p0), 4294901760, %v7476_v18 }
 0xbe3   : > { %10076 = vmatprep.subr.bf16.mxu1 %v11187_v22 }
 0xbe4   : > { %v7589_v32 = vsub.f32 (!%p8890_p0), %v7476_v18, %v7497_v25 }
 0xbe5   : > { %9765 = vmatmul.mubr.f32.vlgmr.msra.gmra.mrb[28].mxu1 %v6978_v36 }
 0xbe6   : > { %10078 = vmatpush3.bf16.msra.mxu1 %v10077_v26  ;;  %9802 = vmatprep.mubr.msk.f32.mxu1 %vm11188_vm5, %v11189_v23  ;;  %v7590_v36 = vand.u32 (!%p8890_p0), 4294901760, %v7589_v32 }
 0xbe7   : > { %10079 = vmatprep.subr.bf16.mxu1 %v11187_v22 }
 0xbea   : > { %10081 = vmatpush3.bf16.msra.mxu1 %v10080_v27  ;;  %v7470_v27 = vld [vmem:[#allocation3] sm:$0x1] (!%p8890_p0) }
 0xbeb   : > { %10082 = vmatprep.subr.bf16.mxu1 %v11187_v22  ;;  %7471 = vst.msk [vmem:[%s12737_s15] sm:$0x1] (!%p8890_p0), %vm5865_vm9, %v7470_v27 }
 0xbee   : > { %10084 = vmatpush3.bf16.msra.mxu1 %v10083_v28  ;;  %v7568_v28 = vsub.f32 (!%p8890_p0), %v7473_v14, %v7488_v17 }
 0xbef   : > { %10085 = vmatprep.subr.bf16.mxu1 %v11187_v22 }
 0xbf0   : > { %v7569_v8 = vand.u32 (!%p8890_p0), 4294901760, %v7568_v28 }
 0xbf2   : > { %10087 = vmatpush3.bf16.msra.mxu1 %v10086_v29  ;;  %v7570_v38 = vsub.f32 (!%p8890_p0), %v7568_v28, %v7569_v8 }
 0xbf3   : > { %10100 = vmatprep.subr.bf16.mxu1 (!%p8890_p0), %v11206_v0 }
 0xbf4   : > { %v7571_v41 = vand.u32 (!%p8890_p0), 4294901760, %v7570_v38 }
 0xbf5   : > { %9803 = vmatmul.mubr.f32.vlgmr.msra.gmra.mrb[30].mxu1 %v6977_v35  ;;  %v7583_v35 = vand.u32 (!%p8890_p0), 4294901760, %v7582_v30 }
 0xbf6   : > { %9832 = vmatprep.mubr.msk.f32.mxu1 (!%p8890_p0), %vm11207_vm11, %v11208_v21 }
 0xc94   : > { %v7263_v7 = vpop.f32.mrb[22].mxu0 }
 0xc95   : > { %v9785_v33 = vpop.f32.mrb[23].mxu0 }
 0xc96   : > { %v10104_v33 = vpack.c.bf16 (!%p8890_p0), %v7497_v25, %v7494_v19 }
 0xc98   : > { %v6983_v1 = vpop.f32.mrb[24].mxu1 }
 0xc99   : > { %v9728_v40 = vpop.f32.mrb[25].mxu1  ;;  %v6984_v44 = vadd.f32 %v6983_v1, %v6899_v42  ;;  %v7591_v1 = vsub.f32 (!%p8890_p0), %v7589_v32, %v7590_v36 }
 0xca4   : > { %v7437_v43 = vpop.f32.mrb[24].mxu0 }
 0xca5   : > { %v9823_v23 = vpop.f32.mrb[25].mxu0 }
 0xca6   : > { %v7592_v23 = vand.u32 (!%p8890_p0), 4294901760, %v7591_v1 }
 0xca8   : > { %v7094_v45 = vpop.f32.mrb[26].mxu1 }
 0xca9   : > { %v7095_v46 = vadd.f32 %v7094_v45, %v6984_v44  ;;  %v9747_v47 = vpop.f32.mrb[27].mxu1 }
 0xcb8   : > { %v7182_v48 = vpop.f32.mrb[28].mxu1 }
 0xcb9   : > { %v7183_v49 = vadd.f32 %v7182_v48, %v7095_v46  ;;  %v9766_v50 = vpop.f32.mrb[29].mxu1  ;;  %v10116_v48 = vpack.c.bf16 (!%p8890_p0), %v7589_v32, %v7582_v30 }
 0xcba   : > { %v10128_v50 = vpack.c.bf16 (!%p8890_p0), %v7590_v36, %v7583_v35 }
 0xcbb   : > { %v7264_v22 = vadd.f32 %v7263_v7, %v7183_v49  ;;  %v7584_v7 = vsub.f32 (!%p8890_p0), %v7582_v30, %v7583_v35 }
 0xcc8   : > { %v7358_v51 = vpop.f32.mrb[30].mxu1 }
 0xcc9   : > { %v7359_v52 = vadd.f32 %v7358_v51, %v7264_v22  ;;  %v9804_v53 = vpop.f32.mrb[31].mxu1 }
 0xccb   : > { %v7438_v55 = vadd.f32 %v7437_v43, %v7359_v52  ;;  %v7585_v43 = vand.u32 (!%p8890_p0), 4294901760, %v7584_v7  ;;  %v8891_v52 = vld [vmem:[#allocation21] ss:$0 sm:$0xff] (!%p8890_p0) }
 0xccd   : > { %v7441_v54 = vadd.f32 %v7438_v55, %v12204_v20  ;;  %v7458_v20 = vrot.slane %v12158_v5, %v7457_v3  ;;  %v7491_v5 = vand.u32 (!%p8890_p0), 4294901760, %v7474_v15  ;;  %v10110_v46 = vpack.c.bf16 (!%p8890_p0), %v7592_v23, %v7585_v43 }
 0xccf   : > { %v7442_v56 = vsel %vm1233_vm4, %v7441_v54, 0.0  ;;  %v7575_v29 = vsub.f32 (!%p8890_p0), %v7474_v15, %v7491_v5  ;;  %v10101_v31 = vpack.c.bf16 (!%p8890_p0), %v7491_v5, %v7488_v17 }
 0xcd0   : > { %7443 = vadd.xlane.f32.xlu0 %v7442_v56 }
 0xcd1   : > { %v7576_v9 = vand.u32 (!%p8890_p0), 4294901760, %v7575_v29  ;;  %10102 = vmatpush3.bf16.msra.mxu1 (!%p8890_p0), %v10101_v31  ;;  %v10113_v47 = vpack.c.bf16 (!%p8890_p0), %v7575_v29, %v7568_v28 }
 0xcd2   : > { %10103 = vmatprep.subr.bf16.mxu1 (!%p8890_p0), %v11206_v0 }
 0xcd3   : > { %v7577_v39 = vsub.f32 (!%p8890_p0), %v7575_v29, %v7576_v9  ;;  %v10125_v49 = vpack.c.bf16 (!%p8890_p0), %v7576_v9, %v7569_v8 }
 0xcd5   : > { %v7578_v42 = vand.u32 (!%p8890_p0), 4294901760, %v7577_v39  ;;  %10105 = vmatpush3.bf16.msra.mxu1 (!%p8890_p0), %v10104_v33 }
 0xcd6   : > { %9890 = vmatprep.subr.mxu1 (!%p8890_p0), %v11208_v21 }
 0xcd7   : > { %v10107_v45 = vpack.c.bf16 (!%p8890_p0), %v7578_v42, %v7571_v41 }
 0xcd9   : > { %10108 = vmatpush3.bf16.msra.mxu0 (!%p8890_p0), %v10107_v45 }
 0xcda   : > { %10109 = vmatprep.subr.bf16.mxu0 (!%p8890_p0), %v11206_v0 }
 0xcdd   : > { %10111 = vmatpush3.bf16.msra.mxu0 (!%p8890_p0), %v10110_v46 }
 0xcde   : > { %10112 = vmatprep.subr.bf16.mxu0 (!%p8890_p0), %v11206_v0 }
 0xd5d   : > { %v7444_v57 = vpop.xlane.xlu0 %7443 }
 0xd5e   : > { %v7445_v58 = vmul.f32 0.03125, %v7444_v57 }
 0xd60   : > { %v7446_v59 = vsub.f32 %v7441_v54, %v7445_v58  ;;  %v7974_v58 = vld [vmem:[#allocation22] sm:$0x3] (!%p8890_p0) }
 0xd62   : > { %v7447_v60 = vmul.f32 %v7446_v59, %v7446_v59 }
 0xd64   : > { %v7448_v61 = vsel %vm1233_vm4, %v7447_v60, 0.0  ;;  %v7984_v60 = vsel (!%p8890_p0), %vm5880_vm7, %v7974_v58, 0 }
 0xd65   : > { %7449 = vadd.xlane.f32.xlu0 %v7448_v61  ;;  %v8054_v61 = vand.u32 (!%p8890_p0), 4294901760, %v7984_v60 }
 0xdf2   : > { %v7450_v62 = vpop.xlane.xlu0 %7449 }
 0xdf3   : > { %v7451_v63 = vmul.f32 0.03125, %v7450_v62  ;;  %v8055_v62 = vsub.f32 (!%p8890_p0), %v7984_v60, %v8054_v61 }
 0xdf5   : > { %v7452_v2 = vadd.f32 1e-05, %v7451_v63  ;;  %v8056_v63 = vand.u32 (!%p8890_p0), 4294901760, %v8055_v62 }
 0xdf7   : > { %10551 = vrsqrt.f32 %v7452_v2  ;;  %v8057_v2 = vsub.f32 (!%p8890_p0), %v8055_v62, %v8056_v63 }
 0xe01   : > { %v10552_v6 = vpop.eup %10551 }
 0xe02   : > { %v7454_v11 = vmul.f32 %v10552_v6, %v7446_v59  ;;  %7469 = sbr.rel (%p8890_p0) target bundleno = 4245 (0x1095), region = 124  ;;  %v11210_v59 = vmov (!%p8890_p0), 0   ;;  %v8058_v6 = vand.u32 (!%p8890_p0), 4294901760, %v8057_v2 }
 0xe03   : > { %10554 = vset.pattern.permute.xlu0 (!%p8890_p0), %v11210_v59 }
 0xe04   : > { %v7459_v12 = vmul.f32 %v7458_v20, %v7454_v11 }
 0xe06   : > { %v7464_v13 = vadd.f32 %v7463_v10, %v7459_v12 }
 0xe08   : > { %7465 = vst.msk [vmem:[#allocation2] sm:$0xff] %vm1233_vm4, %v7464_v13  ;;  %7472 = vst.msk [vmem:[%s12651_s21] sm:$0xff] (!%p8890_p0), %vm1233_vm4, %v7464_v13  ;;  %v7485_v24 = vsel (!%p8890_p0), %vm1233_vm4, %v7464_v13, 0 }
 0xe09   : > { %v12341_v26 = vand.u32 4294901760, %v7485_v24 }
 0xe0b   : > { %v7557_v34 = vsub.f32 %v7485_v24, %v12341_v26  ;;  %9844 = vmatmul.mubr.f32.vlgmr.msra.gmra.mrb[0].mxu0 %v12341_v26 }
 0xe0c   : > { %10114 = vmatpush3.bf16.msra.mxu0 %v10113_v47  ;;  %9854 = vmatprep.mubr.msk.f32.mxu0 %vm11207_vm11, %v11208_v21 }
 0xe0d   : > { %v7558_v37 = vand.u32 4294901760, %v7557_v34  ;;  %10115 = vmatprep.subr.bf16.mxu0 %v11206_v0 }
 0xe0f   : > { %v7559_v40 = vsub.f32 %v7557_v34, %v7558_v37 }
 0xe10   : > { %10117 = vmatpush3.bf16.msra.mxu0 %v10116_v48 }
 0xe11   : > { %v7560_v44 = vand.u32 4294901760, %v7559_v40  ;;  %10118 = vmatprep.subr.bf16.mxu0 %v11206_v0 }
 0xe13   : > { %9833 = vmatmul.mubr.f32.vlgmr.msra.gmra.mrb[0].mxu1 %v7560_v44  ;;  %9855 = vmatmul.mubr.f32.vlgmr.msra.gmra.mrb[0].mxu0 %v7557_v34 }
 0xe14   : > { %9892 = vmatprep.mubr.msk.f32.mxu1 %vm11207_vm11, %v11208_v21  ;;  %10120 = vmatpush3.bf16.msra.mxu0 %v10101_v31 }
 0xe15   : > { %9865 = vmatprep.mubr.msk.f32.mxu0 %vm11207_vm11, %v11208_v21  ;;  %10121 = vmatprep.subr.bf16.mxu0 %v11206_v0 }
 0xe18   : > { %10123 = vmatpush3.bf16.msra.mxu0 %v10104_v33 }
 0xe19   : > { %10124 = vmatprep.subr.bf16.mxu0 %v11206_v0 }
 0xe1b   : > { %9866 = vmatmul.mubr.f32.vlgmr.msra.gmra.mrb[0].mxu0 %v7558_v37 }
 0xe1c   : > { %10126 = vmatpush3.bf16.msra.mxu0 %v10125_v49  ;;  %9876 = vmatprep.mubr.msk.f32.mxu0 %vm11207_vm11, %v11208_v21 }
 0xe1d   : > { %10127 = vmatprep.subr.bf16.mxu0 %v11206_v0 }
 0xe20   : > { %10129 = vmatpush3.bf16.msra.mxu0 %v10128_v50 }
 0xe21   : > { %10130 = vmatprep.subr.bf16.mxu0 %v11206_v0 }
 0xe23   : > { %9877 = vmatmul.mubr.f32.vlgmr.msra.gmra.mrb[0].mxu0 %v12341_v26 }
 0xe24   : > { %10132 = vmatpush3.bf16.msra.mxu0 %v10101_v31  ;;  %9887 = vmatprep.mubr.msk.f32.mxu0 %vm11207_vm11, %v11208_v21 }
 0xe25   : > { %10133 = vmatprep.subr.bf16.mxu0 %v11206_v0 }
 0xe28   : > { %10135 = vmatpush3.bf16.msra.mxu0 %v10104_v33 }
 0xe2b   : > { %9888 = vmatmul.mubr.f32.vlgmr.msra.gmra.mrb[0].mxu0 %v12341_v26 }
 0xee6   : > { %v7562_v22 = vpop.f32.mrb[0].mxu1 }
 0xee7   : > { %v9834_v51 = vpop.f32.mrb[1].mxu1  ;;  %v7563_v53 = vadd.f32 %v8891_v52, %v7562_v22 }
 0xefe   : > { %v7968_v55 = vpop.f32.mrb[0].mxu0 }
 0xeff   : > { %v10247_v54 = vadd.f32 %v7968_v55, %v7563_v53  ;;  %v9889_v56 = vpop.f32.mrb[1].mxu0 }
 0xf01   : > { %7972 = vst.msk [vmem:[%s12738_s2] sm:$0xff] %vm5882_vm8, %v10247_v54  ;;  %v7973_v57 = vmax.f32 %v10247_v54, 0.0 }
 0xf03   : > { %7980 = vrot.lane.b32.xlu0 %v7973_v57, %s11209_s16 }
 0xf07   : > { %7977 = vperm.xlu0 %10554, %v7974_v58  }
 0xf75   : > { %v7981_v3 = vpop.permute.xlu0 %7980 }
 0xf76   : > { %v7986_v4 = vsel %vm5880_vm7, %v7981_v3, 0 }
 0xf77   : > { %v7989_v20 = vand.u32 4294901760, %v7986_v4 }
 0xf79   : > { %v8066_v10 = vsub.f32 %v7986_v4, %v7989_v20  ;;  %9891 = vmatpush3.xpose.msra.mxu1 %v7989_v20 }
 0xf7a   : > { %9895 = vmatprep.subr.mxu1 %v11208_v21 }
 0xf7b   : > { %v8067_v11 = vand.u32 4294901760, %v8066_v10 }
 0xf7c   : > { %9893 = vmatmul.mubr.f32.vlgmr.msra.gmra.mrb[2].mxu1 %v8058_v6 }
 0xf7d   : > { %v8068_v12 = vsub.f32 %v8066_v10, %v8067_v11  ;;  %9897 = vmatprep.mubr.msk.f32.mxu1 %vm11207_vm11, %v11208_v21 }
 0xf7f   : > { %v8069_v13 = vand.u32 4294901760, %v8068_v12 }
 0xf81   : > { %9896 = vmatpush3.xpose.msra.mxu1 %v8069_v13 }
 0xf82   : > { %9900 = vmatprep.subr.mxu1 %v11208_v21 }
 0xf84   : > { %9898 = vmatmul.mubr.f32.vlgmr.msra.gmra.mrb[2].mxu1 %v8054_v61 }
 0xf85   : > { %9901 = vmatpush3.xpose.msra.mxu1 %v8066_v10  ;;  %9902 = vmatprep.mubr.msk.f32.mxu1 %vm11207_vm11, %v11208_v21 }
 0xf86   : > { %9905 = vmatprep.subr.mxu1 %v11208_v21  ;;  %v7978_v14 = vpop.permute.xlu0 %7977 }
 0xf87   : > { %v7982_v15 = vrot.slane %v7978_v14, 1 }
 0xf8c   : > { %9903 = vmatmul.mubr.f32.vlgmr.msra.gmra.mrb[2].mxu1 %v8055_v62 }
 0xf8d   : > { %9906 = vmatpush3.xpose.msra.mxu1 %v7989_v20  ;;  %9907 = vmatprep.mubr.msk.f32.mxu1 %vm11207_vm11, %v11208_v21 }
 0xf8e   : > { %9910 = vmatprep.subr.mxu1 %v11208_v21 }
 0xf94   : > { %9908 = vmatmul.mubr.f32.vlgmr.msra.gmra.mrb[2].mxu1 %v8056_v63 }
 0xf95   : > { %9911 = vmatpush3.xpose.msra.mxu1 %v8067_v11  ;;  %9912 = vmatprep.mubr.msk.f32.mxu1 %vm11207_vm11, %v11208_v21 }
 0xf96   : > { %9915 = vmatprep.subr.mxu1 %v11208_v21 }
 0xf9c   : > { %9913 = vmatmul.mubr.f32.vlgmr.msra.gmra.mrb[2].mxu1 %v8054_v61 }
 0xf9d   : > { %9916 = vmatpush3.xpose.msra.mxu1 %v7989_v20  ;;  %9917 = vmatprep.mubr.msk.f32.mxu1 %vm11207_vm11, %v11208_v21 }
 0xfa4   : > { %9918 = vmatmul.mubr.f32.vlgmr.msra.gmra.mrb[2].mxu1 %v8054_v61 }
0x1077   : > { %v8430_v16 = vpop.f32.mrb[2].mxu1 }
0x1078   : > { %v10248_v0 = vadd.f32 %v8430_v16, %v7982_v15  ;;  %v9919_v17 = vpop.f32.mrb[3].mxu1 }
0x107a   : > { %v8892_v5 = vmul.f32 -1.442695, %v10248_v0 }
0x107c   : > { %10555 = vpow2.f32 %v8892_v5 }
0x1086   : > { %v10556_v18 = vpop.eup %10555 }
0x1087   : > { %v8437_v19 = vadd.f32 1.0, %v10556_v18 }
0x1089   : > { %10557 = vrcp.f32 %v8437_v19 }
0x1093   : > { %v10558_v24 = vpop.eup %10557 }
0x1094   : > { %8440 = vst.msk [vmem:[%s12739_s3] sm:$0x1] %vm5865_vm9, %v10558_v24 }
0x1095 PF: > { %s12740_s1 = sld [smem:[#allocation49_spill]]  ;;  %s12741_s6 = sld [smem:[#allocation46_spill]] }
0x1096   : > { %s12742_s16 = sld [smem:[#allocation66_spill]]  ;;  %s12743_s21 = scalar_lea.vmem [#allocation25], %s11745_s19 }
0x1097   : > { %s8486_s9 = sshll.u32 %s12743_s21, 4  ;;  %p12744_p8 = scmp.ne.s32.totalorder %s12713_s14, 0  ;;  %s12408_s9 = int_to_ptr.vmem [resolvable:$true] %s8486_s9 }
0x1098   : > { %s10897_s11 = scalar_lea.vmem %s12408_s9, 16  ;;  %s11211_s13 = smov [#allocation25]  }
0x1099   : > { %p10898_p13 = scmp.ne.s32.totalorder %s12408_s9, %s10897_s11  ;;  %s10901_s15 = sshll.u32 %s11211_s13, 4  ;;  %s10902_s15 = int_to_ptr.vmem [resolvable:$false] %s10901_s15 }
0x109a   : > { %s10903_s2 = scalar_lea.vmem %s10902_s15, 32  ;;  %p10904_p12 = scmp.lt.s32.totalorder %s12408_s9, %s10902_s15 }
0x109b   : > { %s12654_s5 = sand.u32 1, %s12740_s1   ;;  %s12653_s27 = sshll.u32 %s12741_s6, 4 }
0x109c   : > { %s12404_s18 = scalar_lea.hbm %s12742_s16, %s12653_s27  ;;  %s12413_s10 = scalar_lea.sflag [#allocation26], %s12654_s5 }
0x109d   : > { %p10899_p5 = pnand %p10898_p13, %p12744_p8  ;;  %p10905_p4 = scmp.lt.s32.totalorder %s10903_s2, %s10897_s11 }
0x109f   : > { %p10900_p3 = pneg %p10899_p5  ;;  %p10906_p11 = por %p10905_p4, %p10904_p12 }
0x10a1   : > { %p10907_p1 = pnand %p10906_p11, %p10900_p3 }
0x10a3   : > { %10910 = shalt.err (!%p10907_p1)
}
0x10a4   : > { %s10911_s21 = scalar_lea.hbm %s12404_s18, 16  ;;  %s10915_s13 = scalar_lea.hbm %s12742_s16, 32 }
0x10a5   : > { %p10912_p10 = scmp.ne.s32.totalorder %s12404_s18, %s10911_s21  ;;  %p10916_p7 = scmp.lt.u32.totalorder %s12404_s18, %s12742_s16 }
0x10a6   : > { %p10917_p6 = scmp.lt.u32.totalorder %s10915_s13, %s10911_s21  ;;  %p10919_p13 = scmp.lt.u32.totalorder %s10911_s21, %s12404_s18 }
0x10a7   : > { %p10913_p2 = pnand %p10912_p10, %p12744_p8 }
0x10a8   : > { %p10918_p0 = por %p10917_p6, %p10916_p7 }
0x10a9   : > { %p10914_p9 = pneg %p10913_p2 }
0x10aa   : > { %p10920_p5 = por %p10919_p13, %p10918_p0 }
0x10ac   : > { %p10921_p3 = pnand %p10920_p5, %p10914_p9 }
0x10ae   : > { %10924 = shalt.err (!%p10921_p3)
}
0x10af   : > { %10314 = dma.vmem_to_hbm [thread:$0]  (%p12744_p8), %s12408_s9, 16, %s12404_s18, %s12413_s10  }
0x10b0   : > { %s12745_s11 = sshll.u32 %s12741_s6, 7  ;;  %s12746_s3 = sld [smem:[#allocation68_spill]] }
0x10b1   : > { %s12747_s21 = scalar_lea.vmem [#allocation28], %s11748_s23  ;;  %s12748_s15 = sand.u32 1, %s12740_s1  }
0x10b2   : > { %s8512_s13 = sshll.u32 %s12747_s21, 4  ;;  %s12448_s16 = scalar_lea.sflag [#allocation29], %s12748_s15  ;;  %s8513_s13 = int_to_ptr.vmem [resolvable:$true] %s8512_s13 }
0x10b3   : > { %s10925_s28 = scalar_lea.vmem %s8513_s13, 128  ;;  %s11212_s12 = smov [#allocation28]  }
0x10b4   : > { %p10926_p12 = scmp.ne.s32.totalorder %s8513_s13, %s10925_s28  ;;  %s10929_s30 = sshll.u32 %s11212_s12, 4  ;;  %s10930_s30 = int_to_ptr.vmem [resolvable:$false] %s10929_s30 }
0x10b5   : > { %s10931_s9 = scalar_lea.vmem %s10930_s30, 256  ;;  %p10932_p1 = scmp.lt.s32.totalorder %s8513_s13, %s10930_s30 }
0x10b6   : > { %s12442_s2 = scalar_lea.hbm %s12746_s3, %s12745_s11  ;;  %p10927_p4 = pnand %p10926_p12, %p12744_p8 }
0x10b7   : > { %p10933_p10 = scmp.lt.s32.totalorder %s10931_s9, %s10925_s28 }
0x10b8   : > { %p10928_p11 = pneg %p10927_p4 }
0x10b9   : > { %p10934_p2 = por %p10933_p10, %p10932_p1 }
0x10bb   : > { %p10935_p9 = pnand %p10934_p2, %p10928_p11 }
0x10bd   : > { %10938 = shalt.err (!%p10935_p9)
}
0x10be   : > { %s10939_s18 = scalar_lea.hbm %s12442_s2, 128  ;;  %s10943_s12 = scalar_lea.hbm %s12746_s3, 256 }
0x10bf   : > { %p10940_p7 = scmp.ne.s32.totalorder %s12442_s2, %s10939_s18  ;;  %p10944_p13 = scmp.lt.u32.totalorder %s12442_s2, %s12746_s3 }
0x10c0   : > { %p10945_p5 = scmp.lt.u32.totalorder %s10943_s12, %s10939_s18  ;;  %p10947_p12 = scmp.lt.u32.totalorder %s10939_s18, %s12442_s2 }
0x10c1   : > { %p10941_p6 = pnand %p10940_p7, %p12744_p8 }
0x10c2   : > { %p10946_p3 = por %p10945_p5, %p10944_p13 }
0x10c3   : > { %p10942_p0 = pneg %p10941_p6 }
0x10c4   : > { %p10948_p4 = por %p10947_p12, %p10946_p3 }
0x10c6   : > { %p10949_p11 = pnand %p10948_p4, %p10942_p0 }
0x10c8   : > { %10952 = shalt.err (!%p10949_p11)
}
0x10c9   : > { %10316 = dma.vmem_to_hbm [thread:$0]  (%p12744_p8), %s8513_s13, 128, %s12442_s2, %s12448_s16  }
0x10ca   : > { %s12749_s28 = sshll.u32 %s12741_s6, 7  ;;  %s12750_s15 = sld [smem:[#allocation65_spill]] }
0x10cb   : > { %s12751_s18 = scalar_lea.vmem [#allocation24], %s11748_s23  ;;  %s12752_s11 = sshll.u32 %s12741_s6, 4 }
0x10cc   : > { %s8473_s1 = sshll.u32 %s12751_s18, 4  ;;  %s12753_s30 = sld [smem:[#allocation67_spill]]  ;;  %s12477_s1 = int_to_ptr.vmem [resolvable:$true] %s8473_s1 }
0x10cd   : > { %s8442_s2 = scalar_lea.sflag [#allocation6], %s11745_s19  ;;  %s10953_s13 = scalar_lea.vmem %s12477_s1, 128 }
0x10ce   : > { %p10954_p1 = scmp.ne.s32.totalorder %s12477_s1, %s10953_s13 }
0x10d0   : > { %s12473_s9 = scalar_lea.hbm %s12750_s15, %s12749_s28  ;;  %p10955_p10 = pnand %p10954_p1, %p12744_p8 }
0x10d1   : > { %s11213_s28 = smov [#allocation24]  }
0x10d2   : > { %s12754_s3 = smov %s12753_s30  ;;  %s12484_s29 = scalar_lea.hbm %s12753_s30, %s12752_s11 }
0x10d3   : > { %p10956_p2 = pneg %p10955_p10  ;;  %s10957_s23 = sshll.u32 %s11213_s28, 4  ;;  %s10958_s23 = int_to_ptr.vmem [resolvable:$false] %s10957_s23 }
0x10d4   : > { %s10959_s27 = scalar_lea.vmem %s10958_s23, 256  ;;  %p10960_p9 = scmp.lt.s32.totalorder %s12477_s1, %s10958_s23 }
0x10d5   : > { %p10961_p7 = scmp.lt.s32.totalorder %s10959_s27, %s10953_s13 }
0x10d7   : > { %p10962_p6 = por %p10961_p7, %p10960_p9 }
0x10d9   : > { %p10963_p0 = pnand %p10962_p6, %p10956_p2 }
0x10db   : > { %10966 = shalt.err (!%p10963_p0)
}
0x10dc   : > { %s10967_s21 = scalar_lea.hbm %s12473_s9, 128  ;;  %s10971_s12 = scalar_lea.hbm %s12750_s15, 256 }
0x10dd   : > { %p10968_p13 = scmp.ne.s32.totalorder %s12473_s9, %s10967_s21  ;;  %p10972_p12 = scmp.lt.u32.totalorder %s12473_s9, %s12750_s15 }
0x10de   : > { %p10973_p4 = scmp.lt.u32.totalorder %s10971_s12, %s10967_s21  ;;  %p10975_p1 = scmp.lt.u32.totalorder %s10967_s21, %s12473_s9 }
0x10df   : > { %p10969_p5 = pnand %p10968_p13, %p12744_p8 }
0x10e0   : > { %p10974_p11 = por %p10973_p4, %p10972_p12 }
0x10e1   : > { %p10970_p3 = pneg %p10969_p5 }
0x10e2   : > { %p10976_p10 = por %p10975_p1, %p10974_p11 }
0x10e4   : > { %p10977_p2 = pnand %p10976_p10, %p10970_p3 }
0x10e6   : > { %10980 = shalt.err (!%p10977_p2)
}
0x10e7   : > { %s12755_s13 = sld [smem:[#allocation45_spill]]  ;;  %s12756_s28 = scalar_lea.vmem [#allocation27], %s11745_s19 }
0x10e8   : > { %10313 = dma.vmem_to_hbm [thread:$0]  (%p12744_p8), %s12477_s1, 128, %s12473_s9, %s8442_s2  }
0x10e9   : > { %s8499_s23 = sshll.u32 %s12756_s28, 4  ;;  %s8900_s27 = sshll.u32 %s12741_s6, 1  ;;  %s8500_s23 = int_to_ptr.vmem [resolvable:$true] %s8499_s23 }
0x10ea   : > { %s10981_s11 = scalar_lea.vmem %s8500_s23, 16  ;;  %s11214_s21 = smov [#allocation27]  }
0x10eb   : > { %p10982_p9 = scmp.ne.s32.totalorder %s8500_s23, %s10981_s11  ;;  %s10985_s12 = sshll.u32 %s11214_s21, 4  ;;  %s10986_s12 = int_to_ptr.vmem [resolvable:$false] %s10985_s12 }
0x10ec   : > { %s10987_s5 = scalar_lea.vmem %s10986_s12, 32  ;;  %p10988_p0 = scmp.lt.s32.totalorder %s8500_s23, %s10986_s12 }
0x10ed   : > { %s12512_s18 = sadd.s32 %s12755_s13, %s8900_s27  ;;  %p10983_p7 = pnand %p10982_p9, %p12744_p8 }
0x10ee   : > { %p10989_p13 = scmp.lt.s32.totalorder %s10987_s5, %s10981_s11 }
0x10ef   : > { %p10984_p6 = pneg %p10983_p7 }
0x10f0   : > { %p10990_p5 = por %p10989_p13, %p10988_p0 }
0x10f2   : > { %p10991_p3 = pnand %p10990_p5, %p10984_p6 }
0x10f4   : > { %10994 = shalt.err (!%p10991_p3)
}
0x10f5   : > { %s10995_s19 = scalar_lea.hbm %s12484_s29, 16  ;;  %s10999_s1 = scalar_lea.hbm %s12754_s3, 32 }
0x10f6   : > { %p10996_p12 = scmp.ne.s32.totalorder %s12484_s29, %s10995_s19  ;;  %p11000_p1 = scmp.lt.u32.totalorder %s12484_s29, %s12754_s3 }
0x10f7   : > { %p11001_p10 = scmp.lt.u32.totalorder %s10999_s1, %s10995_s19  ;;  %p11003_p9 = scmp.lt.u32.totalorder %s10995_s19, %s12484_s29 }
0x10f8   : > { %p10997_p4 = pnand %p10996_p12, %p12744_p8 }
0x10f9   : > { %p11002_p2 = por %p11001_p10, %p11000_p1 }
0x10fa   : > { %p10998_p11 = pneg %p10997_p4 }
0x10fb   : > { %p11004_p7 = por %p11003_p9, %p11002_p2 }
0x10fd   : > { %p11005_p6 = pnand %p11004_p7, %p10998_p11 }
0x10ff   : > { %11008 = shalt.err (!%p11005_p6)
}
0x1100   : > { %10315 = dma.vmem_to_hbm [thread:$0]  (%p12744_p8), %s8500_s23, 16, %s12484_s29, %s12413_s10  }
0x1101   : > { %s8905_s13 = sshll.u32 %s12512_s18, 9  ;;  %s8527_s28 = sshll.u32 %s11785_s17, 4  ;;  %s12539_s28 = int_to_ptr.vmem [resolvable:$true] %s8527_s28 }
0x1102   : > { %s12757_s21 = sld [smem:[#allocation69_spill]]  ;;  %s11009_s19 = scalar_lea.vmem %s12539_s28, 512 }
0x1103   : > { %p11010_p0 = scmp.ne.s32.totalorder %s12539_s28, %s11009_s19  ;;  %p12759_p13 = scmp.ne.s32.totalorder %s12715_s7, 0 }
0x1104   : > { %s11215_s14 = smov [#allocation30]  }
0x1105   : > { %p11011_p5 = pnand %p11010_p0, %p12759_p13  ;;  %s11013_s6 = sshll.u32 %s11215_s14, 4  ;;  %s11014_s6 = int_to_ptr.vmem [resolvable:$false] %s11013_s6 }
0x1106   : > { %s11015_s10 = scalar_lea.vmem %s11014_s6, 1024  ;;  %p11016_p8 = scmp.lt.s32.totalorder %s12539_s28, %s11014_s6 }
0x1107   : > { %p11012_p3 = pneg %p11011_p5  ;;  %p11017_p12 = scmp.lt.s32.totalorder %s11015_s10, %s11009_s19 }
0x1108   : > { %s12758_s12 = smov %s12757_s21  ;;  %s12537_s5 = scalar_lea.hbm %s12757_s21, %s8905_s13 }
0x1109   : > { %p11018_p4 = por %p11017_p12, %p11016_p8 }
0x110b   : > { %p11019_p11 = pnand %p11018_p4, %p11012_p3 }
0x110d   : > { %11022 = shalt.err (!%p11019_p11)
}
0x110e   : > { %s11023_s29 = scalar_lea.hbm %s12537_s5, 512  ;;  %s11027_s18 = scalar_lea.hbm %s12758_s12, 2048 }
0x110f   : > { %p11024_p1 = scmp.ne.s32.totalorder %s12537_s5, %s11023_s29  ;;  %p11028_p9 = scmp.lt.u32.totalorder %s12537_s5, %s12758_s12 }
0x1110   : > { %p11029_p7 = scmp.lt.u32.totalorder %s11027_s18, %s11023_s29  ;;  %p11031_p0 = scmp.lt.u32.totalorder %s11023_s29, %s12537_s5 }
0x1111   : > { %p11025_p10 = pnand %p11024_p1, %p12759_p13 }
0x1112   : > { %p11030_p6 = por %p11029_p7, %p11028_p9 }
0x1113   : > { %p11026_p2 = pneg %p11025_p10 }
0x1114   : > { %p11032_p5 = por %p11031_p0, %p11030_p6 }
0x1116   : > { %p11033_p3 = pnand %p11032_p5, %p11026_p2 }
0x1118   : > { %11036 = shalt.err (!%p11033_p3)
}
0x1119   : > { %s11216_s2 = smov 128   ;;  %s12760_s30 = smov 8  }
0x111a   : > { %10317 = dma.vmem_to_hbm [thread:$0]  (%p12759_p13), %s12539_s28, 512, %s12537_s5, %s12448_s16, %s11216_s2, %s11216_s2, %s12760_s30  }
0x111b PF: > { %p10400_p8 = scmp.ge.s32.totalorder %s11167_s0, 2  ;;  %s8542_s13 = sand.u32 1, %s11139_s24  }
0x111c   : > { %p12761_p12 = scmp.ne.s32.totalorder %s12714_s20, 0  ;;  %s8543_s27 = scalar_lea.sflag [#allocation6], %s8542_s13 }
0x111e   : > { %p10362_p4 = pnand %p10400_p8, %p12761_p12 }
0x1120   : > { %11110 = dma.done.wait (!%p10362_p4), %s8543_s27, 128  }
0x1121   : > { %11112 = vsyncadd (!%p10362_p4), %s8543_s27, 4294967168  ;;  %s12762_s7 = sadd.s32 4294967294, %s11167_s0  }
0x1122   : > { %s8551_s11 = sand.u32 1, %s12762_s7  }
0x1123   : > { %s8552_s21 = scalar_lea.sflag [#allocation26], %s8551_s11 }
0x1124   : > { %11114 = dma.done.wait (!%p10362_p4), %s8552_s21, 32  }
0x1125   : > { %11116 = vsyncadd (!%p10362_p4), %s8552_s21, 4294967264  ;;  %s8568_s16 = scalar_lea.sflag [#allocation29], %s8551_s11 }
0x1126   : > { %11118 = dma.done.wait (!%p10362_p4), %s8568_s16, 128  }
0x1127   : > { %11120 = vsyncadd (!%p10362_p4), %s8568_s16, 4294967168  ;;  %p12763_p13 = scmp.ne.s32.totalorder %s12716_s8, 0 }
0x1129   : > { %p10374_p11 = pnand %p10400_p8, %p12763_p13 }
0x112b   : > { %11122 = dma.done.wait (!%p10374_p11), %s8568_s16, 512  }
0x112c   : > { %11124 = vsyncadd (!%p10374_p11), %s8568_s16, 4294966784  ;;  %s45_s0 = sadd.s32 1, %s11167_s0   ;;  %s12764_s21 = sld [smem:[#allocation43_spill]] }
0x112d   : > { %p42_p1 = scmp.ge.s32.totalorder %s45_s0, 6   ;;  %s12765_s24 = sld [smem:[#allocation44_spill]] }
0x112e   : > { %s12766_s20 = smov %s12783_s22  ;;  %s12767_s27 = sld [smem:[#allocation47_spill]] }
0x112f   : > { %s12768_s28 = sld [smem:[#allocation48_spill]]  ;;  %s12769_s29 = sld [smem:[#allocation51_spill]] }
0x1130   : > { %s12770_s30 = sld [smem:[#allocation52_spill]]  ;;  %s12772_s23 = smov %s12766_s20 }
0x1131   :  { %44 = sbr.rel (!%p42_p1) target bundleno = 37 (0x25), region = 238 }
0x1133   : > { %s12771_s22 = smov %s12765_s24  ;;  %s12773_s24 = smov %s11143_s25 }
0x1134   : > { %s12774_s25 = smov %s11147_s26  ;;  %s12775_s26 = smov %s11679_s4 }
0x1138   :  { %8582 = vsyncpa [#allocation5], 1 }
0x1139   :  { %8584 = vsyncpa [#allocation5 + $0x1], 1 }
0x113a   :  { %8585 = vsyncpa [#allocation8], 1 }
0x113b   :  { %8586 = vsyncpa [#allocation11], 1 }
0x113c   :  { %8587 = vsyncpa [#allocation14], 1 }
0x113d   :  { %8588 = vsyncpa [#allocation17], 1 }
0x113e   :  { %8589 = vsyncpa [#allocation20], 1 }
0x113f   :  { %8590 = vsyncpa [#allocation23], 1 }
0x1140   :  { %8591 = vsyncpa [#allocation6], 1 }
0x1141   :  { %8593 = vsyncpa [#allocation6 + $0x1], 1 }
0x1142   :  { %8594 = vsyncpa [#allocation26], 1 }
0x1143   :  { %8596 = vsyncpa [#allocation26 + $0x1], 1 }
0x1144   :  { %8597 = vsyncpa [#allocation29], 1 }
0x1145   :  { %8599 = vsyncpa [#allocation29 + $0x1], 1 }

</bundles_post_ra>
